<compile_context>
chip_gen: v6e
topology: v6e:2x2x1
jax: 0.10.0
libtpu: 0.0.40
codegen_flags: <defaults>
</compile_context>

<pallas_src>
import functools

import jax
import jax.numpy as jnp
from jax.experimental import pallas as pl
from jax.experimental.pallas import tpu as pltpu

HIGHEST = jax.lax.Precision.HIGHEST

# Static sizes implied by the module (flatten(32*6*6) => 28x28 input).
_HP = 30                      # padded input height/width (28 + 2*1)
_H1 = 28                      # conv1 output spatial (k3, s1, p1)
_H2 = 13                      # conv2 output spatial ((28-3)//2 + 1)
_H3 = 6                       # conv3 output spatial ((13-3)//2 + 1)
_C1, _C2, _C3 = 8, 16, 32
_W1 = _H1 * _C1               # 224: conv1 activation lane width, col*8  + c
_W2 = _H2 * _C2               # 208: conv2 activation lane width, col*16 + c
_W3 = _H3 * _C3               # 192: conv3 activation lane width, col*32 + c
_HID = 128


# ---------------------------------------------------------------------------
# Kernel: one grid step == one image. Everything stays in vregs / VMEM values.
# ---------------------------------------------------------------------------
def _encoder_kernel(x_ref, m1_ref, t1_ref, r2_ref, n2_ref, t2_ref,
                    r3_ref, n3_ref, b3_ref, wl1_ref, bl1_ref,
                    w23_ref, b23_ref, out_ref):
    f32 = jnp.float32
    x = x_ref[0]                                                  # (30, 30)

    # conv1 (1->8, k3 s1 p1) + BN1 + ReLU.  Width taps folded into M1.
    acc1 = jnp.dot(x[0:_H1, :], m1_ref[0], preferred_element_type=f32)
    acc1 = acc1 + jnp.dot(x[1:_H1 + 1, :], m1_ref[1], preferred_element_type=f32)
    acc1 = acc1 + jnp.dot(x[2:_H1 + 2, :], m1_ref[2], preferred_element_type=f32)
    a1 = jnp.maximum(acc1 + t1_ref[...], 0.0)                     # (28, 224)

    # conv2 (8->16, k3 s2) + BN2 + ReLU.
    acc2 = jnp.zeros((_H2, _W2), f32)
    for i in range(3):
        rows = jnp.dot(r2_ref[i], a1, preferred_element_type=f32)       # (13, 224)
        acc2 = acc2 + jnp.dot(rows, n2_ref[i], preferred_element_type=f32)
    a2 = jnp.maximum(acc2 + t2_ref[...], 0.0)                     # (13, 208)

    # conv3 (16->32, k3 s2) + bias + ReLU.
    acc3 = jnp.zeros((_H3, _W3), f32)
    for i in range(3):
        rows = jnp.dot(r3_ref[i], a2, preferred_element_type=f32)       # (6, 208)
        acc3 = acc3 + jnp.dot(rows, n3_ref[i], preferred_element_type=f32)
    a3 = jnp.maximum(acc3 + b3_ref[...], 0.0)                     # (6, 192)

    # flatten (NCHW permutation folded into wl1 rows) + linear1 + ReLU.
    h = bl1_ref[...]                                              # (1, 128)
    for r in range(_H3):
        h = h + jnp.dot(a3[r:r + 1, :], wl1_ref[r], preferred_element_type=f32)
    h = jnp.maximum(h, 0.0)

    # linear2 | linear3 merged into one matmul.
    out_ref[0] = jnp.dot(h, w23_ref[...], preferred_element_type=f32) + b23_ref[...]


# ---------------------------------------------------------------------------
# Wrapper: one-time parameter folding (constant-folds / runs once under jit).
# ---------------------------------------------------------------------------
def _sel(n_in, n_out, offset, stride):
    """One-hot selection matrix: S[r, o] = 1.0 where r == o*stride + offset."""
    r = jnp.arange(n_in)[:, None]
    o = jnp.arange(n_out)[None, :]
    return (r == o * stride + offset).astype(jnp.float32)


def encoder_forward(params, x_nchw, eps=1e-5):
    """x_nchw: (B, 1, 28, 28) f32 -> (mu, log_var), each (B, latent_dim)."""
    p = params
    assert x_nchw.shape[1:] == (1, 28, 28), x_nchw.shape
    B = x_nchw.shape[0]
    latent_dim = p["lin2_b"].shape[0]

    # NCHW -> (B, H, W) (Cin == 1), pad H/W by 1 for conv1.
    xpad = jnp.pad(x_nchw.reshape(B, 28, 28), ((0, 0), (1, 1), (1, 1)))  # (B,30,30)

    def bn_fold(gamma, beta, mean, var, conv_b):
        s = gamma / jnp.sqrt(var + eps)            # per-channel scale -> into W
        t = (conv_b - mean) * s + beta             # per-channel additive shift
        return s, t

    s1, t1 = bn_fold(p["bn1_gamma"], p["bn1_beta"], p["bn1_mean"], p["bn1_var"], p["conv1_b"])
    s2, t2 = bn_fold(p["bn2_gamma"], p["bn2_beta"], p["bn2_mean"], p["bn2_var"], p["conv2_b"])

    # Effective conv weights in (kh, kw, cin, cout) order, BN scale folded in.
    w1_eff = jnp.transpose(p["conv1_w"], (2, 3, 1, 0))[:, :, 0, :] * s1   # (3,3,8)
    w2_eff = jnp.transpose(p["conv2_w"], (2, 3, 1, 0)) * s2               # (3,3,8,16)
    w3_eff = jnp.transpose(p["conv3_w"], (2, 3, 1, 0))                    # (3,3,16,32)

    # Width-tap shift (+ stride) and Cin folded into lane-dense weight matrices.
    S1 = jnp.stack([_sel(_HP, _H1, j, 1) for j in range(3)])   # (3,30,28)
    S2 = jnp.stack([_sel(_H1, _H2, j, 2) for j in range(3)])   # (3,28,13)
    S3 = jnp.stack([_sel(_H2, _H3, j, 2) for j in range(3)])   # (3,13,6)
    M1 = jnp.einsum("jwo,ijc->iwoc", S1, w1_eff, precision=HIGHEST).reshape(3, _HP, _W1)
    N2 = jnp.einsum("jxo,ijcd->ixcod", S2, w2_eff, precision=HIGHEST).reshape(3, _W1, _W2)
    N3 = jnp.einsum("jxo,ijde->ixdoe", S3, w3_eff, precision=HIGHEST).reshape(3, _W2, _W3)

    # Stride-2 row-tap selection matrices (gather-as-matmul; MXU is idle here).
    R2 = jnp.stack([_sel(_H1, _H2, i, 2).T for i in range(3)])   # (3,13,28)
    R3 = jnp.stack([_sel(_H2, _H3, i, 2).T for i in range(3)])   # (3,6,13)

    # Per-channel shifts tiled to the lane-dense activation layout.
    t1_t = jnp.tile(t1, _H1).reshape(1, _W1)
    t2_t = jnp.tile(t2, _H2).reshape(1, _W2)
    b3_t = jnp.tile(p["conv3_b"], _H3).reshape(1, _W3)

    # linear1: fold PyTorch's NCHW flatten order (c*36 + h*6 + w) into rows of
    # our (h, w*32 + c) layout, grouped by conv3 output row h.
    wl1 = jnp.transpose(p["lin1_w"].reshape(_HID, _C3, _H3, _H3),
                        (2, 3, 1, 0)).reshape(_H3, _W3, _HID)              # (6,192,128)
    bl1 = p["lin1_b"].reshape(1, _HID)

    # linear2 (mu) | linear3 (log_var) merged along the output dimension.
    w23 = jnp.concatenate([p["lin2_w"].T, p["lin3_w"].T], axis=1)          # (128, 2L)
    b23 = jnp.concatenate([p["lin2_b"], p["lin3_b"]]).reshape(1, 2 * latent_dim)

    def const_spec(shape):
        return pl.BlockSpec(shape, lambda b, _n=len(shape): (0,) * _n)

    in_specs = [
        pl.BlockSpec((1, _HP, _HP), lambda b: (b, 0, 0)),   # xpad (per image)
        const_spec((3, _HP, _W1)),                          # M1
        const_spec((1, _W1)),                               # t1
        const_spec((3, _H2, _H1)),                          # R2
        const_spec((3, _W1, _W2)),                          # N2
        const_spec((1, _W2)),                               # t2
        const_spec((3, _H3, _H2)),                          # R3
        const_spec((3, _W2, _W3)),                          # N3
        const_spec((1, _W3)),                               # b3
        const_spec((_H3, _W3, _HID)),                       # wl1
        const_spec((1, _HID)),                              # bl1
        const_spec((_HID, 2 * latent_dim)),                 # w23
        const_spec((1, 2 * latent_dim)),                    # b23
    ]

    out = pl.pallas_call(
        _encoder_kernel,
        grid=(B,),
        out_shape=jax.ShapeDtypeStruct((B, 1, 2 * latent_dim), jnp.float32),
        in_specs=in_specs,
        out_specs=pl.BlockSpec((1, 1, 2 * latent_dim), lambda b: (b, 0, 0)),
        compiler_params=pltpu.CompilerParams(
            dimension_semantics=("parallel",),        # megacore on v7x
            vmem_limit_bytes=32 * 1024 * 1024,        # actual need ~5 MiB
        ),
    )(xpad, M1, t1_t, R2, N2, t2_t, R3, N3, b3_t, wl1, bl1, w23, b23)

    out = out.reshape(B, 2 * latent_dim)
    return out[:, :latent_dim], out[:, latent_dim:]


# ---------------------------------------------------------------------------
# Pure-JAX reference of the PyTorch module (eval-mode BatchNorm).
# ---------------------------------------------------------------------------
def encoder_reference(params, x_nchw, eps=1e-5):
    p = params

    def conv(x, w, b, stride, pad):
        y = jax.lax.conv_general_dilated(
            x, w, window_strides=(stride, stride),
            padding=[(pad, pad), (pad, pad)],
            dimension_numbers=("NCHW", "OIHW", "NCHW"),
            precision=HIGHEST)
        return y + b[None, :, None, None]

    def bn(x, g, be, m, v):
        s = (g / jnp.sqrt(v + eps))[None, :, None, None]
        return (x - m[None, :, None, None]) * s + be[None, :, None, None]

    y = jax.nn.relu(bn(conv(x_nchw, p["conv1_w"], p["conv1_b"], 1, 1),
                       p["bn1_gamma"], p["bn1_beta"], p["bn1_mean"], p["bn1_var"]))
    y = jax.nn.relu(bn(conv(y, p["conv2_w"], p["conv2_b"], 2, 0),
                       p["bn2_gamma"], p["bn2_beta"], p["bn2_mean"], p["bn2_var"]))
    y = jax.nn.relu(conv(y, p["conv3_w"], p["conv3_b"], 2, 0))
    y = y.reshape(y.shape[0], -1)
    h = jax.nn.relu(jnp.dot(y, p["lin1_w"].T, precision=HIGHEST) + p["lin1_b"])
    mu = jnp.dot(h, p["lin2_w"].T, precision=HIGHEST) + p["lin2_b"]
    log_var = jnp.dot(h, p["lin3_w"].T, precision=HIGHEST) + p["lin3_b"]
    return mu, log_var


# ---------------------------------------------------------------------------
# Deterministic parameter construction (shapes from Encoder.__init__)
# ---------------------------------------------------------------------------
def init_params(key, latent_dim):
    ks = jax.random.split(key, 16)
    n = lambda k, shape, s=0.05: (s * jax.random.normal(k, shape)).astype(jnp.float32)
    return {
        "conv1_w": n(ks[0], (8, 1, 3, 3)),
        "conv1_b": n(ks[1], (8,)),
        "bn1_gamma": 1.0 + n(ks[2], (8,)),
        "bn1_beta": n(ks[3], (8,)),
        "bn1_mean": n(ks[4], (8,)),
        "bn1_var": 1.0 + jnp.abs(n(ks[5], (8,))),
        "conv2_w": n(ks[6], (16, 8, 3, 3)),
        "conv2_b": n(ks[7], (16,)),
        "bn2_gamma": 1.0 + n(ks[8], (16,)),
        "bn2_beta": n(ks[9], (16,)),
        "bn2_mean": n(ks[10], (16,)),
        "bn2_var": 1.0 + jnp.abs(n(ks[11], (16,))),
        "conv3_w": n(ks[12], (32, 16, 3, 3)),
        "conv3_b": n(ks[13], (32,)),
        "lin1_w": n(ks[14], (128, 32 * 6 * 6)),
        "lin1_b": n(ks[15], (128,)),
        "lin2_w": n(jax.random.fold_in(key, 100), (latent_dim, 128)),
        "lin2_b": n(jax.random.fold_in(key, 101), (latent_dim,)),
        "lin3_w": n(jax.random.fold_in(key, 102), (latent_dim, 128)),
        "lin3_b": n(jax.random.fold_in(key, 103), (latent_dim,)),
    }


if __name__ == "__main__":
    latent_dim = 16
    key = jax.random.PRNGKey(0)
    k_param, k_x = jax.random.split(key)
    params = init_params(k_param, latent_dim)
    # MNIST-like input implied by flatten(32*6*6): (B, 1, 28, 28)
    x = jax.random.normal(k_x, (2, 1, 28, 28), dtype=jnp.float32)

    mu, log_var = jax.jit(functools.partial(encoder_forward, params))(x)
    jax.block_until_ready((mu, log_var))

    assert mu.shape == (2, latent_dim) and log_var.shape == (2, latent_dim)
    assert mu.dtype == jnp.float32 and log_var.dtype == jnp.float32

    # Validate against the pure-JAX reference (eval-mode BN).
    mu_ref, lv_ref = jax.jit(functools.partial(encoder_reference, params))(x)
    assert jnp.allclose(mu, mu_ref, rtol=3e-2, atol=3e-3), \
        f"mu max err {float(jnp.max(jnp.abs(mu - mu_ref)))}"
    assert jnp.allclose(log_var, lv_ref, rtol=3e-2, atol=3e-3), \
        f"log_var max err {float(jnp.max(jnp.abs(log_var - lv_ref)))}"

    print("KERNEL_OK")
</pallas_src>

<mosaic_0001>
module attributes {stable_mosaic.version = 11 : i64} {
  func.func @_encoder_kernel(%arg0: i32, %arg1: memref<1x30x30xf32, #tpu.memory_space<vmem>>, %arg2: memref<3x30x224xf32, #tpu.memory_space<vmem>>, %arg3: memref<1x224xf32, #tpu.memory_space<vmem>>, %arg4: memref<3x13x28xf32, #tpu.memory_space<vmem>>, %arg5: memref<3x224x208xf32, #tpu.memory_space<vmem>>, %arg6: memref<1x208xf32, #tpu.memory_space<vmem>>, %arg7: memref<3x6x13xf32, #tpu.memory_space<vmem>>, %arg8: memref<3x208x192xf32, #tpu.memory_space<vmem>>, %arg9: memref<1x192xf32, #tpu.memory_space<vmem>>, %arg10: memref<6x192x128xf32, #tpu.memory_space<vmem>>, %arg11: memref<1x128xf32, #tpu.memory_space<vmem>>, %arg12: memref<128x32xf32, #tpu.memory_space<vmem>>, %arg13: memref<1x32xf32, #tpu.memory_space<vmem>>, %arg14: memref<1x1x32xf32, #tpu.memory_space<vmem>>) attributes {dimension_semantics = [#tpu.dimension_semantics<parallel>], iteration_bounds = array<i64: 2>, scalar_prefetch = 0 : i64, scratch_operands = 0 : i64, tpu.core_type = #tpu.core_type<tc>, window_params = [{transform_indices = @transform_0, window_bounds = array<i64: 1, 30, 30>}, {pipeline_mode = #tpu.pipeline_mode<synchronous>, transform_indices = @transform_1, window_bounds = array<i64: 3, 30, 224>}, {pipeline_mode = #tpu.pipeline_mode<synchronous>, transform_indices = @transform_2, window_bounds = array<i64: 1, 224>}, {pipeline_mode = #tpu.pipeline_mode<synchronous>, transform_indices = @transform_3, window_bounds = array<i64: 3, 13, 28>}, {pipeline_mode = #tpu.pipeline_mode<synchronous>, transform_indices = @transform_4, window_bounds = array<i64: 3, 224, 208>}, {pipeline_mode = #tpu.pipeline_mode<synchronous>, transform_indices = @transform_5, window_bounds = array<i64: 1, 208>}, {pipeline_mode = #tpu.pipeline_mode<synchronous>, transform_indices = @transform_6, window_bounds = array<i64: 3, 6, 13>}, {pipeline_mode = #tpu.pipeline_mode<synchronous>, transform_indices = @transform_7, window_bounds = array<i64: 3, 208, 192>}, {pipeline_mode = #tpu.pipeline_mode<synchronous>, transform_indices = @transform_8, window_bounds = array<i64: 1, 192>}, {pipeline_mode = #tpu.pipeline_mode<synchronous>, transform_indices = @transform_9, window_bounds = array<i64: 6, 192, 128>}, {pipeline_mode = #tpu.pipeline_mode<synchronous>, transform_indices = @transform_10, window_bounds = array<i64: 1, 128>}, {pipeline_mode = #tpu.pipeline_mode<synchronous>, transform_indices = @transform_11, window_bounds = array<i64: 128, 32>}, {pipeline_mode = #tpu.pipeline_mode<synchronous>, transform_indices = @transform_12, window_bounds = array<i64: 1, 32>}, {transform_indices = @transform_13, window_bounds = array<i64: 1, 1, 32>}]} {
    %c0 = arith.constant 0 : index
    %c0_0 = arith.constant 0 : index
    %c0_1 = arith.constant 0 : index
    %0 = vector.load %arg1[%c0, %c0_0, %c0_1] : memref<1x30x30xf32, #tpu.memory_space<vmem>>, vector<1x30x30xf32>
    %1 = vector.shape_cast %0 : vector<1x30x30xf32> to vector<30x30xf32>
    %2 = vector.extract_strided_slice %1 {offsets = [0, 0], sizes = [28, 30], strides = [1, 1]} : vector<30x30xf32> to vector<28x30xf32>
    %c0_2 = arith.constant 0 : index
    %c0_3 = arith.constant 0 : index
    %c0_4 = arith.constant 0 : index
    %3 = vector.load %arg2[%c0_2, %c0_3, %c0_4] : memref<3x30x224xf32, #tpu.memory_space<vmem>>, vector<1x30x224xf32>
    %4 = vector.shape_cast %3 : vector<1x30x224xf32> to vector<30x224xf32>
    %cst = arith.constant dense<0.000000e+00> : vector<28x224xf32>
    %5 = tpu.matmul %2, %4, %cst {dimension_numbers = #tpu.dot_dimension_numbers<[1], [0], [0], [1], [0, 0, 1, 1], [], []>} : vector<28x30xf32>, vector<30x224xf32>, vector<28x224xf32> -> vector<28x224xf32>
    %6 = vector.extract_strided_slice %1 {offsets = [1, 0], sizes = [28, 30], strides = [1, 1]} : vector<30x30xf32> to vector<28x30xf32>
    %c1 = arith.constant 1 : index
    %c0_5 = arith.constant 0 : index
    %c0_6 = arith.constant 0 : index
    %7 = vector.load %arg2[%c1, %c0_5, %c0_6] : memref<3x30x224xf32, #tpu.memory_space<vmem>>, vector<1x30x224xf32>
    %8 = vector.shape_cast %7 : vector<1x30x224xf32> to vector<30x224xf32>
    %cst_7 = arith.constant dense<0.000000e+00> : vector<28x224xf32>
    %9 = tpu.matmul %6, %8, %cst_7 {dimension_numbers = #tpu.dot_dimension_numbers<[1], [0], [0], [1], [0, 0, 1, 1], [], []>} : vector<28x30xf32>, vector<30x224xf32>, vector<28x224xf32> -> vector<28x224xf32>
    %10 = arith.addf %5, %9 : vector<28x224xf32>
    %11 = vector.extract_strided_slice %1 {offsets = [2, 0], sizes = [28, 30], strides = [1, 1]} : vector<30x30xf32> to vector<28x30xf32>
    %c2 = arith.constant 2 : index
    %c0_8 = arith.constant 0 : index
    %c0_9 = arith.constant 0 : index
    %12 = vector.load %arg2[%c2, %c0_8, %c0_9] : memref<3x30x224xf32, #tpu.memory_space<vmem>>, vector<1x30x224xf32>
    %13 = vector.shape_cast %12 : vector<1x30x224xf32> to vector<30x224xf32>
    %cst_10 = arith.constant dense<0.000000e+00> : vector<28x224xf32>
    %14 = tpu.matmul %11, %13, %cst_10 {dimension_numbers = #tpu.dot_dimension_numbers<[1], [0], [0], [1], [0, 0, 1, 1], [], []>} : vector<28x30xf32>, vector<30x224xf32>, vector<28x224xf32> -> vector<28x224xf32>
    %15 = arith.addf %10, %14 : vector<28x224xf32>
    %c0_11 = arith.constant 0 : index
    %c0_12 = arith.constant 0 : index
    %16 = vector.load %arg3[%c0_11, %c0_12] : memref<1x224xf32, #tpu.memory_space<vmem>>, vector<1x224xf32>
    %17 = vector.broadcast %16 : vector<1x224xf32> to vector<28x224xf32>
    %18 = arith.addf %15, %17 : vector<28x224xf32>
    %cst_13 = arith.constant 0.000000e+00 : f32
    %19 = vector.broadcast %cst_13 : f32 to vector<28x224xf32>
    %20 = arith.maximumf %18, %19 : vector<28x224xf32>
    %cst_14 = arith.constant 0.000000e+00 : f32
    %21 = vector.broadcast %cst_14 : f32 to vector<13x208xf32>
    %c0_15 = arith.constant 0 : index
    %c0_16 = arith.constant 0 : index
    %c0_17 = arith.constant 0 : index
    %22 = vector.load %arg4[%c0_15, %c0_16, %c0_17] : memref<3x13x28xf32, #tpu.memory_space<vmem>>, vector<1x13x28xf32>
    %23 = vector.shape_cast %22 : vector<1x13x28xf32> to vector<13x28xf32>
    %cst_18 = arith.constant dense<0.000000e+00> : vector<13x224xf32>
    %24 = tpu.matmul %23, %20, %cst_18 {dimension_numbers = #tpu.dot_dimension_numbers<[1], [0], [0], [1], [0, 0, 1, 1], [], []>} : vector<13x28xf32>, vector<28x224xf32>, vector<13x224xf32> -> vector<13x224xf32>
    %c0_19 = arith.constant 0 : index
    %c0_20 = arith.constant 0 : index
    %c0_21 = arith.constant 0 : index
    %25 = vector.load %arg5[%c0_19, %c0_20, %c0_21] : memref<3x224x208xf32, #tpu.memory_space<vmem>>, vector<1x224x208xf32>
    %26 = vector.shape_cast %25 : vector<1x224x208xf32> to vector<224x208xf32>
    %cst_22 = arith.constant dense<0.000000e+00> : vector<13x208xf32>
    %27 = tpu.matmul %24, %26, %cst_22 {dimension_numbers = #tpu.dot_dimension_numbers<[1], [0], [0], [1], [0, 0, 1, 1], [], []>} : vector<13x224xf32>, vector<224x208xf32>, vector<13x208xf32> -> vector<13x208xf32>
    %28 = arith.addf %21, %27 : vector<13x208xf32>
    %c1_23 = arith.constant 1 : index
    %c0_24 = arith.constant 0 : index
    %c0_25 = arith.constant 0 : index
    %29 = vector.load %arg4[%c1_23, %c0_24, %c0_25] : memref<3x13x28xf32, #tpu.memory_space<vmem>>, vector<1x13x28xf32>
    %30 = vector.shape_cast %29 : vector<1x13x28xf32> to vector<13x28xf32>
    %cst_26 = arith.constant dense<0.000000e+00> : vector<13x224xf32>
    %31 = tpu.matmul %30, %20, %cst_26 {dimension_numbers = #tpu.dot_dimension_numbers<[1], [0], [0], [1], [0, 0, 1, 1], [], []>} : vector<13x28xf32>, vector<28x224xf32>, vector<13x224xf32> -> vector<13x224xf32>
    %c1_27 = arith.constant 1 : index
    %c0_28 = arith.constant 0 : index
    %c0_29 = arith.constant 0 : index
    %32 = vector.load %arg5[%c1_27, %c0_28, %c0_29] : memref<3x224x208xf32, #tpu.memory_space<vmem>>, vector<1x224x208xf32>
    %33 = vector.shape_cast %32 : vector<1x224x208xf32> to vector<224x208xf32>
    %cst_30 = arith.constant dense<0.000000e+00> : vector<13x208xf32>
    %34 = tpu.matmul %31, %33, %cst_30 {dimension_numbers = #tpu.dot_dimension_numbers<[1], [0], [0], [1], [0, 0, 1, 1], [], []>} : vector<13x224xf32>, vector<224x208xf32>, vector<13x208xf32> -> vector<13x208xf32>
    %35 = arith.addf %28, %34 : vector<13x208xf32>
    %c2_31 = arith.constant 2 : index
    %c0_32 = arith.constant 0 : index
    %c0_33 = arith.constant 0 : index
    %36 = vector.load %arg4[%c2_31, %c0_32, %c0_33] : memref<3x13x28xf32, #tpu.memory_space<vmem>>, vector<1x13x28xf32>
    %37 = vector.shape_cast %36 : vector<1x13x28xf32> to vector<13x28xf32>
    %cst_34 = arith.constant dense<0.000000e+00> : vector<13x224xf32>
    %38 = tpu.matmul %37, %20, %cst_34 {dimension_numbers = #tpu.dot_dimension_numbers<[1], [0], [0], [1], [0, 0, 1, 1], [], []>} : vector<13x28xf32>, vector<28x224xf32>, vector<13x224xf32> -> vector<13x224xf32>
    %c2_35 = arith.constant 2 : index
    %c0_36 = arith.constant 0 : index
    %c0_37 = arith.constant 0 : index
    %39 = vector.load %arg5[%c2_35, %c0_36, %c0_37] : memref<3x224x208xf32, #tpu.memory_space<vmem>>, vector<1x224x208xf32>
    %40 = vector.shape_cast %39 : vector<1x224x208xf32> to vector<224x208xf32>
    %cst_38 = arith.constant dense<0.000000e+00> : vector<13x208xf32>
    %41 = tpu.matmul %38, %40, %cst_38 {dimension_numbers = #tpu.dot_dimension_numbers<[1], [0], [0], [1], [0, 0, 1, 1], [], []>} : vector<13x224xf32>, vector<224x208xf32>, vector<13x208xf32> -> vector<13x208xf32>
    %42 = arith.addf %35, %41 : vector<13x208xf32>
    %c0_39 = arith.constant 0 : index
    %c0_40 = arith.constant 0 : index
    %43 = vector.load %arg6[%c0_39, %c0_40] : memref<1x208xf32, #tpu.memory_space<vmem>>, vector<1x208xf32>
    %44 = vector.broadcast %43 : vector<1x208xf32> to vector<13x208xf32>
    %45 = arith.addf %42, %44 : vector<13x208xf32>
    %cst_41 = arith.constant 0.000000e+00 : f32
    %46 = vector.broadcast %cst_41 : f32 to vector<13x208xf32>
    %47 = arith.maximumf %45, %46 : vector<13x208xf32>
    %cst_42 = arith.constant 0.000000e+00 : f32
    %48 = vector.broadcast %cst_42 : f32 to vector<6x192xf32>
    %c0_43 = arith.constant 0 : index
    %c0_44 = arith.constant 0 : index
    %c0_45 = arith.constant 0 : index
    %49 = vector.load %arg7[%c0_43, %c0_44, %c0_45] : memref<3x6x13xf32, #tpu.memory_space<vmem>>, vector<1x6x13xf32>
    %50 = vector.shape_cast %49 : vector<1x6x13xf32> to vector<6x13xf32>
    %cst_46 = arith.constant dense<0.000000e+00> : vector<6x208xf32>
    %51 = tpu.matmul %50, %47, %cst_46 {dimension_numbers = #tpu.dot_dimension_numbers<[1], [0], [0], [1], [0, 0, 1, 1], [], []>} : vector<6x13xf32>, vector<13x208xf32>, vector<6x208xf32> -> vector<6x208xf32>
    %c0_47 = arith.constant 0 : index
    %c0_48 = arith.constant 0 : index
    %c0_49 = arith.constant 0 : index
    %52 = vector.load %arg8[%c0_47, %c0_48, %c0_49] : memref<3x208x192xf32, #tpu.memory_space<vmem>>, vector<1x208x192xf32>
    %53 = vector.shape_cast %52 : vector<1x208x192xf32> to vector<208x192xf32>
    %cst_50 = arith.constant dense<0.000000e+00> : vector<6x192xf32>
    %54 = tpu.matmul %51, %53, %cst_50 {dimension_numbers = #tpu.dot_dimension_numbers<[1], [0], [0], [1], [0, 0, 1, 1], [], []>} : vector<6x208xf32>, vector<208x192xf32>, vector<6x192xf32> -> vector<6x192xf32>
    %55 = arith.addf %48, %54 : vector<6x192xf32>
    %c1_51 = arith.constant 1 : index
    %c0_52 = arith.constant 0 : index
    %c0_53 = arith.constant 0 : index
    %56 = vector.load %arg7[%c1_51, %c0_52, %c0_53] : memref<3x6x13xf32, #tpu.memory_space<vmem>>, vector<1x6x13xf32>
    %57 = vector.shape_cast %56 : vector<1x6x13xf32> to vector<6x13xf32>
    %cst_54 = arith.constant dense<0.000000e+00> : vector<6x208xf32>
    %58 = tpu.matmul %57, %47, %cst_54 {dimension_numbers = #tpu.dot_dimension_numbers<[1], [0], [0], [1], [0, 0, 1, 1], [], []>} : vector<6x13xf32>, vector<13x208xf32>, vector<6x208xf32> -> vector<6x208xf32>
    %c1_55 = arith.constant 1 : index
    %c0_56 = arith.constant 0 : index
    %c0_57 = arith.constant 0 : index
    %59 = vector.load %arg8[%c1_55, %c0_56, %c0_57] : memref<3x208x192xf32, #tpu.memory_space<vmem>>, vector<1x208x192xf32>
    %60 = vector.shape_cast %59 : vector<1x208x192xf32> to vector<208x192xf32>
    %cst_58 = arith.constant dense<0.000000e+00> : vector<6x192xf32>
    %61 = tpu.matmul %58, %60, %cst_58 {dimension_numbers = #tpu.dot_dimension_numbers<[1], [0], [0], [1], [0, 0, 1, 1], [], []>} : vector<6x208xf32>, vector<208x192xf32>, vector<6x192xf32> -> vector<6x192xf32>
    %62 = arith.addf %55, %61 : vector<6x192xf32>
    %c2_59 = arith.constant 2 : index
    %c0_60 = arith.constant 0 : index
    %c0_61 = arith.constant 0 : index
    %63 = vector.load %arg7[%c2_59, %c0_60, %c0_61] : memref<3x6x13xf32, #tpu.memory_space<vmem>>, vector<1x6x13xf32>
    %64 = vector.shape_cast %63 : vector<1x6x13xf32> to vector<6x13xf32>
    %cst_62 = arith.constant dense<0.000000e+00> : vector<6x208xf32>
    %65 = tpu.matmul %64, %47, %cst_62 {dimension_numbers = #tpu.dot_dimension_numbers<[1], [0], [0], [1], [0, 0, 1, 1], [], []>} : vector<6x13xf32>, vector<13x208xf32>, vector<6x208xf32> -> vector<6x208xf32>
    %c2_63 = arith.constant 2 : index
    %c0_64 = arith.constant 0 : index
    %c0_65 = arith.constant 0 : index
    %66 = vector.load %arg8[%c2_63, %c0_64, %c0_65] : memref<3x208x192xf32, #tpu.memory_space<vmem>>, vector<1x208x192xf32>
    %67 = vector.shape_cast %66 : vector<1x208x192xf32> to vector<208x192xf32>
    %cst_66 = arith.constant dense<0.000000e+00> : vector<6x192xf32>
    %68 = tpu.matmul %65, %67, %cst_66 {dimension_numbers = #tpu.dot_dimension_numbers<[1], [0], [0], [1], [0, 0, 1, 1], [], []>} : vector<6x208xf32>, vector<208x192xf32>, vector<6x192xf32> -> vector<6x192xf32>
    %69 = arith.addf %62, %68 : vector<6x192xf32>
    %c0_67 = arith.constant 0 : index
    %c0_68 = arith.constant 0 : index
    %70 = vector.load %arg9[%c0_67, %c0_68] : memref<1x192xf32, #tpu.memory_space<vmem>>, vector<1x192xf32>
    %71 = vector.broadcast %70 : vector<1x192xf32> to vector<6x192xf32>
    %72 = arith.addf %69, %71 : vector<6x192xf32>
    %cst_69 = arith.constant 0.000000e+00 : f32
    %73 = vector.broadcast %cst_69 : f32 to vector<6x192xf32>
    %74 = arith.maximumf %72, %73 : vector<6x192xf32>
    %c0_70 = arith.constant 0 : index
    %c0_71 = arith.constant 0 : index
    %75 = vector.load %arg11[%c0_70, %c0_71] : memref<1x128xf32, #tpu.memory_space<vmem>>, vector<1x128xf32>
    %76 = vector.extract_strided_slice %74 {offsets = [0, 0], sizes = [1, 192], strides = [1, 1]} : vector<6x192xf32> to vector<1x192xf32>
    %c0_72 = arith.constant 0 : index
    %c0_73 = arith.constant 0 : index
    %c0_74 = arith.constant 0 : index
    %77 = vector.load %arg10[%c0_72, %c0_73, %c0_74] : memref<6x192x128xf32, #tpu.memory_space<vmem>>, vector<1x192x128xf32>
    %78 = vector.shape_cast %77 : vector<1x192x128xf32> to vector<192x128xf32>
    %cst_75 = arith.constant dense<0.000000e+00> : vector<1x128xf32>
    %79 = tpu.matmul %76, %78, %cst_75 {dimension_numbers = #tpu.dot_dimension_numbers<[1], [0], [0], [1], [0, 0, 1, 1], [], []>} : vector<1x192xf32>, vector<192x128xf32>, vector<1x128xf32> -> vector<1x128xf32>
    %80 = arith.addf %75, %79 : vector<1x128xf32>
    %81 = vector.extract_strided_slice %74 {offsets = [1, 0], sizes = [1, 192], strides = [1, 1]} : vector<6x192xf32> to vector<1x192xf32>
    %c1_76 = arith.constant 1 : index
    %c0_77 = arith.constant 0 : index
    %c0_78 = arith.constant 0 : index
    %82 = vector.load %arg10[%c1_76, %c0_77, %c0_78] : memref<6x192x128xf32, #tpu.memory_space<vmem>>, vector<1x192x128xf32>
    %83 = vector.shape_cast %82 : vector<1x192x128xf32> to vector<192x128xf32>
    %cst_79 = arith.constant dense<0.000000e+00> : vector<1x128xf32>
    %84 = tpu.matmul %81, %83, %cst_79 {dimension_numbers = #tpu.dot_dimension_numbers<[1], [0], [0], [1], [0, 0, 1, 1], [], []>} : vector<1x192xf32>, vector<192x128xf32>, vector<1x128xf32> -> vector<1x128xf32>
    %85 = arith.addf %80, %84 : vector<1x128xf32>
    %86 = vector.extract_strided_slice %74 {offsets = [2, 0], sizes = [1, 192], strides = [1, 1]} : vector<6x192xf32> to vector<1x192xf32>
    %c2_80 = arith.constant 2 : index
    %c0_81 = arith.constant 0 : index
    %c0_82 = arith.constant 0 : index
    %87 = vector.load %arg10[%c2_80, %c0_81, %c0_82] : memref<6x192x128xf32, #tpu.memory_space<vmem>>, vector<1x192x128xf32>
    %88 = vector.shape_cast %87 : vector<1x192x128xf32> to vector<192x128xf32>
    %cst_83 = arith.constant dense<0.000000e+00> : vector<1x128xf32>
    %89 = tpu.matmul %86, %88, %cst_83 {dimension_numbers = #tpu.dot_dimension_numbers<[1], [0], [0], [1], [0, 0, 1, 1], [], []>} : vector<1x192xf32>, vector<192x128xf32>, vector<1x128xf32> -> vector<1x128xf32>
    %90 = arith.addf %85, %89 : vector<1x128xf32>
    %91 = vector.extract_strided_slice %74 {offsets = [3, 0], sizes = [1, 192], strides = [1, 1]} : vector<6x192xf32> to vector<1x192xf32>
    %c3 = arith.constant 3 : index
    %c0_84 = arith.constant 0 : index
    %c0_85 = arith.constant 0 : index
    %92 = vector.load %arg10[%c3, %c0_84, %c0_85] : memref<6x192x128xf32, #tpu.memory_space<vmem>>, vector<1x192x128xf32>
    %93 = vector.shape_cast %92 : vector<1x192x128xf32> to vector<192x128xf32>
    %cst_86 = arith.constant dense<0.000000e+00> : vector<1x128xf32>
    %94 = tpu.matmul %91, %93, %cst_86 {dimension_numbers = #tpu.dot_dimension_numbers<[1], [0], [0], [1], [0, 0, 1, 1], [], []>} : vector<1x192xf32>, vector<192x128xf32>, vector<1x128xf32> -> vector<1x128xf32>
    %95 = arith.addf %90, %94 : vector<1x128xf32>
    %96 = vector.extract_strided_slice %74 {offsets = [4, 0], sizes = [1, 192], strides = [1, 1]} : vector<6x192xf32> to vector<1x192xf32>
    %c4 = arith.constant 4 : index
    %c0_87 = arith.constant 0 : index
    %c0_88 = arith.constant 0 : index
    %97 = vector.load %arg10[%c4, %c0_87, %c0_88] : memref<6x192x128xf32, #tpu.memory_space<vmem>>, vector<1x192x128xf32>
    %98 = vector.shape_cast %97 : vector<1x192x128xf32> to vector<192x128xf32>
    %cst_89 = arith.constant dense<0.000000e+00> : vector<1x128xf32>
    %99 = tpu.matmul %96, %98, %cst_89 {dimension_numbers = #tpu.dot_dimension_numbers<[1], [0], [0], [1], [0, 0, 1, 1], [], []>} : vector<1x192xf32>, vector<192x128xf32>, vector<1x128xf32> -> vector<1x128xf32>
    %100 = arith.addf %95, %99 : vector<1x128xf32>
    %101 = vector.extract_strided_slice %74 {offsets = [5, 0], sizes = [1, 192], strides = [1, 1]} : vector<6x192xf32> to vector<1x192xf32>
    %c5 = arith.constant 5 : index
    %c0_90 = arith.constant 0 : index
    %c0_91 = arith.constant 0 : index
    %102 = vector.load %arg10[%c5, %c0_90, %c0_91] : memref<6x192x128xf32, #tpu.memory_space<vmem>>, vector<1x192x128xf32>
    %103 = vector.shape_cast %102 : vector<1x192x128xf32> to vector<192x128xf32>
    %cst_92 = arith.constant dense<0.000000e+00> : vector<1x128xf32>
    %104 = tpu.matmul %101, %103, %cst_92 {dimension_numbers = #tpu.dot_dimension_numbers<[1], [0], [0], [1], [0, 0, 1, 1], [], []>} : vector<1x192xf32>, vector<192x128xf32>, vector<1x128xf32> -> vector<1x128xf32>
    %105 = arith.addf %100, %104 : vector<1x128xf32>
    %cst_93 = arith.constant 0.000000e+00 : f32
    %106 = vector.broadcast %cst_93 : f32 to vector<1x128xf32>
    %107 = arith.maximumf %105, %106 : vector<1x128xf32>
    %c0_94 = arith.constant 0 : index
    %c0_95 = arith.constant 0 : index
    %108 = vector.load %arg12[%c0_94, %c0_95] : memref<128x32xf32, #tpu.memory_space<vmem>>, vector<128x32xf32>
    %cst_96 = arith.constant dense<0.000000e+00> : vector<1x32xf32>
    %109 = tpu.matmul %107, %108, %cst_96 {dimension_numbers = #tpu.dot_dimension_numbers<[1], [0], [0], [1], [0, 0, 1, 1], [], []>} : vector<1x128xf32>, vector<128x32xf32>, vector<1x32xf32> -> vector<1x32xf32>
    %c0_97 = arith.constant 0 : index
    %c0_98 = arith.constant 0 : index
    %110 = vector.load %arg13[%c0_97, %c0_98] : memref<1x32xf32, #tpu.memory_space<vmem>>, vector<1x32xf32>
    %111 = arith.addf %109, %110 : vector<1x32xf32>
    %c0_99 = arith.constant 0 : index
    %c0_100 = arith.constant 0 : index
    %c0_101 = arith.constant 0 : index
    %112 = vector.load %arg14[%c0_99, %c0_100, %c0_101] : memref<1x1x32xf32, #tpu.memory_space<vmem>>, vector<1x1x32xf32>
    %113 = vector.shape_cast %112 : vector<1x1x32xf32> to vector<1x32xf32>
    %114 = vector.shape_cast %111 : vector<1x32xf32> to vector<1x1x32xf32>
    tpu.vector_store %arg14[%c0_99, %c0_100, %c0_101], %114 {strides = array<i32>} : memref<1x1x32xf32, #tpu.memory_space<vmem>>, vector<1x1x32xf32>,
    return
  }
  func.func @transform_0(%arg0: i32) -> (i32, i32, i32) {
    %c0_i32 = arith.constant 0 : i32
    %c0_i32_0 = arith.constant 0 : i32
    %c0_i32_1 = arith.constant 0 : i32
    return %arg0, %c0_i32, %c0_i32_0 : i32, i32, i32
  }
  func.func @transform_1(%arg0: i32) -> (i32, i32, i32) {
    %c0_i32 = arith.constant 0 : i32
    %c0_i32_0 = arith.constant 0 : i32
    %c0_i32_1 = arith.constant 0 : i32
    %c0_i32_2 = arith.constant 0 : i32
    return %c0_i32, %c0_i32_0, %c0_i32_1 : i32, i32, i32
  }
  func.func @transform_2(%arg0: i32) -> (i32, i32) {
    %c0_i32 = arith.constant 0 : i32
    %c0_i32_0 = arith.constant 0 : i32
    %c0_i32_1 = arith.constant 0 : i32
    return %c0_i32, %c0_i32_0 : i32, i32
  }
  func.func @transform_3(%arg0: i32) -> (i32, i32, i32) {
    %c0_i32 = arith.constant 0 : i32
    %c0_i32_0 = arith.constant 0 : i32
    %c0_i32_1 = arith.constant 0 : i32
    %c0_i32_2 = arith.constant 0 : i32
    return %c0_i32, %c0_i32_0, %c0_i32_1 : i32, i32, i32
  }
  func.func @transform_4(%arg0: i32) -> (i32, i32, i32) {
    %c0_i32 = arith.constant 0 : i32
    %c0_i32_0 = arith.constant 0 : i32
    %c0_i32_1 = arith.constant 0 : i32
    %c0_i32_2 = arith.constant 0 : i32
    return %c0_i32, %c0_i32_0, %c0_i32_1 : i32, i32, i32
  }
  func.func @transform_5(%arg0: i32) -> (i32, i32) {
    %c0_i32 = arith.constant 0 : i32
    %c0_i32_0 = arith.constant 0 : i32
    %c0_i32_1 = arith.constant 0 : i32
    return %c0_i32, %c0_i32_0 : i32, i32
  }
  func.func @transform_6(%arg0: i32) -> (i32, i32, i32) {
    %c0_i32 = arith.constant 0 : i32
    %c0_i32_0 = arith.constant 0 : i32
    %c0_i32_1 = arith.constant 0 : i32
    %c0_i32_2 = arith.constant 0 : i32
    return %c0_i32, %c0_i32_0, %c0_i32_1 : i32, i32, i32
  }
  func.func @transform_7(%arg0: i32) -> (i32, i32, i32) {
    %c0_i32 = arith.constant 0 : i32
    %c0_i32_0 = arith.constant 0 : i32
    %c0_i32_1 = arith.constant 0 : i32
    %c0_i32_2 = arith.constant 0 : i32
    return %c0_i32, %c0_i32_0, %c0_i32_1 : i32, i32, i32
  }
  func.func @transform_8(%arg0: i32) -> (i32, i32) {
    %c0_i32 = arith.constant 0 : i32
    %c0_i32_0 = arith.constant 0 : i32
    %c0_i32_1 = arith.constant 0 : i32
    return %c0_i32, %c0_i32_0 : i32, i32
  }
  func.func @transform_9(%arg0: i32) -> (i32, i32, i32) {
    %c0_i32 = arith.constant 0 : i32
    %c0_i32_0 = arith.constant 0 : i32
    %c0_i32_1 = arith.constant 0 : i32
    %c0_i32_2 = arith.constant 0 : i32
    return %c0_i32, %c0_i32_0, %c0_i32_1 : i32, i32, i32
  }
  func.func @transform_10(%arg0: i32) -> (i32, i32) {
    %c0_i32 = arith.constant 0 : i32
    %c0_i32_0 = arith.constant 0 : i32
    %c0_i32_1 = arith.constant 0 : i32
    return %c0_i32, %c0_i32_0 : i32, i32
  }
  func.func @transform_11(%arg0: i32) -> (i32, i32) {
    %c0_i32 = arith.constant 0 : i32
    %c0_i32_0 = arith.constant 0 : i32
    %c0_i32_1 = arith.constant 0 : i32
    return %c0_i32, %c0_i32_0 : i32, i32
  }
  func.func @transform_12(%arg0: i32) -> (i32, i32) {
    %c0_i32 = arith.constant 0 : i32
    %c0_i32_0 = arith.constant 0 : i32
    %c0_i32_1 = arith.constant 0 : i32
    return %c0_i32, %c0_i32_0 : i32, i32
  }
  func.func @transform_13(%arg0: i32) -> (i32, i32, i32) {
    %c0_i32 = arith.constant 0 : i32
    %c0_i32_0 = arith.constant 0 : i32
    %c0_i32_1 = arith.constant 0 : i32
    return %arg0, %c0_i32, %c0_i32_0 : i32, i32, i32
  }
}

</mosaic_0001>

<bundles_post_ra>
// kernel: tile.14
= control target key start
LH: loop header
LB: loop body
LE: loop exit
PB: predicated region body
PF: predicated region fallthrough
CT: control target
= control target key end

     0   :  { %s40_s0 = inlined_call_operand.vmem [shape: f32[8], index: 0, kind: input, shape index: {}]   ;;  %s41_s1 = inlined_call_operand.vmem [shape: f32[28,8], index: 1, kind: output, shape index: {}]  }
   0x1   :  { %v4_v0 = vld [vmem:[%s40_s0] ss:$0 sm:$0xff] }
   0x2   :  { %5 = vst [vmem:[%s41_s1] sm:$0xff] %v4_v0  ;;  %12 = vst [vmem:[%s41_s1 + $0x8] sm:$0xff] %v4_v0 }
   0x3   :  { %13 = vst [vmem:[%s41_s1 + $0x10] sm:$0xff] %v4_v0  ;;  %14 = vst [vmem:[%s41_s1 + $0x18] sm:$0xff] %v4_v0 }

// kernel: tile.15
= control target key start
LH: loop header
LB: loop body
LE: loop exit
PB: predicated region body
PF: predicated region fallthrough
CT: control target
= control target key end

     0   :  { %s152_s10 = smov 120   ;;  %s153_s11 = smov 104   ;;  %vm4_vm0 = vcmask 64512   ;;  %vm10_vm1 = vcmask 1048512   ;;  %vm16_vm2 = vcmask 982912   ;;  %vm22_vm3 = vcmask 917312   ;;  %s231_s0 = inlined_call_operand.vmem [shape: f32[28,8], index: 0, kind: input, shape index: {}]   ;;  %s232_s1 = inlined_call_operand.vmem [shape: f32[1,224], index: 1, kind: output, shape index: {}]  }
   0x1   :  { %v121_v0 = vld [vmem:[%s231_s0 + $0xf] sm:$0x1]   ;;  %v123_v1 = vld [vmem:[%s231_s0 + $0xd] sm:$0x1]   ;;  %v122_v2 = vld [vmem:[%s231_s0 + $0xe] sm:$0x1]  }
   0x2   :  { %8 = vrot.lane.b32.xlu0 %v121_v0, %s152_s10  ;;  %20 = vrot.lane.b32.xlu1 %v123_v1, %s153_s11  ;;  %v124_v3 = vld [vmem:[%s231_s0 + $0xc] sm:$0x1]   ;;  %s31_s16 = smov 3  ;;  %s38_s17 = smov 3  ;;  %vm28_vm4 = vcmask 851712   ;;  %vm35_vm5 = vcmask 786112  }
   0x3   :  { %s154_s18 = smov 112   ;;  %s155_s19 = smov 96   ;;  %v125_v4 = vld [vmem:[%s231_s0 + $0xb] ss:$16 sm:%s31_s16]   ;;  %v126_v5 = vld [vmem:[%s231_s0 + $0xa] ss:$16 sm:%s38_s17]  }
   0x4   :  { %s45_s24 = smov 3  ;;  %s52_s25 = smov 3  ;;  %vm42_vm6 = vcmask 720512   ;;  %vm49_vm7 = vcmask 654912   ;;  %vm56_vm8 = vcmask 589312   ;;  %vm63_vm9 = vcmask 523712  }
   0x5   :  { %s156_s26 = smov 88   ;;  %s157_s27 = smov 80   ;;  %v127_v6 = vld [vmem:[%s231_s0 + $0x9] ss:$16 sm:%s45_s24]   ;;  %v128_v7 = vld [vmem:[%s231_s0 + $0x8] ss:$16 sm:%s52_s25]  }
   0x6   :  { %14 = vrot.lane.b32.xlu0 %v122_v2, %s154_s18  ;;  %26 = vrot.lane.b32.xlu1 %v124_v3, %s155_s19  ;;  %s59_s3 = smov 3  ;;  %s66_s4 = smov 3  ;;  %vm70_vm10 = vcmask 458112   ;;  %vm77_vm11 = vcmask 392512   ;;  %vm84_vm12 = vcmask 326912   ;;  %vm91_vm13 = vcmask 261312  }
   0x7   :  { %s158_s5 = smov 72   ;;  %s159_s6 = smov 64   ;;  %v129_v8 = vld [vmem:[%s231_s0 + $0x7] ss:$16 sm:%s59_s3]   ;;  %v130_v9 = vld [vmem:[%s231_s0 + $0x6] ss:$16 sm:%s66_s4]  }
   0x8   :  { %s2_s9 = smov 3  ;;  %s73_s14 = smov 3  ;;  %vm98_vm14 = vcmask 195712   ;;  %vm105_vm15 = vcmask 130112  }
   0x9   :  { %v3_v10 = vld [vmem:[%s231_s0] ss:$16 sm:%s2_s9]   ;;  %s80_s15 = smov 3  ;;  %s160_s16 = smov 56   ;;  %v131_v11 = vld [vmem:[%s231_s0 + $0x5] ss:$16 sm:%s73_s14]  }
   0xa   :  { %33 = vrot.lane.b32.xlu0 %v125_v4, %s156_s26  ;;  %40 = vrot.lane.b32.xlu1 %v126_v5, %s157_s27  ;;  %5 = vst.msk [vmem:[#allocation0] ss:$8 sm:$0x3] %vm4_vm0, %v3_v10   ;;  %s161_s17 = smov 48   ;;  %v132_v12 = vld [vmem:[%s231_s0 + $0x4] ss:$16 sm:%s80_s15]  }
   0xb   :  { %s87_s22 = smov 3  ;;  %s94_s23 = smov 3 }
   0xc   :  { %s162_s24 = smov 40   ;;  %s163_s25 = smov 32   ;;  %v133_v13 = vld [vmem:[%s231_s0 + $0x3] ss:$16 sm:%s87_s22]   ;;  %v134_v14 = vld [vmem:[%s231_s0 + $0x2] ss:$16 sm:%s94_s23]  }
   0xd   :  { %s101_s30 = smov 3  ;;  %s164_s2 = smov 24  }
   0xe   :  { %47 = vrot.lane.b32.xlu0 %v127_v6, %s158_s5  ;;  %54 = vrot.lane.b32.xlu1 %v128_v7, %s159_s6  ;;  %s165_s3 = smov 16   ;;  %v135_v15 = vld [vmem:[%s231_s0 + $0x1] ss:$16 sm:%s101_s30]   ;;  %s166_s0 = smov 8  }
  0x12   :  { %61 = vrot.lane.b32.xlu0 %v129_v8, %s160_s16  ;;  %68 = vrot.lane.b32.xlu1 %v130_v9, %s161_s17 }
  0x16   :  { %75 = vrot.lane.b32.xlu0 %v131_v11, %s162_s24  ;;  %82 = vrot.lane.b32.xlu1 %v132_v12, %s163_s25 }
  0x1a   :  { %89 = vrot.lane.b32.xlu0 %v133_v13, %s164_s2  ;;  %96 = vrot.lane.b32.xlu1 %v134_v14, %s165_s3 }
  0x1e   :  { %103 = vrot.lane.b32.xlu0 %v135_v15, %s166_s0 }
  0x74   :  { %v9_v16 = vpop.permute.xlu0 %8   ;;  %v21_v17 = vpop.permute.xlu1 %20  }
  0x75   :  { %11 = vst.msk [vmem:[#allocation0] sm:$0x1] %vm10_vm1, %v9_v16  }
  0x78   :  { %v15_v18 = vpop.permute.xlu0 %14   ;;  %v27_v19 = vpop.permute.xlu1 %26  }
  0x79   :  { %17 = vst.msk [vmem:[#allocation0] sm:$0x1] %vm16_vm2, %v15_v18  }
  0x7a   :  { %23 = vst.msk [vmem:[#allocation0] sm:$0x1] %vm22_vm3, %v21_v17  }
  0x7b   :  { %29 = vst.msk [vmem:[#allocation0] sm:$0x1] %vm28_vm4, %v27_v19  }
  0x7c   :  { %v34_v20 = vpop.permute.xlu0 %33   ;;  %v41_v21 = vpop.permute.xlu1 %40  }
  0x7d   :  { %36 = vst.msk [vmem:[#allocation0] ss:$8 sm:$0x3] %vm35_vm5, %v34_v20  }
  0x7e   :  { %43 = vst.msk [vmem:[#allocation0] ss:$8 sm:$0x3] %vm42_vm6, %v41_v21  }
  0x80   :  { %v48_v22 = vpop.permute.xlu0 %47   ;;  %v55_v23 = vpop.permute.xlu1 %54  }
  0x81   :  { %50 = vst.msk [vmem:[#allocation0] ss:$8 sm:$0x3] %vm49_vm7, %v48_v22  }
  0x82   :  { %57 = vst.msk [vmem:[#allocation0] ss:$8 sm:$0x3] %vm56_vm8, %v55_v23  }
  0x84   :  { %v62_v24 = vpop.permute.xlu0 %61   ;;  %v69_v25 = vpop.permute.xlu1 %68  }
  0x85   :  { %64 = vst.msk [vmem:[#allocation0] ss:$8 sm:$0x3] %vm63_vm9, %v62_v24  }
  0x86   :  { %71 = vst.msk [vmem:[#allocation0] ss:$8 sm:$0x3] %vm70_vm10, %v69_v25  }
  0x88   :  { %v76_v26 = vpop.permute.xlu0 %75   ;;  %v83_v27 = vpop.permute.xlu1 %82  }
  0x89   :  { %78 = vst.msk [vmem:[#allocation0] ss:$8 sm:$0x3] %vm77_vm11, %v76_v26  }
  0x8a   :  { %85 = vst.msk [vmem:[#allocation0] ss:$8 sm:$0x3] %vm84_vm12, %v83_v27  }
  0x8c   :  { %v90_v28 = vpop.permute.xlu0 %89   ;;  %v97_v29 = vpop.permute.xlu1 %96  }
  0x8d   :  { %92 = vst.msk [vmem:[#allocation0] ss:$8 sm:$0x3] %vm91_vm13, %v90_v28  }
  0x8e   :  { %99 = vst.msk [vmem:[#allocation0] ss:$8 sm:$0x3] %vm98_vm14, %v97_v29  }
  0x90   :  { %v104_v30 = vpop.permute.xlu0 %103  }
  0x91   :  { %106 = vst.msk [vmem:[#allocation0] ss:$8 sm:$0x3] %vm105_vm15, %v104_v30  }
  0x98   :  { %v111_v31 = vld [vmem:[#allocation0] sm:$0x1]  ;;  %v116_v32 = vld [vmem:[#allocation0 + $0x8] sm:$0x1] }
  0x99   :  { %114 = vst [vmem:[%s232_s1] sm:$0x1] %v111_v31  ;;  %136 = vst [vmem:[%s232_s1 + $0x1] sm:$0x1] %v116_v32 }

// kernel: tile.18
= control target key start
LH: loop header
LB: loop body
LE: loop exit
PB: predicated region body
PF: predicated region fallthrough
CT: control target
= control target key end

     0   :  { %s28_s0 = inlined_call_operand.vmem [shape: f32[16], index: 0, kind: input, shape index: {}]   ;;  %s29_s1 = inlined_call_operand.vmem [shape: f32[13,16], index: 1, kind: output, shape index: {}]  }
   0x1   :  { %v4_v0 = vld [vmem:[%s28_s0] ss:$0 sm:$0xff] }
   0x2   :  { %5 = vst [vmem:[%s29_s1] sm:$0xff] %v4_v0  ;;  %8 = vst [vmem:[%s29_s1 + $0x8] sm:$0xff] %v4_v0 }

// kernel: tile.19
= control target key start
LH: loop header
LB: loop body
LE: loop exit
PB: predicated region body
PF: predicated region fallthrough
CT: control target
= control target key end

     0   :  { %s81_s10 = smov 112   ;;  %s82_s11 = smov 80   ;;  %vm4_vm0 = vcmask 130048   ;;  %vm10_vm1 = vcmask 1048448   ;;  %vm16_vm2 = vcmask 917248   ;;  %vm22_vm3 = vcmask 786048   ;;  %s128_s0 = inlined_call_operand.vmem [shape: f32[13,16], index: 0, kind: input, shape index: {}]   ;;  %s129_s1 = inlined_call_operand.vmem [shape: f32[1,208], index: 1, kind: output, shape index: {}]  }
   0x1   :  { %v66_v0 = vld [vmem:[%s128_s0 + $0x7] sm:$0x1]   ;;  %v68_v1 = vld [vmem:[%s128_s0 + $0x5] sm:$0x1]   ;;  %s25_s12 = smov 3  ;;  %s32_s17 = smov 3 }
   0x2   :  { %8 = vrot.lane.b32.xlu0 %v66_v0, %s81_s10  ;;  %20 = vrot.lane.b32.xlu1 %v68_v1, %s82_s11  ;;  %v67_v2 = vld [vmem:[%s128_s0 + $0x6] sm:$0x1]   ;;  %s39_s18 = smov 3  ;;  %s83_s19 = smov 96   ;;  %vm29_vm4 = vcmask 654848   ;;  %vm36_vm5 = vcmask 523648  }
   0x3   :  { %v69_v3 = vld [vmem:[%s128_s0 + $0x4] ss:$8 sm:%s25_s12]   ;;  %s84_s20 = smov 64   ;;  %v70_v4 = vld [vmem:[%s128_s0 + $0x3] ss:$8 sm:%s32_s17]   ;;  %s2_s23 = smov 3 }
   0x4   :  { %v71_v5 = vld [vmem:[%s128_s0 + $0x2] ss:$8 sm:%s39_s18]   ;;  %v3_v6 = vld [vmem:[%s128_s0] ss:$8 sm:%s2_s23]   ;;  %s46_s28 = smov 3  ;;  %s85_s29 = smov 48  }
   0x5   :  { %5 = vst.msk [vmem:[#allocation0] ss:$8 sm:$0x3] %vm4_vm0, %v3_v6   ;;  %s86_s30 = smov 32   ;;  %v72_v7 = vld [vmem:[%s128_s0 + $0x1] ss:$8 sm:%s46_s28]  }
   0x6   :  { %14 = vrot.lane.b32.xlu0 %v67_v2, %s83_s19  ;;  %27 = vrot.lane.b32.xlu1 %v69_v3, %s84_s20  ;;  %s87_s0 = smov 16   ;;  %vm43_vm6 = vcmask 392448   ;;  %vm50_vm7 = vcmask 261248  }
   0xa   :  { %34 = vrot.lane.b32.xlu0 %v70_v4, %s85_s29  ;;  %41 = vrot.lane.b32.xlu1 %v71_v5, %s86_s30 }
   0xe   :  { %48 = vrot.lane.b32.xlu0 %v72_v7, %s87_s0 }
  0x74   :  { %v9_v8 = vpop.permute.xlu0 %8   ;;  %v21_v9 = vpop.permute.xlu1 %20  }
  0x75   :  { %11 = vst.msk [vmem:[#allocation0] sm:$0x1] %vm10_vm1, %v9_v8  }
  0x78   :  { %v15_v10 = vpop.permute.xlu0 %14   ;;  %v28_v11 = vpop.permute.xlu1 %27  }
  0x79   :  { %17 = vst.msk [vmem:[#allocation0] sm:$0x1] %vm16_vm2, %v15_v10  }
  0x7a   :  { %23 = vst.msk [vmem:[#allocation0] sm:$0x1] %vm22_vm3, %v21_v9  }
  0x7b   :  { %30 = vst.msk [vmem:[#allocation0] ss:$8 sm:$0x3] %vm29_vm4, %v28_v11  }
  0x7c   :  { %v35_v12 = vpop.permute.xlu0 %34   ;;  %v42_v13 = vpop.permute.xlu1 %41  }
  0x7d   :  { %37 = vst.msk [vmem:[#allocation0] ss:$8 sm:$0x3] %vm36_vm5, %v35_v12  }
  0x7e   :  { %44 = vst.msk [vmem:[#allocation0] ss:$8 sm:$0x3] %vm43_vm6, %v42_v13  }
  0x80   :  { %v49_v14 = vpop.permute.xlu0 %48  }
  0x81   :  { %51 = vst.msk [vmem:[#allocation0] ss:$8 sm:$0x3] %vm50_vm7, %v49_v14  }
  0x88   :  { %v56_v15 = vld [vmem:[#allocation0] sm:$0x1]  ;;  %v61_v16 = vld [vmem:[#allocation0 + $0x8] sm:$0x1] }
  0x89   :  { %59 = vst [vmem:[%s129_s1] sm:$0x1] %v56_v15  ;;  %73 = vst [vmem:[%s129_s1 + $0x1] sm:$0x1] %v61_v16 }

// kernel: tile.22
= control target key start
LH: loop header
LB: loop body
LE: loop exit
PB: predicated region body
PF: predicated region fallthrough
CT: control target
= control target key end

     0   :  { %s22_s0 = inlined_call_operand.vmem [shape: f32[32], index: 0, kind: input, shape index: {}]   ;;  %s23_s1 = inlined_call_operand.vmem [shape: f32[6,32], index: 1, kind: output, shape index: {}]  }
   0x1   :  { %v4_v0 = vld [vmem:[%s22_s0] ss:$0 sm:$0xff] }
   0x2   :  { %5 = vst [vmem:[%s23_s1] sm:$0xff] %v4_v0 }

// kernel: tile.23
= control target key start
LH: loop header
LB: loop body
LE: loop exit
PB: predicated region body
PF: predicated region fallthrough
CT: control target
= control target key end

     0   :  { %s46_s8 = smov 96   ;;  %s19_s9 = smov 3  ;;  %vm4_vm0 = vcmask 261120   ;;  %vm10_vm1 = vcmask 1048320   ;;  %vm16_vm2 = vcmask 785920   ;;  %vm23_vm3 = vcmask 523520   ;;  %s77_s0 = inlined_call_operand.vmem [shape: f32[6,32], index: 0, kind: input, shape index: {}]   ;;  %s78_s1 = inlined_call_operand.vmem [shape: f32[1,192], index: 1, kind: output, shape index: {}]  }
   0x1   :  { %v39_v0 = vld [vmem:[%s77_s0 + $0x3] sm:$0x1]   ;;  %v40_v1 = vld [vmem:[%s77_s0 + $0x2] sm:$0x1]   ;;  %v41_v2 = vld [vmem:[%s77_s0 + $0x1] ss:$4 sm:%s19_s9]  }
   0x2   :  { %8 = vrot.lane.b32.xlu0 %v39_v0, %s46_s8  ;;  %s2_s14 = smov 3  ;;  %s47_s15 = smov 32  }
   0x3   :  { %21 = vrot.lane.b32.xlu1 %v41_v2, %s47_s15  ;;  %v3_v3 = vld [vmem:[%s77_s0] ss:$4 sm:%s2_s14]   ;;  %s48_s0 = smov 64  }
   0x4   :  { %5 = vst.msk [vmem:[#allocation0] ss:$8 sm:$0x3] %vm4_vm0, %v3_v3  }
   0x6   :  { %14 = vrot.lane.b32.xlu0 %v40_v1, %s48_s0 }
  0x74   :  { %v9_v4 = vpop.permute.xlu0 %8  }
  0x75   :  { %11 = vst.msk [vmem:[#allocation0] sm:$0x1] %vm10_vm1, %v9_v4   ;;  %v22_v5 = vpop.permute.xlu1 %21  }
  0x78   :  { %v15_v6 = vpop.permute.xlu0 %14  }
  0x79   :  { %17 = vst.msk [vmem:[#allocation0] sm:$0x1] %vm16_vm2, %v15_v6  }
  0x7a   :  { %24 = vst.msk [vmem:[#allocation0] ss:$8 sm:$0x3] %vm23_vm3, %v22_v5  }
  0x81   :  { %v29_v7 = vld [vmem:[#allocation0] sm:$0x1]  ;;  %v34_v8 = vld [vmem:[#allocation0 + $0x8] sm:$0x1] }
  0x82   :  { %32 = vst [vmem:[%s78_s1] sm:$0x1] %v29_v7  ;;  %42 = vst [vmem:[%s78_s1 + $0x1] sm:$0x1] %v34_v8 }

// kernel: encoder_forward.1
= control target key start
LH: loop header
LB: loop body
LE: loop exit
PB: predicated region body
PF: predicated region fallthrough
CT: control target
= control target key end

     0   :  { %s3491_s25 = smov 0   ;;  %s5436_s0 = inlined_call_operand.vmem [shape: f32[2,30,30], index: 0, kind: input, shape index: {}]   ;;  %s5437_s1 = inlined_call_operand.vmem [shape: f32[3,30,224], index: 1, kind: input, shape index: {}]   ;;  %s5438_s2 = inlined_call_operand.vmem [shape: f32[1,224], index: 2, kind: input, shape index: {}]   ;;  %s5439_s3 = inlined_call_operand.vmem [shape: f32[3,13,28], index: 3, kind: input, shape index: {}]   ;;  %s5440_s4 = inlined_call_operand.vmem [shape: f32[3,224,208], index: 4, kind: input, shape index: {}]   ;;  %s5441_s5 = inlined_call_operand.vmem [shape: f32[1,208], index: 5, kind: input, shape index: {}]   ;;  %s5442_s6 = inlined_call_operand.vmem [shape: f32[3,6,13], index: 6, kind: input, shape index: {}]   ;;  %s5443_s7 = inlined_call_operand.vmem [shape: f32[3,208,192], index: 7, kind: input, shape index: {}]   ;;  %s5444_s8 = inlined_call_operand.vmem [shape: f32[1,192], index: 8, kind: input, shape index: {}]   ;;  %s5445_s9 = inlined_call_operand.vmem [shape: f32[6,192,128], index: 9, kind: input, shape index: {}]   ;;  %s5446_s10 = inlined_call_operand.vmem [shape: f32[1,128], index: 10, kind: input, shape index: {}]   ;;  %s5447_s11 = inlined_call_operand.vmem [shape: f32[128,32], index: 11, kind: input, shape index: {}]   ;;  %s5448_s12 = inlined_call_operand.vmem [shape: f32[1,32], index: 12, kind: input, shape index: {}]   ;;  %s5449_s13 = inlined_call_operand.vmem [shape: f32[2,1,32], index: 13, kind: output, shape index: {}]  }
   0x1 LB: > { %s2919_s26 = sadd.s32 4294967295, %s3417_s25   ;;  %p2923_p0 = scmp.ge.s32.totalorder %s3417_s25, 1  ;;  %s3417_s25 = sphi %s3491_s25, %s23_s25  }
   0x2   : > { %p387_p1 = scmp.lt.s32.totalorder %s3417_s25, 3 }
   0x4   : > { %p388_p2 = pnand %p2923_p0, %p387_p1 }
   0x5   : > { %p429_p3 = scmp.lt.s32.totalorder (!%p388_p2), %s2919_s26, 1 }
   0x6   : > { %391 = sbr.rel (%p388_p2) target bundleno = 1969 (0x7b1), region = 72 }
   0xb   : > { %v2933_v0 = vld [vmem:[%s5437_s1 + $0x78] sm:$0x3f]  ;;  %vm479_vm0 = vcmask 1045504   ;;  %v2932_v1 = vld [vmem:[%s5437_s1 + $0x70] sm:$0x3f]  ;;  %v2931_v2 = vld [vmem:[%s5437_s1 + $0x68] sm:$0xff] }
   0xc   : > { %2934 = vmatprep.subr.msk.mxu0 %vm479_vm0, %v2933_v0  ;;  %3393 = vmatprep.subr.msk.mxu1 %vm479_vm0, %v2933_v0  ;;  %v2930_v3 = vld [vmem:[%s5437_s1 + $0x60] sm:$0xff]  ;;  %v2929_v4 = vld [vmem:[%s5437_s1 + $0x58] sm:$0xff]  ;;  %v2928_v5 = vld [vmem:[%s5437_s1 + $0x50] sm:$0xff]  ;;  %s5451_s26 = smov (!%p429_p3, %s2919_s26), 1  ;;  %vm462_vm1 = vcmask 1046528   ;;  %vm470_vm2 = vcmask 244736  }
   0xd   : > { %2935 = vmatpush1.msk.msra.mxu0 %vm479_vm0, %v2932_v1  ;;  %3397 = vmatpush1.msk.msra.mxu1 %vm479_vm0, %v2932_v1  ;;  %v2927_v6 = vld [vmem:[%s5437_s1 + $0x48] sm:$0xff]  ;;  %v2926_v7 = vld [vmem:[%s5437_s1 + $0x40] sm:$0xff]  ;;  %s3340_s28 = sshll.u32 %s5451_s26, 5  ;;  %v448_v8 = vld [vmem:[%s5437_s1 + $0x38] sm:$0x3f]  ;;  %v3419_v16 = vmov 0.0   ;;  %s436_s27 = scalar_lea.vmem %s5449_s13, %s5451_s26 }
   0xe   : > { %512 = vmatprep.subr.mxu0 %v2931_v2  ;;  %3394 = vmatprep.subr.mxu1 %v2931_v2  ;;  %s433_s14 = scalar_lea.vmem %s5436_s0, %s3340_s28  ;;  %v2953_v9 = vld [vmem:[%s5437_s1 + $0xb8] sm:$0x3f]  ;;  %v2952_v19 = vld [vmem:[%s5437_s1 + $0xb0] sm:$0x3f]  ;;  %v2951_v22 = vld [vmem:[%s5437_s1 + $0xa8] sm:$0xff]  ;;  %vm842_vm3 = vcmask 1043456  }
   0xf   : > { %513 = vmatpush1.msra.mxu0 %v2930_v3  ;;  %3398 = vmatpush1.msra.mxu1 %v2930_v3  ;;  %v437_v10 = vld [vmem:[%s433_s14] sm:$0xff]  ;;  %v3539_v11 = vld [vmem:[%s433_s14 + $0x8] sm:$0xff]  ;;  %v3541_v12 = vld [vmem:[%s433_s14 + $0x10] sm:$0xff]  ;;  %vm835_vm4 = vcmask 228352   ;;  %vm1125_vm5 = vcmask 785408   ;;  %vm1547_vm6 = vcmask 1044480  }
  0x10   : > { %514 = vmatprep.subr.mxu0 %v2929_v4  ;;  %3395 = vmatprep.subr.mxu1 %v2929_v4  ;;  %v463_v13 = vrot.slane %v437_v10, 1  ;;  %v464_v14 = vrot.slane %v3539_v11, 1  ;;  %v3544_v15 = vld [vmem:[%s433_s14 + $0x18] sm:$0x3f]  ;;  %v466_v17 = vrot.slane %v3541_v12, 1  ;;  %v446_v24 = vld [vmem:[%s5437_s1 + $0x28] sm:$0xff] }
  0x11   : > { %515 = vmatpush1.msra.mxu0 %v2928_v5  ;;  %3399 = vmatpush1.msra.mxu1 %v2928_v5  ;;  %v468_v18 = vrot.slane %v3544_v15, 1  ;;  %v447_v21 = vld [vmem:[%s5437_s1 + $0x30] sm:$0x3f]  ;;  %v445_v25 = vld [vmem:[%s5437_s1 + $0x20] sm:$0xff]  ;;  %v444_v28 = vld [vmem:[%s5437_s1 + $0x18] sm:$0xff]  ;;  %v687_v31 = vrot.slane %v437_v10, 2 }
  0x12   : > { %516 = vmatprep.subr.mxu0 %v2927_v6  ;;  %3396 = vmatprep.subr.mxu1 %v2927_v6  ;;  %v465_v20 = vsel %vm462_vm1, %v463_v13, %v464_v14  ;;  %v2950_v26 = vld [vmem:[%s5437_s1 + $0xa0] sm:$0xff]  ;;  %v467_v27 = vsel %vm462_vm1, %v464_v14, %v466_v17  ;;  %v2949_v29 = vld [vmem:[%s5437_s1 + $0x98] sm:$0xff]  ;;  %v443_v30 = vld [vmem:[%s5437_s1 + $0x10] sm:$0xff]  ;;  %v688_v32 = vrot.slane %v3539_v11, 2  ;;  %v690_v39 = vrot.slane %v3541_v12, 2 }
  0x13   : > { %517 = vmatpush1.msra.mxu0 %v2926_v7  ;;  %3400 = vmatpush1.msra.mxu1 %v2926_v7  ;;  %v469_v23 = vsel %vm462_vm1, %v466_v17, %v468_v18  ;;  %v2948_v33 = vld [vmem:[%s5437_s1 + $0x90] sm:$0xff]  ;;  %v442_v34 = vld [vmem:[%s5437_s1 + $0x8] sm:$0xff]  ;;  %v441_v36 = vld [vmem:[%s5437_s1] sm:$0xff]  ;;  %v692_v44 = vrot.slane %v3544_v15, 2  ;;  %vm1543_vm7 = vcmask 105472   ;;  %vm1806_vm8 = vcmask 654336  }
  0x14   : > { %550 = vmatprep.mubr.f32.mxu0 %v3419_v16  ;;  %562 = vmatprep.mubr.f32.mxu1 %v3419_v16  ;;  %v2947_v35 = vld [vmem:[%s5437_s1 + $0x88] sm:$0xff]  ;;  %v2946_v37 = vld [vmem:[%s5437_s1 + $0x80] sm:$0xff]  ;;  %v689_v38 = vsel %vm479_vm0, %v687_v31, %v688_v32  ;;  %v3001_v40 = vld [vmem:[%s5440_s4 + $0x2b8] sm:$0xff]  ;;  %v691_v43 = vsel %vm479_vm0, %v688_v32, %v690_v39  ;;  %vm2201_vm9 = vcmask 523264   ;;  %vm3420_vm10 = vmmov 0  }
  0x15   : > { %2940 = vmatprep.subr.msk.mxu1 %vm479_vm0, %v448_v8  ;;  %2954 = vmatprep.subr.msk.mxu0 %vm479_vm0, %v2953_v9  ;;  %v3000_v41 = vld [vmem:[%s5440_s4 + $0x2b0] sm:$0xff]  ;;  %v2999_v42 = vld [vmem:[%s5440_s4 + $0x2a8] sm:$0xff]  ;;  %v2998_v45 = vld [vmem:[%s5440_s4 + $0x2a0] sm:$0xff]  ;;  %v693_v48 = vsel %vm479_vm0, %v690_v39, %v692_v44  ;;  %vm2870_vm11 = vcmask 253952  }
  0x16   : > { %2936 = vmatmul.mubr.msk.f32.vlgmr.msra.gmra.mxu0 %vm470_vm2, %v465_v20  ;;  %2938 = vmatmul.mubr.msk.f32.vlgmr.msra.gmra.mxu1 %vm470_vm2, %v469_v23  ;;  %v2997_v46 = vld [vmem:[%s5440_s4 + $0x298] sm:$0xff]  ;;  %v2996_v47 = vld [vmem:[%s5440_s4 + $0x290] sm:$0xff]  ;;  %v2995_v49 = vld [vmem:[%s5440_s4 + $0x288] sm:$0xff] }
  0x17   : > { %2955 = vmatpush1.msk.msra.mxu0 %vm479_vm0, %v2952_v19  ;;  %2941 = vmatpush1.msk.msra.mxu1 %vm479_vm0, %v447_v21  ;;  %v2994_v50 = vld [vmem:[%s5440_s4 + $0x280] sm:$0xff]  ;;  %v2993_v51 = vld [vmem:[%s5440_s4 + $0x278] sm:$0xff]  ;;  %v2992_v52 = vld [vmem:[%s5440_s4 + $0x270] sm:$0xff] }
  0x18   : > { %734 = vmatprep.subr.mxu0 %v2951_v22  ;;  %615 = vmatprep.subr.mxu1 %v446_v24  ;;  %v2991_v53 = vld [vmem:[%s5440_s4 + $0x268] sm:$0xff]  ;;  %v2990_v54 = vld [vmem:[%s5440_s4 + $0x260] sm:$0xff]  ;;  %v2989_v55 = vld [vmem:[%s5440_s4 + $0x258] sm:$0xff] }
  0x19   : > { %556 = vmatprep.mubr.f32.mxu0 %v3419_v16  ;;  %568 = vmatprep.mubr.f32.mxu1 %v3419_v16  ;;  %v2988_v56 = vld [vmem:[%s5440_s4 + $0x250] sm:$0xff]  ;;  %v2987_v57 = vld [vmem:[%s5440_s4 + $0x248] sm:$0xff]  ;;  %v2986_v58 = vld [vmem:[%s5440_s4 + $0x240] sm:$0xff] }
  0x1a   : > { %616 = vmatpush1.msra.mxu1 %v445_v25  ;;  %735 = vmatpush1.msra.mxu0 %v2950_v26  ;;  %v2985_v59 = vld [vmem:[%s5440_s4 + $0x238] sm:$0xff]  ;;  %v2984_v60 = vld [vmem:[%s5440_s4 + $0x230] sm:$0xff]  ;;  %v2983_v61 = vld [vmem:[%s5440_s4 + $0x228] sm:$0xff] }
  0x1b   : > { %2939 = vmatmul.mubr.msk.f32.gmra.mxu1 %vm470_vm2, %v468_v18  ;;  %2937 = vmatmul.mubr.msk.f32.gmra.mxu0 %vm470_vm2, %v467_v27  ;;  %v2982_v62 = vld [vmem:[%s5440_s4 + $0x220] sm:$0xff]  ;;  %v2981_v63 = vld [vmem:[%s5440_s4 + $0x218] sm:$0xff]  ;;  %v2980_v0 = vld [vmem:[%s5440_s4 + $0x210] sm:$0xff] }
  0x1c   : > { %617 = vmatprep.subr.mxu1 %v444_v28  ;;  %736 = vmatprep.subr.mxu0 %v2949_v29  ;;  %v2979_v1 = vld [vmem:[%s5440_s4 + $0x208] sm:$0xff]  ;;  %v2978_v2 = vld [vmem:[%s5440_s4 + $0x200] sm:$0xff]  ;;  %v2977_v3 = vld [vmem:[%s5440_s4 + $0x1f8] sm:$0xff] }
  0x1d   : > { %618 = vmatpush1.msra.mxu1 %v443_v30  ;;  %737 = vmatpush1.msra.mxu0 %v2948_v33  ;;  %v2976_v4 = vld [vmem:[%s5440_s4 + $0x1f0] sm:$0xff]  ;;  %v2975_v5 = vld [vmem:[%s5440_s4 + $0x1e8] sm:$0xff]  ;;  %v2974_v6 = vld [vmem:[%s5440_s4 + $0x1e0] sm:$0xff] }
  0x1e   : > { %619 = vmatprep.subr.mxu1 %v442_v34  ;;  %738 = vmatprep.subr.mxu0 %v2947_v35  ;;  %v2973_v7 = vld [vmem:[%s5440_s4 + $0x1d8] sm:$0xff]  ;;  %v2972_v8 = vld [vmem:[%s5440_s4 + $0x1d0] sm:$0xff]  ;;  %v2971_v9 = vld [vmem:[%s5440_s4 + $0x1c8] sm:$0xff] }
  0x1f   : > { %620 = vmatpush1.msra.mxu1 %v441_v36  ;;  %653 = vmatprep.mubr.f32.mxu1 %v3419_v16  ;;  %v3023_v13 = vld [vmem:[%s5440_s4 + $0x368] sm:$0xff]  ;;  %v3022_v14 = vld [vmem:[%s5440_s4 + $0x360] sm:$0xff]  ;;  %v3020_v17 = vld [vmem:[%s5440_s4 + $0x350] sm:$0xff] }
  0x20   : > { %739 = vmatpush1.msra.mxu0 %v2946_v37  ;;  %772 = vmatprep.mubr.f32.mxu0 %v3419_v16  ;;  %v3019_v18 = vld [vmem:[%s5440_s4 + $0x348] sm:$0xff]  ;;  %v3018_v19 = vld [vmem:[%s5440_s4 + $0x340] sm:$0xff]  ;;  %v3017_v20 = vld [vmem:[%s5440_s4 + $0x338] sm:$0xff] }
  0x21   : > { %2942 = vmatmul.mubr.msk.f32.vlgmr.msra.gmra.mxu1 %vm470_vm2, %v437_v10  ;;  %2956 = vmatmul.mubr.msk.f32.vlgmr.msra.gmra.mxu0 %vm470_vm2, %v689_v38  ;;  %v2970_v10 = vld [vmem:[%s5440_s4 + $0x1c0] sm:$0xff]  ;;  %v3016_v21 = vld [vmem:[%s5440_s4 + $0x330] sm:$0xff]  ;;  %v3015_v22 = vld [vmem:[%s5440_s4 + $0x328] sm:$0xff] }
  0x22   : > { %659 = vmatprep.mubr.f32.mxu1 %v3419_v16  ;;  %778 = vmatprep.mubr.f32.mxu0 %v3419_v16  ;;  %v3014_v23 = vld [vmem:[%s5440_s4 + $0x320] sm:$0xff]  ;;  %v3013_v24 = vld [vmem:[%s5440_s4 + $0x318] sm:$0xff]  ;;  %v3012_v25 = vld [vmem:[%s5440_s4 + $0x310] sm:$0xff] }
  0x23   : > { %1132 = vmatprep.subr.mxu0 %v3001_v40  ;;  %v3011_v26 = vld [vmem:[%s5440_s4 + $0x308] sm:$0xff]  ;;  %v3010_v27 = vld [vmem:[%s5440_s4 + $0x300] sm:$0xff]  ;;  %v3009_v28 = vld [vmem:[%s5440_s4 + $0x2f8] sm:$0xff] }
  0x24   : > { %1133 = vmatpush1.msra.mxu0 %v3000_v41  ;;  %v3008_v29 = vld [vmem:[%s5440_s4 + $0x2f0] sm:$0xff]  ;;  %v3007_v30 = vld [vmem:[%s5440_s4 + $0x2e8] sm:$0xff]  ;;  %v3006_v31 = vld [vmem:[%s5440_s4 + $0x2e0] sm:$0xff] }
  0x25   : > { %2943 = vmatmul.mubr.msk.f32.gmra.mxu1 %vm470_vm2, %v3539_v11  ;;  %1134 = vmatprep.subr.mxu0 %v2999_v42  ;;  %v3025_v11 = vld [vmem:[%s5440_s4 + $0x378] sm:$0xff]  ;;  %v3004_v33 = vld [vmem:[%s5440_s4 + $0x2d0] sm:$0xff]  ;;  %v3003_v34 = vld [vmem:[%s5440_s4 + $0x2c8] sm:$0xff] }
  0x26   : > { %2957 = vmatmul.mubr.msk.f32.gmra.mxu0 %vm470_vm2, %v691_v43  ;;  %665 = vmatprep.mubr.f32.mxu1 %v3419_v16  ;;  %v3005_v32 = vld [vmem:[%s5440_s4 + $0x2d8] sm:$0xff]  ;;  %v3002_v35 = vld [vmem:[%s5440_s4 + $0x2c0] sm:$0xff] }
  0x27   : > { %784 = vmatprep.mubr.f32.mxu0 %v3419_v16  ;;  %1135 = vmatpush1.msra.mxu0 %v2998_v45 }
  0x28   : > { %1136 = vmatprep.subr.mxu0 %v2997_v46 }
  0x29   : > { %2944 = vmatmul.mubr.msk.f32.gmra.mxu1 %vm470_vm2, %v3541_v12  ;;  %1137 = vmatpush1.msra.mxu0 %v2996_v47  ;;  %v3024_v12 = vld [vmem:[%s5440_s4 + $0x370] sm:$0xff] }
  0x2a   : > { %2958 = vmatmul.mubr.msk.f32.gmra.mxu0 %vm470_vm2, %v693_v48  ;;  %671 = vmatprep.mubr.f32.mxu1 %v3419_v16  ;;  %v807_v48 = vlaneseq }
  0x2b   : > { %790 = vmatprep.mubr.f32.mxu0 %v3419_v16  ;;  %1138 = vmatprep.subr.mxu0 %v2995_v49 }
  0x2c   : > { %1139 = vmatpush1.msra.mxu0 %v2994_v50 }
  0x2d   : > { %2945 = vmatmul.mubr.msk.f32.gmra.mxu1 %vm470_vm2, %v3544_v15  ;;  %1140 = vmatprep.subr.mxu0 %v2993_v51  ;;  %v3021_v15 = vld [vmem:[%s5440_s4 + $0x358] sm:$0xff] }
  0x2e   : > { %2959 = vmatmul.mubr.msk.f32.gmra.mxu0 %vm470_vm2, %v692_v44  ;;  %913 = vmatprep.mubr.f32.mxu1 %v3419_v16 }
  0x2f   : > { %1141 = vmatpush1.msra.mxu0 %v2992_v52 }
  0x30   : > { %1142 = vmatprep.subr.mxu0 %v2991_v53  ;;  %v808_v53 = vshrl.u32 %v807_v48, 7  ;;  %v949_v48 = vld [vmem:[%s5440_s4 + $0xb8] sm:$0xff] }
  0x31   : > { %1143 = vmatpush1.msra.mxu0 %v2990_v54 }
  0x32   : > { %1144 = vmatprep.subr.mxu0 %v2989_v55 }
  0x33   : > { %1145 = vmatpush1.msra.mxu0 %v2988_v56 }
  0x34   : > { %1146 = vmatprep.subr.mxu0 %v2987_v57 }
  0x35   : > { %1147 = vmatpush1.msra.mxu0 %v2986_v58 }
  0x36   : > { %1148 = vmatprep.subr.mxu0 %v2985_v59  ;;  %v3799_v59 = vsub.s32 0, %v808_v53 }
  0x37   : > { %1149 = vmatpush1.msra.mxu0 %v2984_v60 }
  0x38   : > { %1150 = vmatprep.subr.mxu0 %v2983_v61 }
  0x39   : > { %1151 = vmatpush1.msra.mxu0 %v2982_v62  ;;  %v805_v62 = vld [vmem:[%s5438_s2] sm:$0x3] }
  0x3a   : > { %1152 = vmatprep.subr.mxu0 %v2981_v63  ;;  %v3804_v63 = vsub.s32 1, %v808_v53  ;;  %v944_v53 = vld [vmem:[%s5440_s4 + $0x90] sm:$0xff] }
  0x3b   : > { %1153 = vmatpush1.msra.mxu0 %v2980_v0 }
  0x3c   : > { %1154 = vmatprep.subr.mxu0 %v2979_v1 }
  0x3d   : > { %1155 = vmatpush1.msra.mxu0 %v2978_v2 }
  0x3e   : > { %1156 = vmatprep.subr.mxu0 %v2977_v3 }
  0x3f   : > { %1157 = vmatpush1.msra.mxu0 %v2976_v4 }
  0x40   : > { %1158 = vmatprep.subr.mxu0 %v2975_v5 }
  0x41   : > { %1159 = vmatpush1.msra.mxu0 %v2974_v6 }
  0x42   : > { %1160 = vmatprep.subr.mxu0 %v2973_v7 }
  0x43   : > { %1161 = vmatpush1.msra.mxu0 %v2972_v8 }
  0x44   : > { %1162 = vmatprep.subr.mxu0 %v2971_v9 }
  0x45   : > { %1163 = vmatpush1.msra.mxu0 %v2970_v10  ;;  %v810_v10 = vrot.slane %v805_v62, %v3799_v59 }
  0x46   : > { %1172 = vmatprep.subr.mxu0 %v3025_v11 }
  0x47   : > { %1173 = vmatpush2.msra.mxu0 %v3024_v12 }
  0x48   : > { %1174 = vmatprep.subr.mxu0 %v3023_v13  ;;  %v814_v13 = vrot.slane %v805_v62, %v3804_v63  ;;  %v936_v62 = vld [vmem:[%s5440_s4 + $0x50] sm:$0xff] }
  0x49   : > { %1175 = vmatpush2.msra.mxu0 %v3022_v14 }
  0x4a   : > { %1176 = vmatprep.subr.mxu0 %v3021_v15 }
  0x4b   : > { %1177 = vmatpush2.msra.mxu0 %v3020_v17 }
  0x4c   : > { %1178 = vmatprep.subr.mxu0 %v3019_v18 }
  0x4d   : > { %1179 = vmatpush2.msra.mxu0 %v3018_v19 }
  0x4e   : > { %1180 = vmatprep.subr.mxu0 %v3017_v20 }
  0x4f   : > { %1181 = vmatpush2.msra.mxu0 %v3016_v21 }
  0x50   : > { %1182 = vmatprep.subr.mxu0 %v3015_v22 }
  0x51   : > { %1183 = vmatpush2.msra.mxu0 %v3014_v23 }
  0x52   : > { %1184 = vmatprep.subr.mxu0 %v3013_v24 }
  0x53   : > { %1185 = vmatpush2.msra.mxu0 %v3012_v25 }
  0x54   : > { %1186 = vmatprep.subr.mxu0 %v3011_v26 }
  0x55   : > { %1187 = vmatpush2.msra.mxu0 %v3010_v27 }
  0x56   : > { %1188 = vmatprep.subr.mxu0 %v3009_v28 }
  0x57   : > { %1189 = vmatpush2.msra.mxu0 %v3008_v29 }
  0x58   : > { %1190 = vmatprep.subr.mxu0 %v3007_v30 }
  0x59   : > { %1191 = vmatpush2.msra.mxu0 %v3006_v31 }
  0x5a   : > { %1192 = vmatprep.subr.mxu0 %v3005_v32 }
  0x5b   : > { %1193 = vmatpush2.msra.mxu0 %v3004_v33 }
  0x5c   : > { %1194 = vmatprep.subr.mxu0 %v3003_v34 }
  0x5d   : > { %1195 = vmatpush2.msra.mxu0 %v3002_v35 }
  0xd6   : > { %v552_v36 = vpop.f32.mrf.mxu0  ;;  %v564_v37 = vpop.f32.mrf.mxu1 }
  0xd8   : > { %v554_v38 = vpop.f32.mrf.mxu0  ;;  %v566_v39 = vpop.f32.mrf.mxu1 }
  0xdb   : > { %v570_v40 = vpop.f32.mrf.mxu1  ;;  %v558_v41 = vpop.f32.mrf.mxu0 }
  0xdd   : > { %v572_v42 = vpop.f32.mrf.mxu1  ;;  %v560_v43 = vpop.f32.mrf.mxu0 }
  0xe1   : > { %v655_v44 = vpop.f32.mrf.mxu1  ;;  %v774_v45 = vpop.f32.mrf.mxu0 }
  0xe2   : > { %v656_v9 = vadd.f32 %v655_v44, %v552_v36  ;;  %v833_v36 = vld [vmem:[%s5439_s3] sm:$0xff]  ;;  %v953_v44 = vld [vmem:[%s5440_s4 + $0xd8] sm:$0xff] }
  0xe3   : > { %v657_v46 = vpop.f32.mrf.mxu1  ;;  %v776_v47 = vpop.f32.mrf.mxu0 }
  0xe4   : > { %v658_v5 = vadd.f32 %v657_v46, %v554_v38  ;;  %v797_v22 = vadd.f32 %v774_v45, %v656_v9  ;;  %v2964_v38 = vld [vmem:[%s5439_s3 + $0x10] sm:$0xff]  ;;  %v951_v46 = vld [vmem:[%s5440_s4 + $0xc8] sm:$0xff]  ;;  %v926_v9 = vld [vmem:[%s5440_s4] sm:$0xff] }
  0xe5   : > { %v661_v49 = vpop.f32.mrf.mxu1  ;;  %v952_v45 = vld [vmem:[%s5440_s4 + $0xd0] sm:$0xff] }
  0xe6   : > { %v780_v50 = vpop.f32.mrf.mxu0  ;;  %v662_v3 = vadd.f32 %v661_v49, %v558_v41  ;;  %v798_v19 = vadd.f32 %v776_v47, %v658_v5  ;;  %v817_v30 = vadd.f32 %v810_v10, %v797_v22  ;;  %v955_v41 = vld [vmem:[%s5440_s4 + $0xe8] sm:$0xff]  ;;  %v950_v47 = vld [vmem:[%s5440_s4 + $0xc0] sm:$0xff]  ;;  %v948_v49 = vld [vmem:[%s5440_s4 + $0xb0] sm:$0xff] }
  0xe7   : > { %v663_v51 = vpop.f32.mrf.mxu1  ;;  %v930_v5 = vld [vmem:[%s5440_s4 + $0x20] sm:$0xff] }
  0xe8   : > { %v782_v52 = vpop.f32.mrf.mxu0  ;;  %v664_v0 = vadd.f32 %v663_v51, %v560_v43  ;;  %v799_v17 = vadd.f32 %v780_v50, %v662_v3  ;;  %v818_v28 = vadd.f32 %v814_v13, %v798_v19  ;;  %v3827_v35 = vmax.f32 %v817_v30, 0.0  ;;  %v2965_v43 = vld [vmem:[%s5439_s3 + $0x18] sm:$0x1f]  ;;  %v947_v50 = vld [vmem:[%s5440_s4 + $0xa8] sm:$0xff]  ;;  %v946_v51 = vld [vmem:[%s5440_s4 + $0xa0] sm:$0xff] }
  0xe9   : > { %v667_v54 = vpop.f32.mrf.mxu1  ;;  %v932_v3 = vld [vmem:[%s5440_s4 + $0x30] sm:$0xff]  ;;  %v973_v19 = vld [vmem:[%s5440_s4 + $0x178] sm:$0xff]  ;;  %v970_v22 = vld [vmem:[%s5440_s4 + $0x160] sm:$0xff] }
  0xea   : > { %v786_v55 = vpop.f32.mrf.mxu0  ;;  %v668_v60 = vadd.f32 %v667_v54, %v564_v37  ;;  %v800_v14 = vadd.f32 %v782_v52, %v664_v0  ;;  %v819_v26 = vadd.f32 %v810_v10, %v799_v17  ;;  %v3824_v34 = vmax.f32 %v818_v28, 0.0  ;;  %v834_v37 = vld [vmem:[%s5439_s3 + $0x8] sm:$0x1f]  ;;  %v945_v52 = vld [vmem:[%s5440_s4 + $0x98] sm:$0xff]  ;;  %v964_v30 = vld [vmem:[%s5440_s4 + $0x130] sm:$0xff] }
  0xeb   : > { %v669_v56 = vpop.f32.mrf.mxu1  ;;  %v943_v54 = vld [vmem:[%s5440_s4 + $0x88] sm:$0xff]  ;;  %v965_v28 = vld [vmem:[%s5440_s4 + $0x138] sm:$0xff] }
  0xec   : > { %v670_v57 = vadd.f32 %v669_v56, %v566_v39  ;;  %v788_v58 = vpop.f32.mrf.mxu0  ;;  %v801_v11 = vadd.f32 %v786_v55, %v668_v60  ;;  %v820_v24 = vadd.f32 %v814_v13, %v800_v14  ;;  %v3821_v33 = vmax.f32 %v819_v26, 0.0  ;;  %v957_v39 = vld [vmem:[%s5440_s4 + $0xf8] sm:$0xff]  ;;  %v942_v55 = vld [vmem:[%s5440_s4 + $0x80] sm:$0xff]  ;;  %v935_v0 = vld [vmem:[%s5440_s4 + $0x48] sm:$0xff] }
  0xed   : > { %v673_v61 = vpop.f32.mrf.mxu1  ;;  %v941_v56 = vld [vmem:[%s5440_s4 + $0x78] sm:$0xff]  ;;  %v938_v60 = vld [vmem:[%s5440_s4 + $0x60] sm:$0xff]  ;;  %v975_v17 = vld [vmem:[%s5440_s4 + $0x188] sm:$0xff] }
  0xee   : > { %v674_v1 = vadd.f32 %v673_v61, %v570_v40  ;;  %v792_v2 = vpop.f32.mrf.mxu0  ;;  %v802_v6 = vadd.f32 %v788_v58, %v670_v57  ;;  %v821_v23 = vadd.f32 %v810_v10, %v801_v11  ;;  %v3818_v32 = vmax.f32 %v820_v24, 0.0  ;;  %v956_v40 = vld [vmem:[%s5440_s4 + $0xf0] sm:$0xff]  ;;  %v939_v58 = vld [vmem:[%s5440_s4 + $0x68] sm:$0xff]  ;;  %v937_v61 = vld [vmem:[%s5440_s4 + $0x58] sm:$0xff] }
  0xef   : > { %v675_v4 = vpop.f32.mrf.mxu1  ;;  %v940_v57 = vld [vmem:[%s5440_s4 + $0x70] sm:$0xff]  ;;  %v977_v14 = vld [vmem:[%s5440_s4 + $0x198] sm:$0xff]  ;;  %v966_v26 = vld [vmem:[%s5440_s4 + $0x140] sm:$0xff] }
  0xf0   : > { %v803_v7 = vadd.f32 %v792_v2, %v674_v1  ;;  %v676_v8 = vadd.f32 %v675_v4, %v572_v42  ;;  %v794_v12 = vpop.f32.mrf.mxu0  ;;  %v822_v20 = vadd.f32 %v814_v13, %v802_v6  ;;  %v3814_v31 = vmax.f32 %v821_v23, 0.0  ;;  %v954_v42 = vld [vmem:[%s5440_s4 + $0xe0] sm:$0xff]  ;;  %v933_v2 = vld [vmem:[%s5440_s4 + $0x38] sm:$0xff]  ;;  %v931_v4 = vld [vmem:[%s5440_s4 + $0x28] sm:$0xff] }
  0xf1   : > { %v934_v1 = vld [vmem:[%s5440_s4 + $0x40] sm:$0xff]  ;;  %v929_v6 = vld [vmem:[%s5440_s4 + $0x18] sm:$0xff]  ;;  %v980_v11 = vld [vmem:[%s5440_s4 + $0x1b0] sm:$0xff] }
  0xf2   : > { %v804_v15 = vadd.f32 %v794_v12, %v676_v8  ;;  %v823_v18 = vadd.f32 %v810_v10, %v803_v7  ;;  %v3810_v29 = vmax.f32 %v822_v20, 0.0  ;;  %v928_v7 = vld [vmem:[%s5440_s4 + $0x10] sm:$0xff]  ;;  %v927_v8 = vld [vmem:[%s5440_s4 + $0x8] sm:$0xff]  ;;  %v981_v10 = vld [vmem:[%s5440_s4 + $0x1b8] sm:$0xff] }
  0xf3   : > { %v979_v12 = vld [vmem:[%s5440_s4 + $0x1a8] sm:$0xff]  ;;  %v972_v20 = vld [vmem:[%s5440_s4 + $0x170] sm:$0xff]  ;;  %v969_v23 = vld [vmem:[%s5440_s4 + $0x158] sm:$0xff] }
  0xf4   : > { %v824_v21 = vadd.f32 %v814_v13, %v804_v15  ;;  %v3808_v27 = vmax.f32 %v823_v18, 0.0  ;;  %v978_v13 = vld [vmem:[%s5440_s4 + $0x1a0] sm:$0xff]  ;;  %v976_v15 = vld [vmem:[%s5440_s4 + $0x190] sm:$0xff] }
  0xf5   : > { %v974_v18 = vld [vmem:[%s5440_s4 + $0x180] sm:$0xff]  ;;  %v968_v24 = vld [vmem:[%s5440_s4 + $0x150] sm:$0xff] }
  0xf6   : > { %v832_v25 = vmax.f32 %v824_v21, 0.0  ;;  %v971_v21 = vld [vmem:[%s5440_s4 + $0x168] sm:$0xff] }
  0xf8   : > { %2960 = vmatprep.subr.msk.mxu1 %vm842_vm3, %v832_v25  ;;  %3032 = vmatprep.subr.msk.mxu0 %vm842_vm3, %v832_v25 }
  0xf9   : > { %2961 = vmatpush1.msk.msra.mxu1 %vm842_vm3, %v3808_v27 }
  0xfa   : > { %875 = vmatprep.subr.mxu1 %v3810_v29 }
  0xfb   : > { %876 = vmatpush1.msra.mxu1 %v3814_v31 }
  0xfc   : > { %877 = vmatprep.subr.mxu1 %v3818_v32 }
  0xfd   : > { %878 = vmatpush1.msra.mxu1 %v3821_v33 }
  0xfe   : > { %879 = vmatprep.subr.mxu1 %v3824_v34 }
  0xff   : > { %880 = vmatpush1.msra.mxu1 %v3827_v35 }
 0x100   : > { %2962 = vmatmul.mubr.msk.f32.vlgmr.msra.gmra.mxu1 %vm835_vm4, %v833_v36  ;;  %2966 = vmatprep.subr.msk.mxu1 %vm842_vm3, %v832_v25  ;;  %v967_v25 = vld [vmem:[%s5440_s4 + $0x148] sm:$0xff] }
 0x101   : > { %2967 = vmatpush1.msk.msra.mxu1 %vm842_vm3, %v3808_v27  ;;  %919 = vmatprep.mubr.f32.mxu1 %v3419_v16  ;;  %v963_v36 = vld [vmem:[%s5440_s4 + $0x128] sm:$0xff] }
 0x102   : > { %1017 = vmatprep.subr.mxu1 %v3810_v29 }
 0x103   : > { %1018 = vmatpush1.msra.mxu1 %v3814_v31 }
 0x104   : > { %2963 = vmatmul.mubr.msk.f32.gmra.mxu1 %vm835_vm4, %v834_v37  ;;  %1019 = vmatprep.subr.mxu1 %v3818_v32  ;;  %v962_v37 = vld [vmem:[%s5440_s4 + $0x120] sm:$0xff] }
 0x105   : > { %1020 = vmatpush1.msra.mxu1 %v3821_v33  ;;  %1055 = vmatprep.mubr.f32.mxu1 %v3419_v16 }
 0x106   : > { %1021 = vmatprep.subr.mxu1 %v3824_v34 }
 0x107   : > { %1022 = vmatpush1.msra.mxu1 %v3827_v35 }
 0x108   : > { %2968 = vmatmul.mubr.msk.f32.vlgmr.msra.gmra.mxu1 %vm835_vm4, %v2964_v38  ;;  %1215 = vmatprep.subr.mxu1 %v957_v39  ;;  %v961_v38 = vld [vmem:[%s5440_s4 + $0x118] sm:$0xff]  ;;  %v960_v39 = vld [vmem:[%s5440_s4 + $0x110] sm:$0xff] }
 0x109   : > { %1061 = vmatprep.mubr.f32.mxu1 %v3419_v16  ;;  %1216 = vmatpush1.msra.mxu1 %v956_v40  ;;  %v959_v40 = vld [vmem:[%s5440_s4 + $0x108] sm:$0xff] }
 0x10a   : > { %1217 = vmatprep.subr.mxu1 %v955_v41  ;;  %v958_v41 = vld [vmem:[%s5440_s4 + $0x100] sm:$0xff] }
 0x10b   : > { %1218 = vmatpush1.msra.mxu1 %v954_v42 }
 0x10c   : > { %2969 = vmatmul.mubr.msk.f32.gmra.mxu1 %vm835_vm4, %v2965_v43  ;;  %1219 = vmatprep.subr.mxu1 %v953_v44 }
 0x10d   : > { %1220 = vmatpush1.msra.mxu1 %v952_v45 }
 0x10e   : > { %1221 = vmatprep.subr.mxu1 %v951_v46 }
 0x10f   : > { %1222 = vmatpush1.msra.mxu1 %v950_v47 }
 0x110   : > { %1223 = vmatprep.subr.mxu1 %v949_v48 }
 0x111   : > { %1224 = vmatpush1.msra.mxu1 %v948_v49 }
 0x112   : > { %1225 = vmatprep.subr.mxu1 %v947_v50  ;;  %v3030_v50 = vld [vmem:[%s5439_s3 + $0x20] sm:$0xff] }
 0x113   : > { %1226 = vmatpush1.msra.mxu1 %v946_v51  ;;  %v3061_v51 = vld [vmem:[%s5440_s4 + $0x448] sm:$0xff] }
 0x114   : > { %1227 = vmatprep.subr.mxu1 %v945_v52  ;;  %v3060_v52 = vld [vmem:[%s5440_s4 + $0x440] sm:$0xff] }
 0x115   : > { %1228 = vmatpush1.msra.mxu1 %v944_v53  ;;  %v3059_v53 = vld [vmem:[%s5440_s4 + $0x438] sm:$0xff] }
 0x116   : > { %1229 = vmatprep.subr.mxu1 %v943_v54  ;;  %v3058_v54 = vld [vmem:[%s5440_s4 + $0x430] sm:$0xff] }
 0x117   : > { %1230 = vmatpush1.msra.mxu1 %v942_v55  ;;  %v3057_v55 = vld [vmem:[%s5440_s4 + $0x428] sm:$0xff] }
 0x118   : > { %1231 = vmatprep.subr.mxu1 %v941_v56  ;;  %v3056_v56 = vld [vmem:[%s5440_s4 + $0x420] sm:$0xff] }
 0x119   : > { %1232 = vmatpush1.msra.mxu1 %v940_v57  ;;  %v3055_v57 = vld [vmem:[%s5440_s4 + $0x418] sm:$0xff] }
 0x11a   : > { %1233 = vmatprep.subr.mxu1 %v939_v58  ;;  %v3054_v58 = vld [vmem:[%s5440_s4 + $0x410] sm:$0xff] }
 0x11b   : > { %1234 = vmatpush1.msra.mxu1 %v938_v60  ;;  %v3053_v60 = vld [vmem:[%s5440_s4 + $0x408] sm:$0xff] }
 0x11c   : > { %1235 = vmatprep.subr.mxu1 %v937_v61  ;;  %v3052_v61 = vld [vmem:[%s5440_s4 + $0x400] sm:$0xff] }
 0x11d   : > { %1236 = vmatpush1.msra.mxu1 %v936_v62  ;;  %v3051_v62 = vld [vmem:[%s5440_s4 + $0x3f8] sm:$0xff] }
 0x11e   : > { %1237 = vmatprep.subr.mxu1 %v935_v0  ;;  %v3050_v0 = vld [vmem:[%s5440_s4 + $0x3f0] sm:$0xff] }
 0x11f   : > { %1238 = vmatpush1.msra.mxu1 %v934_v1  ;;  %v3049_v1 = vld [vmem:[%s5440_s4 + $0x3e8] sm:$0xff] }
 0x120   : > { %1239 = vmatprep.subr.mxu1 %v933_v2  ;;  %v3048_v2 = vld [vmem:[%s5440_s4 + $0x3e0] sm:$0xff] }
 0x121   : > { %1240 = vmatpush1.msra.mxu1 %v932_v3  ;;  %v3047_v3 = vld [vmem:[%s5440_s4 + $0x3d8] sm:$0xff] }
 0x122   : > { %1241 = vmatprep.subr.mxu1 %v931_v4  ;;  %v3046_v4 = vld [vmem:[%s5440_s4 + $0x3d0] sm:$0xff] }
 0x123   : > { %1242 = vmatpush1.msra.mxu1 %v930_v5  ;;  %v3045_v5 = vld [vmem:[%s5440_s4 + $0x3c8] sm:$0xff] }
 0x124   : > { %1243 = vmatprep.subr.mxu1 %v929_v6  ;;  %v3044_v6 = vld [vmem:[%s5440_s4 + $0x3c0] sm:$0xff] }
 0x125   : > { %1244 = vmatpush1.msra.mxu1 %v928_v7  ;;  %v3043_v7 = vld [vmem:[%s5440_s4 + $0x3b8] sm:$0xff] }
 0x126   : > { %1245 = vmatprep.subr.mxu1 %v927_v8  ;;  %v3042_v8 = vld [vmem:[%s5440_s4 + $0x3b0] sm:$0xff] }
 0x127   : > { %1246 = vmatpush1.msra.mxu1 %v926_v9  ;;  %v3041_v9 = vld [vmem:[%s5440_s4 + $0x3a8] sm:$0xff] }
 0x128   : > { %1255 = vmatprep.subr.mxu1 %v981_v10  ;;  %v3040_v10 = vld [vmem:[%s5440_s4 + $0x3a0] sm:$0xff] }
 0x129   : > { %1256 = vmatpush2.msra.mxu1 %v980_v11  ;;  %v3039_v11 = vld [vmem:[%s5440_s4 + $0x398] sm:$0xff] }
 0x12a   : > { %1257 = vmatprep.subr.mxu1 %v979_v12  ;;  %v3038_v12 = vld [vmem:[%s5440_s4 + $0x390] sm:$0xff] }
 0x12b   : > { %1258 = vmatpush2.msra.mxu1 %v978_v13  ;;  %v3037_v13 = vld [vmem:[%s5440_s4 + $0x388] sm:$0xff] }
 0x12c   : > { %1259 = vmatprep.subr.mxu1 %v977_v14  ;;  %v3036_v14 = vld [vmem:[%s5440_s4 + $0x380] sm:$0xff] }
 0x12d   : > { %1260 = vmatpush2.msra.mxu1 %v976_v15  ;;  %v3091_v15 = vld [vmem:[%s5440_s4 + $0x538] sm:$0xff] }
 0x12e   : > { %1261 = vmatprep.subr.mxu1 %v975_v17  ;;  %v3090_v17 = vld [vmem:[%s5440_s4 + $0x530] sm:$0xff] }
 0x12f   : > { %1262 = vmatpush2.msra.mxu1 %v974_v18  ;;  %v3089_v18 = vld [vmem:[%s5440_s4 + $0x528] sm:$0xff] }
 0x130   : > { %1263 = vmatprep.subr.mxu1 %v973_v19  ;;  %v3088_v19 = vld [vmem:[%s5440_s4 + $0x520] sm:$0xff] }
 0x131   : > { %1264 = vmatpush2.msra.mxu1 %v972_v20  ;;  %v3087_v20 = vld [vmem:[%s5440_s4 + $0x518] sm:$0xff] }
 0x132   : > { %1265 = vmatprep.subr.mxu1 %v971_v21  ;;  %v3086_v21 = vld [vmem:[%s5440_s4 + $0x510] sm:$0xff] }
 0x133   : > { %1266 = vmatpush2.msra.mxu1 %v970_v22  ;;  %v3085_v22 = vld [vmem:[%s5440_s4 + $0x508] sm:$0xff] }
 0x134   : > { %1267 = vmatprep.subr.mxu1 %v969_v23  ;;  %v3084_v23 = vld [vmem:[%s5440_s4 + $0x500] sm:$0xff] }
 0x135   : > { %1268 = vmatpush2.msra.mxu1 %v968_v24  ;;  %v3083_v24 = vld [vmem:[%s5440_s4 + $0x4f8] sm:$0xff] }
 0x136   : > { %1269 = vmatprep.subr.mxu1 %v967_v25  ;;  %v3082_v25 = vld [vmem:[%s5440_s4 + $0x4f0] sm:$0xff] }
 0x137   : > { %1270 = vmatpush2.msra.mxu1 %v966_v26  ;;  %v3081_v26 = vld [vmem:[%s5440_s4 + $0x4e8] sm:$0xff] }
 0x138   : > { %1271 = vmatprep.subr.mxu1 %v965_v28  ;;  %v3080_v28 = vld [vmem:[%s5440_s4 + $0x4e0] sm:$0xff] }
 0x139   : > { %1272 = vmatpush2.msra.mxu1 %v964_v30  ;;  %v3079_v30 = vld [vmem:[%s5440_s4 + $0x4d8] sm:$0xff] }
 0x13a   : > { %1273 = vmatprep.subr.mxu1 %v963_v36  ;;  %v3078_v36 = vld [vmem:[%s5440_s4 + $0x4d0] sm:$0xff] }
 0x13b   : > { %1274 = vmatpush2.msra.mxu1 %v962_v37  ;;  %v3077_v37 = vld [vmem:[%s5440_s4 + $0x4c8] sm:$0xff] }
 0x13c   : > { %1275 = vmatprep.subr.mxu1 %v961_v38  ;;  %v3076_v38 = vld [vmem:[%s5440_s4 + $0x4c0] sm:$0xff] }
 0x13d   : > { %1276 = vmatpush2.msra.mxu1 %v960_v39  ;;  %v3075_v39 = vld [vmem:[%s5440_s4 + $0x4b8] sm:$0xff] }
 0x13e   : > { %1277 = vmatprep.subr.mxu1 %v959_v40  ;;  %v3074_v40 = vld [vmem:[%s5440_s4 + $0x4b0] sm:$0xff] }
 0x13f   : > { %1278 = vmatpush2.msra.mxu1 %v958_v41  ;;  %v3073_v41 = vld [vmem:[%s5440_s4 + $0x4a8] sm:$0xff] }
 0x1c0   : > { %v915_v42 = vpop.f32.mrf.mxu1 }
 0x1c2   : > { %v917_v43 = vpop.f32.mrf.mxu1 }
 0x1c3   : > { %3028 = vmatprep.mubr.msk.f32.mxu1 %vm1125_vm5, %v917_v43  ;;  %v3071_v43 = vld [vmem:[%s5440_s4 + $0x498] sm:$0xff] }
 0x1c4   : > { %v921_v44 = vpop.f32.mrf.mxu1  ;;  %1280 = vmatmul.mubr.f32.vlgmr.msra.gmra.mxu1 %v915_v42  ;;  %v3072_v42 = vld [vmem:[%s5440_s4 + $0x4a0] sm:$0xff] }
 0x1c6   : > { %v923_v45 = vpop.f32.mrf.mxu1 }
 0x1c7   : > { %3029 = vmatprep.mubr.msk.f32.mxu1 %vm1125_vm5, %v923_v45  ;;  %v3069_v45 = vld [vmem:[%s5440_s4 + $0x488] sm:$0xff] }
 0x1c8   : > { %v1057_v46 = vpop.f32.mrf.mxu1  ;;  %1286 = vmatmul.mubr.f32.gmra.mxu1 %v921_v44  ;;  %v3070_v44 = vld [vmem:[%s5440_s4 + $0x490] sm:$0xff] }
 0x1c9   : > { %1618 = vmatprep.mubr.f32.mxu1 %v3419_v16 }
 0x1ca   : > { %v1059_v47 = vpop.f32.mrf.mxu1 }
 0x1cb   : > { %3026 = vmatprep.mubr.msk.f32.mxu0 %vm1125_vm5, %v1059_v47 }
 0x1cc   : > { %v1063_v48 = vpop.f32.mrf.mxu1  ;;  %1197 = vmatmul.mubr.f32.vlgmr.msra.gmra.mxu0 %v1057_v46  ;;  %v3068_v46 = vld [vmem:[%s5440_s4 + $0x480] sm:$0xff] }
 0x1cd   : > { %3033 = vmatpush1.msk.msra.mxu0 %vm842_vm3, %v3808_v27  ;;  %v3067_v27 = vld [vmem:[%s5440_s4 + $0x478] sm:$0xff] }
 0x1ce   : > { %1327 = vmatprep.subr.mxu0 %v3810_v29  ;;  %v1065_v49 = vpop.f32.mrf.mxu1  ;;  %v3066_v29 = vld [vmem:[%s5440_s4 + $0x470] sm:$0xff] }
 0x1cf   : > { %1328 = vmatpush1.msra.mxu0 %v3814_v31  ;;  %3027 = vmatprep.mubr.msk.f32.mxu0 %vm1125_vm5, %v1065_v49  ;;  %v3065_v31 = vld [vmem:[%s5440_s4 + $0x468] sm:$0xff] }
 0x1d0   : > { %1329 = vmatprep.subr.mxu0 %v3818_v32  ;;  %1203 = vmatmul.mubr.f32.gmra.mxu0 %v1063_v48  ;;  %v3064_v32 = vld [vmem:[%s5440_s4 + $0x460] sm:$0xff] }
 0x1d1   : > { %1330 = vmatpush1.msra.mxu0 %v3821_v33  ;;  %1365 = vmatprep.mubr.f32.mxu0 %v3419_v16  ;;  %v3031_v33 = vld [vmem:[%s5439_s3 + $0x28] sm:$0x1f] }
 0x1d2   : > { %1331 = vmatprep.subr.mxu0 %v3824_v34  ;;  %v3063_v34 = vld [vmem:[%s5440_s4 + $0x458] sm:$0xff] }
 0x1d3   : > { %1332 = vmatpush1.msra.mxu0 %v3827_v35  ;;  %v3062_v35 = vld [vmem:[%s5440_s4 + $0x450] sm:$0xff] }
 0x1d4   : > { %3034 = vmatmul.mubr.msk.f32.vlgmr.msra.gmra.mxu0 %vm835_vm4, %v3030_v50  ;;  %1441 = vmatprep.subr.mxu0 %v3067_v27 }
 0x1d5   : > { %1371 = vmatprep.mubr.f32.mxu0 %v3419_v16  ;;  %1442 = vmatpush1.msra.mxu0 %v3066_v29 }
 0x1d6   : > { %1443 = vmatprep.subr.mxu0 %v3065_v31 }
 0x1d7   : > { %1444 = vmatpush1.msra.mxu0 %v3064_v32 }
 0x1d8   : > { %3035 = vmatmul.mubr.msk.f32.gmra.mxu0 %vm835_vm4, %v3031_v33  ;;  %1445 = vmatprep.subr.mxu0 %v3063_v34  ;;  %v1656_v33 = vld [vmem:[%s5443_s7 + $0xf8] sm:$0xff]  ;;  %v1655_v34 = vld [vmem:[%s5443_s7 + $0xf0] sm:$0xff] }
 0x1d9   : > { %1446 = vmatpush1.msra.mxu0 %v3062_v35  ;;  %v1654_v35 = vld [vmem:[%s5443_s7 + $0xe8] sm:$0xff] }
 0x1da   : > { %1447 = vmatprep.subr.mxu0 %v3061_v51  ;;  %v1653_v51 = vld [vmem:[%s5443_s7 + $0xe0] sm:$0xff] }
 0x1db   : > { %1448 = vmatpush1.msra.mxu0 %v3060_v52  ;;  %v1652_v52 = vld [vmem:[%s5443_s7 + $0xd8] sm:$0xff] }
 0x1dc   : > { %1449 = vmatprep.subr.mxu0 %v3059_v53  ;;  %v1651_v53 = vld [vmem:[%s5443_s7 + $0xd0] sm:$0xff] }
 0x1dd   : > { %1450 = vmatpush1.msra.mxu0 %v3058_v54  ;;  %v1650_v54 = vld [vmem:[%s5443_s7 + $0xc8] sm:$0xff] }
 0x1de   : > { %1451 = vmatprep.subr.mxu0 %v3057_v55  ;;  %v1649_v55 = vld [vmem:[%s5443_s7 + $0xc0] sm:$0xff] }
 0x1df   : > { %1452 = vmatpush1.msra.mxu0 %v3056_v56  ;;  %v1648_v56 = vld [vmem:[%s5443_s7 + $0xb8] sm:$0xff] }
 0x1e0   : > { %1453 = vmatprep.subr.mxu0 %v3055_v57  ;;  %v1647_v57 = vld [vmem:[%s5443_s7 + $0xb0] sm:$0xff] }
 0x1e1   : > { %1454 = vmatpush1.msra.mxu0 %v3054_v58  ;;  %v1646_v58 = vld [vmem:[%s5443_s7 + $0xa8] sm:$0xff] }
 0x1e2   : > { %1455 = vmatprep.subr.mxu0 %v3053_v60  ;;  %v1645_v60 = vld [vmem:[%s5443_s7 + $0xa0] sm:$0xff] }
 0x1e3   : > { %1456 = vmatpush1.msra.mxu0 %v3052_v61  ;;  %v1644_v61 = vld [vmem:[%s5443_s7 + $0x98] sm:$0xff] }
 0x1e4   : > { %1457 = vmatprep.subr.mxu0 %v3051_v62  ;;  %v1643_v62 = vld [vmem:[%s5443_s7 + $0x90] sm:$0xff] }
 0x1e5   : > { %1458 = vmatpush1.msra.mxu0 %v3050_v0  ;;  %v1642_v0 = vld [vmem:[%s5443_s7 + $0x88] sm:$0xff] }
 0x1e6   : > { %1459 = vmatprep.subr.mxu0 %v3049_v1  ;;  %v1641_v1 = vld [vmem:[%s5443_s7 + $0x80] sm:$0xff] }
 0x1e7   : > { %1460 = vmatpush1.msra.mxu0 %v3048_v2  ;;  %v1640_v2 = vld [vmem:[%s5443_s7 + $0x78] sm:$0xff] }
 0x1e8   : > { %1461 = vmatprep.subr.mxu0 %v3047_v3  ;;  %v1639_v3 = vld [vmem:[%s5443_s7 + $0x70] sm:$0xff] }
 0x1e9   : > { %1462 = vmatpush1.msra.mxu0 %v3046_v4  ;;  %v1638_v4 = vld [vmem:[%s5443_s7 + $0x68] sm:$0xff] }
 0x1ea   : > { %1463 = vmatprep.subr.mxu0 %v3045_v5  ;;  %v1637_v5 = vld [vmem:[%s5443_s7 + $0x60] sm:$0xff] }
 0x1eb   : > { %1464 = vmatpush1.msra.mxu0 %v3044_v6  ;;  %v1636_v6 = vld [vmem:[%s5443_s7 + $0x58] sm:$0xff] }
 0x1ec   : > { %1465 = vmatprep.subr.mxu0 %v3043_v7  ;;  %v1635_v7 = vld [vmem:[%s5443_s7 + $0x50] sm:$0xff] }
 0x1ed   : > { %1466 = vmatpush1.msra.mxu0 %v3042_v8  ;;  %v1634_v8 = vld [vmem:[%s5443_s7 + $0x48] sm:$0xff] }
 0x1ee   : > { %1467 = vmatprep.subr.mxu0 %v3041_v9  ;;  %v1633_v9 = vld [vmem:[%s5443_s7 + $0x40] sm:$0xff] }
 0x1ef   : > { %1468 = vmatpush1.msra.mxu0 %v3040_v10  ;;  %v1632_v10 = vld [vmem:[%s5443_s7 + $0x38] sm:$0xff] }
 0x1f0   : > { %1469 = vmatprep.subr.mxu0 %v3039_v11  ;;  %v1631_v11 = vld [vmem:[%s5443_s7 + $0x30] sm:$0xff] }
 0x1f1   : > { %1470 = vmatpush1.msra.mxu0 %v3038_v12  ;;  %v1630_v12 = vld [vmem:[%s5443_s7 + $0x28] sm:$0xff] }
 0x1f2   : > { %1471 = vmatprep.subr.mxu0 %v3037_v13  ;;  %v1629_v13 = vld [vmem:[%s5443_s7 + $0x20] sm:$0xff] }
 0x1f3   : > { %1472 = vmatpush1.msra.mxu0 %v3036_v14  ;;  %v1628_v14 = vld [vmem:[%s5443_s7 + $0x18] sm:$0xff] }
 0x1f4   : > { %1481 = vmatprep.subr.mxu0 %v3091_v15  ;;  %v1627_v15 = vld [vmem:[%s5443_s7 + $0x10] sm:$0xff] }
 0x1f5   : > { %1482 = vmatpush2.msra.mxu0 %v3090_v17  ;;  %v1626_v17 = vld [vmem:[%s5443_s7 + $0x8] sm:$0xff] }
 0x1f6   : > { %1483 = vmatprep.subr.mxu0 %v3089_v18  ;;  %v1625_v18 = vld [vmem:[%s5443_s7] sm:$0xff] }
 0x1f7   : > { %1484 = vmatpush2.msra.mxu0 %v3088_v19  ;;  %v1676_v19 = vld [vmem:[%s5443_s7 + $0x198] sm:$0xff] }
 0x1f8   : > { %1485 = vmatprep.subr.mxu0 %v3087_v20  ;;  %v1675_v20 = vld [vmem:[%s5443_s7 + $0x190] sm:$0xff] }
 0x1f9   : > { %1486 = vmatpush2.msra.mxu0 %v3086_v21  ;;  %v1674_v21 = vld [vmem:[%s5443_s7 + $0x188] sm:$0xff] }
 0x1fa   : > { %1487 = vmatprep.subr.mxu0 %v3085_v22  ;;  %v1673_v22 = vld [vmem:[%s5443_s7 + $0x180] sm:$0xff] }
 0x1fb   : > { %1488 = vmatpush2.msra.mxu0 %v3084_v23  ;;  %v1672_v23 = vld [vmem:[%s5443_s7 + $0x178] sm:$0xff] }
 0x1fc   : > { %1489 = vmatprep.subr.mxu0 %v3083_v24  ;;  %v1671_v24 = vld [vmem:[%s5443_s7 + $0x170] sm:$0xff] }
 0x1fd   : > { %1490 = vmatpush2.msra.mxu0 %v3082_v25  ;;  %v1670_v25 = vld [vmem:[%s5443_s7 + $0x168] sm:$0xff] }
 0x1fe   : > { %1491 = vmatprep.subr.mxu0 %v3081_v26  ;;  %v1669_v26 = vld [vmem:[%s5443_s7 + $0x160] sm:$0xff] }
 0x1ff   : > { %1492 = vmatpush2.msra.mxu0 %v3080_v28  ;;  %v1668_v28 = vld [vmem:[%s5443_s7 + $0x158] sm:$0xff] }
 0x200   : > { %1493 = vmatprep.subr.mxu0 %v3079_v30  ;;  %v1667_v30 = vld [vmem:[%s5443_s7 + $0x150] sm:$0xff] }
 0x201   : > { %1494 = vmatpush2.msra.mxu0 %v3078_v36  ;;  %v1666_v36 = vld [vmem:[%s5443_s7 + $0x148] sm:$0xff] }
 0x202   : > { %1495 = vmatprep.subr.mxu0 %v3077_v37  ;;  %v1665_v37 = vld [vmem:[%s5443_s7 + $0x140] sm:$0xff] }
 0x203   : > { %1496 = vmatpush2.msra.mxu0 %v3076_v38 }
 0x204   : > { %1497 = vmatprep.subr.mxu0 %v3075_v39 }
 0x205   : > { %1498 = vmatpush2.msra.mxu0 %v3074_v40 }
 0x206   : > { %1499 = vmatprep.subr.mxu0 %v3073_v41 }
 0x207   : > { %1500 = vmatpush2.msra.mxu0 %v3072_v42 }
 0x208   : > { %1501 = vmatprep.subr.mxu0 %v3071_v43 }
 0x209   : > { %1502 = vmatpush2.msra.mxu0 %v3070_v44 }
 0x20a   : > { %1503 = vmatprep.subr.mxu0 %v3069_v45  ;;  %v1522_v45 = vld [vmem:[%s5441_s5] sm:$0x3] }
 0x20b   : > { %1504 = vmatpush2.msra.mxu0 %v3068_v46 }
 0x20c   : > { %1884 = vmatprep.subr.mxu0 %v1656_v33  ;;  %v1531_v33 = vrot.slane %v1522_v45, %v3804_v63 }
 0x284   : > { %v1281_v38 = vpop.f32.mrf.mxu1 }
 0x286   : > { %v1283_v39 = vpop.f32.mrf.mxu1 }
 0x288   : > { %v1287_v40 = vpop.f32.mrf.mxu1 }
 0x28a   : > { %v1289_v46 = vpop.f32.mrf.mxu1 }
 0x28c   : > { %v4219_v47 = vpop.f32.mrf.mxu0 }
 0x28e   : > { %v4221_v48 = vpop.f32.mrf.mxu0 }
 0x28f   : > { %v1284_v43 = vadd.f32 %v1283_v39, %v4221_v48  ;;  %v3151_v39 = vld [vmem:[%s5443_s7 + $0x330] sm:$0xff] }
 0x290   : > { %v4223_v49 = vpop.f32.mrf.mxu0 }
 0x291   : > { %v1288_v44 = vadd.f32 %v1287_v40, %v4223_v49  ;;  %v3150_v40 = vld [vmem:[%s5443_s7 + $0x328] sm:$0xff] }
 0x292   : > { %v4225_v50 = vpop.f32.mrf.mxu0 }
 0x294   : > { %v1367_v27 = vpop.f32.mrf.mxu0 }
 0x296   : > { %v1369_v29 = vpop.f32.mrf.mxu0 }
 0x297   : > { %3092 = vmatprep.mubr.msk.f32.mxu0 %vm1125_vm5, %v1369_v29 }
 0x298   : > { %v1373_v31 = vpop.f32.mrf.mxu0  ;;  %1506 = vmatmul.mubr.f32.vlgmr.msra.gmra.mxu0 %v1367_v27  ;;  %v1282_v27 = vadd.f32 %v1281_v38, %v4219_v47  ;;  %v3152_v38 = vld [vmem:[%s5443_s7 + $0x338] sm:$0xff] }
 0x299   : > { %1885 = vmatpush1.msra.mxu0 %v1655_v34 }
 0x29a   : > { %v1375_v32 = vpop.f32.mrf.mxu0  ;;  %1886 = vmatprep.subr.mxu0 %v1654_v35 }
 0x29b   : > { %3093 = vmatprep.mubr.msk.f32.mxu0 %vm1125_vm5, %v1375_v32  ;;  %1887 = vmatpush1.msra.mxu0 %v1653_v51  ;;  %v1527_v51 = vrot.slane %v1522_v45, %v3799_v59  ;;  %v3145_v45 = vld [vmem:[%s5443_s7 + $0x300] sm:$0xff] }
 0x29c   : > { %1512 = vmatmul.mubr.f32.gmra.mxu0 %v1373_v31  ;;  %1888 = vmatprep.subr.mxu0 %v1652_v52  ;;  %v1290_v31 = vadd.f32 %v1289_v46, %v4225_v50  ;;  %v3144_v46 = vld [vmem:[%s5443_s7 + $0x2f8] sm:$0xff] }
 0x29d   : > { %1889 = vmatpush1.msra.mxu0 %v1651_v53 }
 0x29e   : > { %1890 = vmatprep.subr.mxu0 %v1650_v54 }
 0x29f   : > { %1891 = vmatpush1.msra.mxu0 %v1649_v55 }
 0x2a0   : > { %1892 = vmatprep.subr.mxu0 %v1648_v56 }
 0x2a1   : > { %1893 = vmatpush1.msra.mxu0 %v1647_v57 }
 0x2a2   : > { %1894 = vmatprep.subr.mxu0 %v1646_v58  ;;  %v1542_v58 = vld [vmem:[%s5442_s6] sm:$0x3f] }
 0x2a3   : > { %1895 = vmatpush1.msra.mxu0 %v1645_v60  ;;  %v3097_v60 = vld [vmem:[%s5442_s6 + $0x8] sm:$0x3f] }
 0x2a4   : > { %1896 = vmatprep.subr.mxu0 %v1644_v61  ;;  %v3132_v61 = vld [vmem:[%s5443_s7 + $0x298] sm:$0xff] }
 0x2a5   : > { %1897 = vmatpush1.msra.mxu0 %v1643_v62  ;;  %v3131_v62 = vld [vmem:[%s5443_s7 + $0x290] sm:$0xff] }
 0x2a6   : > { %1898 = vmatprep.subr.mxu0 %v1642_v0  ;;  %v3130_v0 = vld [vmem:[%s5443_s7 + $0x288] sm:$0xff] }
 0x2a7   : > { %1899 = vmatpush1.msra.mxu0 %v1641_v1  ;;  %v3129_v1 = vld [vmem:[%s5443_s7 + $0x280] sm:$0xff] }
 0x2a8   : > { %1900 = vmatprep.subr.mxu0 %v1640_v2  ;;  %v3128_v2 = vld [vmem:[%s5443_s7 + $0x278] sm:$0xff] }
 0x2a9   : > { %1901 = vmatpush1.msra.mxu0 %v1639_v3  ;;  %v3127_v3 = vld [vmem:[%s5443_s7 + $0x270] sm:$0xff] }
 0x2aa   : > { %1902 = vmatprep.subr.mxu0 %v1638_v4  ;;  %v3126_v4 = vld [vmem:[%s5443_s7 + $0x268] sm:$0xff] }
 0x2ab   : > { %1903 = vmatpush1.msra.mxu0 %v1637_v5  ;;  %v3125_v5 = vld [vmem:[%s5443_s7 + $0x260] sm:$0xff] }
 0x2ac   : > { %1904 = vmatprep.subr.mxu0 %v1636_v6  ;;  %v3124_v6 = vld [vmem:[%s5443_s7 + $0x258] sm:$0xff] }
 0x2ad   : > { %1905 = vmatpush1.msra.mxu0 %v1635_v7  ;;  %v3123_v7 = vld [vmem:[%s5443_s7 + $0x250] sm:$0xff] }
 0x2ae   : > { %1906 = vmatprep.subr.mxu0 %v1634_v8  ;;  %v3122_v8 = vld [vmem:[%s5443_s7 + $0x248] sm:$0xff] }
 0x2af   : > { %1907 = vmatpush1.msra.mxu0 %v1633_v9  ;;  %v3121_v9 = vld [vmem:[%s5443_s7 + $0x240] sm:$0xff] }
 0x2b0   : > { %1908 = vmatprep.subr.mxu0 %v1632_v10  ;;  %v3120_v10 = vld [vmem:[%s5443_s7 + $0x238] sm:$0xff] }
 0x2b1   : > { %1909 = vmatpush1.msra.mxu0 %v1631_v11  ;;  %v3119_v11 = vld [vmem:[%s5443_s7 + $0x230] sm:$0xff] }
 0x2b2   : > { %1910 = vmatprep.subr.mxu0 %v1630_v12  ;;  %v3118_v12 = vld [vmem:[%s5443_s7 + $0x228] sm:$0xff] }
 0x2b3   : > { %1911 = vmatpush1.msra.mxu0 %v1629_v13  ;;  %v3117_v13 = vld [vmem:[%s5443_s7 + $0x220] sm:$0xff] }
 0x2b4   : > { %1912 = vmatprep.subr.mxu0 %v1628_v14  ;;  %v3116_v14 = vld [vmem:[%s5443_s7 + $0x218] sm:$0xff] }
 0x2b5   : > { %1913 = vmatpush1.msra.mxu0 %v1627_v15  ;;  %v3115_v15 = vld [vmem:[%s5443_s7 + $0x210] sm:$0xff] }
 0x2b6   : > { %1914 = vmatprep.subr.mxu0 %v1626_v17  ;;  %v3114_v17 = vld [vmem:[%s5443_s7 + $0x208] sm:$0xff] }
 0x2b7   : > { %1915 = vmatpush1.msra.mxu0 %v1625_v18  ;;  %v3113_v18 = vld [vmem:[%s5443_s7 + $0x200] sm:$0xff] }
 0x2b8   : > { %1928 = vmatprep.subr.mxu0 %v1676_v19  ;;  %v3112_v19 = vld [vmem:[%s5443_s7 + $0x1f8] sm:$0xff] }
 0x2b9   : > { %1929 = vmatpush2.msra.mxu0 %v1675_v20  ;;  %v3111_v20 = vld [vmem:[%s5443_s7 + $0x1f0] sm:$0xff] }
 0x2ba   : > { %1930 = vmatprep.subr.mxu0 %v1674_v21  ;;  %v3110_v21 = vld [vmem:[%s5443_s7 + $0x1e8] sm:$0xff] }
 0x2bb   : > { %1931 = vmatpush2.msra.mxu0 %v1673_v22  ;;  %v3109_v22 = vld [vmem:[%s5443_s7 + $0x1e0] sm:$0xff] }
 0x2bc   : > { %1932 = vmatprep.subr.mxu0 %v1672_v23  ;;  %v3108_v23 = vld [vmem:[%s5443_s7 + $0x1d8] sm:$0xff] }
 0x2bd   : > { %1933 = vmatpush2.msra.mxu0 %v1671_v24  ;;  %v3107_v24 = vld [vmem:[%s5443_s7 + $0x1d0] sm:$0xff] }
 0x2be   : > { %1934 = vmatprep.subr.mxu0 %v1670_v25  ;;  %v3106_v25 = vld [vmem:[%s5443_s7 + $0x1c8] sm:$0xff] }
 0x2bf   : > { %1935 = vmatpush2.msra.mxu0 %v1669_v26  ;;  %v3105_v26 = vld [vmem:[%s5443_s7 + $0x1c0] sm:$0xff] }
 0x2c0   : > { %1936 = vmatprep.subr.mxu0 %v1668_v28  ;;  %v3104_v28 = vld [vmem:[%s5443_s7 + $0x1b8] sm:$0xff] }
 0x2c1   : > { %1937 = vmatpush2.msra.mxu0 %v1667_v30  ;;  %v3103_v30 = vld [vmem:[%s5443_s7 + $0x1b0] sm:$0xff] }
 0x2c2   : > { %1938 = vmatprep.subr.mxu0 %v1666_v36  ;;  %v3102_v36 = vld [vmem:[%s5443_s7 + $0x1a8] sm:$0xff] }
 0x2c3   : > { %1939 = vmatpush2.msra.mxu0 %v1665_v37  ;;  %v3101_v37 = vld [vmem:[%s5443_s7 + $0x1a0] sm:$0xff] }
 0x358   : > { %v1507_v41 = vpop.f32.mrf.mxu0 }
 0x359   : > { %v1518_v35 = vadd.f32 %v1507_v41, %v1282_v27  ;;  %v3149_v41 = vld [vmem:[%s5443_s7 + $0x320] sm:$0xff]  ;;  %v3143_v27 = vld [vmem:[%s5443_s7 + $0x2f0] sm:$0xff] }
 0x35a   : > { %v1509_v42 = vpop.f32.mrf.mxu0 }
 0x35b   : > { %v1519_v32 = vadd.f32 %v1509_v42, %v1284_v43  ;;  %v1534_v55 = vadd.f32 %v1527_v51, %v1518_v35  ;;  %v3148_v42 = vld [vmem:[%s5443_s7 + $0x318] sm:$0xff]  ;;  %v3147_v43 = vld [vmem:[%s5443_s7 + $0x310] sm:$0xff]  ;;  %v3137_v35 = vld [vmem:[%s5443_s7 + $0x2c0] sm:$0xff] }
 0x35c   : > { %v1513_v29 = vpop.f32.mrf.mxu0 }
 0x35d   : > { %v1520_v34 = vadd.f32 %v1513_v29, %v1288_v44  ;;  %v1535_v53 = vadd.f32 %v1531_v33, %v1519_v32  ;;  %v4378_v50 = vmax.f32 %v1534_v55, 0.0  ;;  %v3146_v44 = vld [vmem:[%s5443_s7 + $0x308] sm:$0xff]  ;;  %v3140_v32 = vld [vmem:[%s5443_s7 + $0x2d8] sm:$0xff] }
 0x35e   : > { %v1515_v48 = vpop.f32.mrf.mxu0  ;;  %v3142_v29 = vld [vmem:[%s5443_s7 + $0x2e8] sm:$0xff] }
 0x35f   : > { %v1521_v52 = vadd.f32 %v1515_v48, %v1290_v31  ;;  %v1536_v49 = vadd.f32 %v1527_v51, %v1520_v34  ;;  %v4374_v57 = vmax.f32 %v1535_v53, 0.0  ;;  %v3141_v31 = vld [vmem:[%s5443_s7 + $0x2e0] sm:$0xff]  ;;  %v3138_v34 = vld [vmem:[%s5443_s7 + $0x2c8] sm:$0xff]  ;;  %v3136_v51 = vld [vmem:[%s5443_s7 + $0x2b8] sm:$0xff] }
 0x360   : > { %v3135_v48 = vld [vmem:[%s5443_s7 + $0x2b0] sm:$0xff]  ;;  %v1664_v53 = vld [vmem:[%s5443_s7 + $0x138] sm:$0xff]  ;;  %v1662_v55 = vld [vmem:[%s5443_s7 + $0x128] sm:$0xff] }
 0x361   : > { %v1537_v54 = vadd.f32 %v1531_v33, %v1521_v52  ;;  %v4372_v47 = vmax.f32 %v1536_v49, 0.0  ;;  %v3139_v33 = vld [vmem:[%s5443_s7 + $0x2d0] sm:$0xff]  ;;  %v3134_v52 = vld [vmem:[%s5443_s7 + $0x2a8] sm:$0xff]  ;;  %v3133_v49 = vld [vmem:[%s5443_s7 + $0x2a0] sm:$0xff]  ;;  %1940 = vmatprep.subr.mxu0 %v1664_v53 }
 0x362   : > { %v3194_v53 = vld [vmem:[%s5443_s7 + $0x458] sm:$0xff] }
 0x363   : > { %v4370_v56 = vmax.f32 %v1537_v54, 0.0  ;;  %v1663_v54 = vld [vmem:[%s5443_s7 + $0x130] sm:$0xff] }
 0x364   : > { %1941 = vmatpush2.msra.mxu0 %v1663_v54  ;;  %v3193_v54 = vld [vmem:[%s5443_s7 + $0x450] sm:$0xff] }
 0x365   : > { %3094 = vmatprep.subr.msk.mxu1 %vm1547_vm6, %v4370_v56  ;;  %1942 = vmatprep.subr.mxu0 %v1662_v55  ;;  %v3192_v55 = vld [vmem:[%s5443_s7 + $0x448] sm:$0xff] }
 0x366   : > { %3095 = vmatpush1.msk.msra.mxu1 %vm1547_vm6, %v4372_v47 }
 0x367   : > { %1584 = vmatprep.subr.mxu1 %v4374_v57 }
 0x368   : > { %1585 = vmatpush1.msra.mxu1 %v4378_v50 }
 0x369   : > { %3096 = vmatmul.mubr.msk.f32.vlgmr.msra.gmra.mxu1 %vm1543_vm7, %v1542_v58  ;;  %3098 = vmatprep.subr.msk.mxu1 %vm1547_vm6, %v4370_v56  ;;  %v1661_v58 = vld [vmem:[%s5443_s7 + $0x120] sm:$0xff] }
 0x36a   : > { %3099 = vmatpush1.msk.msra.mxu1 %vm1547_vm6, %v4372_v47  ;;  %1746 = vmatprep.mubr.f32.mxu1 %v3419_v16 }
 0x36b   : > { %1712 = vmatprep.subr.mxu1 %v4374_v57  ;;  %1943 = vmatpush2.msra.mxu0 %v1661_v58  ;;  %v3191_v58 = vld [vmem:[%s5443_s7 + $0x440] sm:$0xff] }
 0x36c   : > { %1713 = vmatpush1.msra.mxu1 %v4378_v50 }
 0x36d   : > { %3100 = vmatmul.mubr.msk.f32.vlgmr.msra.gmra.mxu1 %vm1543_vm7, %v3097_v60  ;;  %1810 = vmatprep.subr.mxu1 %v3132_v61  ;;  %v1659_v60 = vld [vmem:[%s5443_s7 + $0x110] sm:$0xff]  ;;  %v1658_v61 = vld [vmem:[%s5443_s7 + $0x108] sm:$0xff] }
 0x36e   : > { %1811 = vmatpush1.msra.mxu1 %v3131_v62  ;;  %v1657_v62 = vld [vmem:[%s5443_s7 + $0x100] sm:$0xff] }
 0x36f   : > { %1812 = vmatprep.subr.mxu1 %v3130_v0 }
 0x370   : > { %1813 = vmatpush1.msra.mxu1 %v3129_v1 }
 0x371   : > { %1814 = vmatprep.subr.mxu1 %v3128_v2 }
 0x372   : > { %1815 = vmatpush1.msra.mxu1 %v3127_v3 }
 0x373   : > { %1816 = vmatprep.subr.mxu1 %v3126_v4  ;;  %v3155_v4 = vld [vmem:[%s5442_s6 + $0x10] sm:$0x3f] }
 0x374   : > { %1817 = vmatpush1.msra.mxu1 %v3125_v5  ;;  %v3190_v5 = vld [vmem:[%s5443_s7 + $0x438] sm:$0xff] }
 0x375   : > { %1818 = vmatprep.subr.mxu1 %v3124_v6  ;;  %v3189_v6 = vld [vmem:[%s5443_s7 + $0x430] sm:$0xff] }
 0x376   : > { %1819 = vmatpush1.msra.mxu1 %v3123_v7  ;;  %v3187_v7 = vld [vmem:[%s5443_s7 + $0x420] sm:$0xff] }
 0x377   : > { %1820 = vmatprep.subr.mxu1 %v3122_v8  ;;  %v3184_v8 = vld [vmem:[%s5443_s7 + $0x408] sm:$0xff] }
 0x378   : > { %1821 = vmatpush1.msra.mxu1 %v3121_v9  ;;  %v3183_v9 = vld [vmem:[%s5443_s7 + $0x400] sm:$0xff] }
 0x379   : > { %1822 = vmatprep.subr.mxu1 %v3120_v10  ;;  %v3182_v10 = vld [vmem:[%s5443_s7 + $0x3f8] sm:$0xff] }
 0x37a   : > { %1823 = vmatpush1.msra.mxu1 %v3119_v11  ;;  %v3181_v11 = vld [vmem:[%s5443_s7 + $0x3f0] sm:$0xff] }
 0x37b   : > { %1824 = vmatprep.subr.mxu1 %v3118_v12  ;;  %v3180_v12 = vld [vmem:[%s5443_s7 + $0x3e8] sm:$0xff] }
 0x37c   : > { %1825 = vmatpush1.msra.mxu1 %v3117_v13  ;;  %v3179_v13 = vld [vmem:[%s5443_s7 + $0x3e0] sm:$0xff] }
 0x37d   : > { %1826 = vmatprep.subr.mxu1 %v3116_v14  ;;  %v3178_v14 = vld [vmem:[%s5443_s7 + $0x3d8] sm:$0xff] }
 0x37e   : > { %1827 = vmatpush1.msra.mxu1 %v3115_v15  ;;  %v3177_v15 = vld [vmem:[%s5443_s7 + $0x3d0] sm:$0xff] }
 0x37f   : > { %1828 = vmatprep.subr.mxu1 %v3114_v17  ;;  %v3176_v17 = vld [vmem:[%s5443_s7 + $0x3c8] sm:$0xff] }
 0x380   : > { %1829 = vmatpush1.msra.mxu1 %v3113_v18  ;;  %v3175_v18 = vld [vmem:[%s5443_s7 + $0x3c0] sm:$0xff] }
 0x381   : > { %1830 = vmatprep.subr.mxu1 %v3112_v19  ;;  %v3174_v19 = vld [vmem:[%s5443_s7 + $0x3b8] sm:$0xff] }
 0x382   : > { %1831 = vmatpush1.msra.mxu1 %v3111_v20  ;;  %v3173_v20 = vld [vmem:[%s5443_s7 + $0x3b0] sm:$0xff] }
 0x383   : > { %1832 = vmatprep.subr.mxu1 %v3110_v21  ;;  %v3172_v21 = vld [vmem:[%s5443_s7 + $0x3a8] sm:$0xff] }
 0x384   : > { %1833 = vmatpush1.msra.mxu1 %v3109_v22  ;;  %v3171_v22 = vld [vmem:[%s5443_s7 + $0x3a0] sm:$0xff] }
 0x385   : > { %1834 = vmatprep.subr.mxu1 %v3108_v23  ;;  %v3170_v23 = vld [vmem:[%s5443_s7 + $0x398] sm:$0xff] }
 0x386   : > { %1835 = vmatpush1.msra.mxu1 %v3107_v24  ;;  %v3169_v24 = vld [vmem:[%s5443_s7 + $0x390] sm:$0xff] }
 0x387   : > { %1836 = vmatprep.subr.mxu1 %v3106_v25  ;;  %v3168_v25 = vld [vmem:[%s5443_s7 + $0x388] sm:$0xff] }
 0x388   : > { %1837 = vmatpush1.msra.mxu1 %v3105_v26  ;;  %v3167_v26 = vld [vmem:[%s5443_s7 + $0x380] sm:$0xff] }
 0x389   : > { %1838 = vmatprep.subr.mxu1 %v3104_v28  ;;  %v3166_v28 = vld [vmem:[%s5443_s7 + $0x378] sm:$0xff] }
 0x38a   : > { %1839 = vmatpush1.msra.mxu1 %v3103_v30  ;;  %v3165_v30 = vld [vmem:[%s5443_s7 + $0x370] sm:$0xff] }
 0x38b   : > { %1840 = vmatprep.subr.mxu1 %v3102_v36  ;;  %v3164_v36 = vld [vmem:[%s5443_s7 + $0x368] sm:$0xff] }
 0x38c   : > { %1841 = vmatpush1.msra.mxu1 %v3101_v37  ;;  %v3163_v37 = vld [vmem:[%s5443_s7 + $0x360] sm:$0xff] }
 0x38d   : > { %1854 = vmatprep.subr.mxu1 %v3152_v38  ;;  %v3162_v38 = vld [vmem:[%s5443_s7 + $0x358] sm:$0xff] }
 0x38e   : > { %1855 = vmatpush2.msra.mxu1 %v3151_v39  ;;  %v3161_v39 = vld [vmem:[%s5443_s7 + $0x350] sm:$0xff] }
 0x38f   : > { %1856 = vmatprep.subr.mxu1 %v3150_v40  ;;  %v3160_v40 = vld [vmem:[%s5443_s7 + $0x348] sm:$0xff] }
 0x390   : > { %1857 = vmatpush2.msra.mxu1 %v3149_v41  ;;  %v3159_v41 = vld [vmem:[%s5443_s7 + $0x340] sm:$0xff] }
 0x391   : > { %1858 = vmatprep.subr.mxu1 %v3148_v42  ;;  %v3210_v42 = vld [vmem:[%s5443_s7 + $0x4d8] sm:$0xff] }
 0x392   : > { %1859 = vmatpush2.msra.mxu1 %v3147_v43  ;;  %v3209_v43 = vld [vmem:[%s5443_s7 + $0x4d0] sm:$0xff] }
 0x393   : > { %1860 = vmatprep.subr.mxu1 %v3146_v44  ;;  %v3208_v44 = vld [vmem:[%s5443_s7 + $0x4c8] sm:$0xff] }
 0x394   : > { %1861 = vmatpush2.msra.mxu1 %v3145_v45  ;;  %v3207_v45 = vld [vmem:[%s5443_s7 + $0x4c0] sm:$0xff] }
 0x395   : > { %1862 = vmatprep.subr.mxu1 %v3144_v46  ;;  %v3206_v46 = vld [vmem:[%s5443_s7 + $0x4b8] sm:$0xff] }
 0x396   : > { %1863 = vmatpush2.msra.mxu1 %v3143_v27  ;;  %v3205_v27 = vld [vmem:[%s5443_s7 + $0x4b0] sm:$0xff] }
 0x397   : > { %1864 = vmatprep.subr.mxu1 %v3142_v29  ;;  %v3204_v29 = vld [vmem:[%s5443_s7 + $0x4a8] sm:$0xff] }
 0x398   : > { %1865 = vmatpush2.msra.mxu1 %v3141_v31  ;;  %v3203_v31 = vld [vmem:[%s5443_s7 + $0x4a0] sm:$0xff] }
 0x399   : > { %1866 = vmatprep.subr.mxu1 %v3140_v32  ;;  %v3202_v32 = vld [vmem:[%s5443_s7 + $0x498] sm:$0xff] }
 0x39a   : > { %1867 = vmatpush2.msra.mxu1 %v3139_v33  ;;  %v3201_v33 = vld [vmem:[%s5443_s7 + $0x490] sm:$0xff] }
 0x39b   : > { %1868 = vmatprep.subr.mxu1 %v3138_v34  ;;  %v3200_v34 = vld [vmem:[%s5443_s7 + $0x488] sm:$0xff] }
 0x39c   : > { %1869 = vmatpush2.msra.mxu1 %v3137_v35  ;;  %v3199_v35 = vld [vmem:[%s5443_s7 + $0x480] sm:$0xff] }
 0x39d   : > { %1870 = vmatprep.subr.mxu1 %v3136_v51  ;;  %v3198_v51 = vld [vmem:[%s5443_s7 + $0x478] sm:$0xff] }
 0x39e   : > { %1871 = vmatpush2.msra.mxu1 %v3135_v48  ;;  %v3197_v48 = vld [vmem:[%s5443_s7 + $0x470] sm:$0xff] }
 0x39f   : > { %1872 = vmatprep.subr.mxu1 %v3134_v52  ;;  %v3196_v52 = vld [vmem:[%s5443_s7 + $0x468] sm:$0xff] }
 0x3a0   : > { %1873 = vmatpush2.msra.mxu1 %v3133_v49  ;;  %v3195_v49 = vld [vmem:[%s5443_s7 + $0x460] sm:$0xff] }
 0x3a1   : > { %3156 = vmatprep.subr.msk.mxu1 %vm1547_vm6, %v4370_v56  ;;  %v1660_v56 = vld [vmem:[%s5443_s7 + $0x118] sm:$0xff] }
 0x3a2   : > { %1944 = vmatprep.subr.mxu0 %v1660_v56  ;;  %v2192_v56 = vld [vmem:[%s5445_s9 + $0x78] sm:$0xff] }
 0x3a3   : > { %1945 = vmatpush2.msra.mxu0 %v1659_v60  ;;  %v2191_v60 = vld [vmem:[%s5445_s9 + $0x70] sm:$0xff] }
 0x3a4   : > { %1946 = vmatprep.subr.mxu0 %v1658_v61  ;;  %v2190_v61 = vld [vmem:[%s5445_s9 + $0x68] sm:$0xff] }
 0x3a5   : > { %1947 = vmatpush2.msra.mxu0 %v1657_v62  ;;  %v2189_v62 = vld [vmem:[%s5445_s9 + $0x60] sm:$0xff] }
 0x3a6   : > { %2205 = vmatprep.subr.mxu0 %v3419_v16 }
 0x429   : > { %v1620_v0 = vpop.f32.mrf.mxu1 }
 0x42b   : > { %v1622_v1 = vpop.f32.mrf.mxu1 }
 0x42c   : > { %3154 = vmatprep.mubr.msk.f32.mxu0 %vm1806_vm8, %v1622_v1  ;;  %v2187_v1 = vld [vmem:[%s5445_s9 + $0x50] sm:$0xff] }
 0x42d   : > { %v1748_v2 = vpop.f32.mrf.mxu1  ;;  %1949 = vmatmul.mubr.f32.vlgmr.msra.gmra.mxu0 %v1620_v0  ;;  %v2188_v0 = vld [vmem:[%s5445_s9 + $0x58] sm:$0xff] }
 0x42e   : > { %2206 = vmatpush1.msra.mxu0 %v2192_v56 }
 0x42f   : > { %v1750_v3 = vpop.f32.mrf.mxu1  ;;  %2207 = vmatprep.subr.mxu0 %v3419_v16 }
 0x430   : > { %3153 = vmatprep.mubr.msk.f32.mxu1 %vm1806_vm8, %v1750_v3  ;;  %2208 = vmatpush1.msra.mxu0 %v2191_v60  ;;  %v2185_v3 = vld [vmem:[%s5445_s9 + $0x40] sm:$0xff] }
 0x431   : > { %1875 = vmatmul.mubr.f32.vlgmr.msra.gmra.mxu1 %v1748_v2  ;;  %2209 = vmatprep.subr.mxu0 %v3419_v16  ;;  %v2186_v2 = vld [vmem:[%s5445_s9 + $0x48] sm:$0xff] }
 0x432   : > { %3157 = vmatpush1.msk.msra.mxu1 %vm1547_vm6, %v4372_v47  ;;  %2024 = vmatprep.mubr.f32.mxu1 %v3419_v16  ;;  %v3188_v47 = vld [vmem:[%s5443_s7 + $0x428] sm:$0xff] }
 0x433   : > { %1990 = vmatprep.subr.mxu1 %v4374_v57  ;;  %v3186_v57 = vld [vmem:[%s5443_s7 + $0x418] sm:$0xff]  ;;  %2210 = vmatpush1.msra.mxu0 %v2190_v61 }
 0x434   : > { %1991 = vmatpush1.msra.mxu1 %v4378_v50  ;;  %v3185_v50 = vld [vmem:[%s5443_s7 + $0x410] sm:$0xff]  ;;  %2211 = vmatprep.subr.mxu0 %v3419_v16 }
 0x435   : > { %3158 = vmatmul.mubr.msk.f32.vlgmr.msra.gmra.mxu1 %vm1543_vm7, %v3155_v4  ;;  %2087 = vmatprep.subr.mxu1 %v3190_v5  ;;  %v2184_v4 = vld [vmem:[%s5445_s9 + $0x38] sm:$0xff]  ;;  %v2183_v5 = vld [vmem:[%s5445_s9 + $0x30] sm:$0xff] }
 0x436   : > { %2088 = vmatpush1.msra.mxu1 %v3189_v6  ;;  %2212 = vmatpush1.msra.mxu0 %v2189_v62  ;;  %v2182_v6 = vld [vmem:[%s5445_s9 + $0x28] sm:$0xff] }
 0x437   : > { %2089 = vmatprep.subr.mxu1 %v3188_v47  ;;  %2213 = vmatprep.subr.mxu0 %v3419_v16  ;;  %v2181_v47 = vld [vmem:[%s5445_s9 + $0x20] sm:$0xff] }
 0x438   : > { %2090 = vmatpush1.msra.mxu1 %v3187_v7  ;;  %2214 = vmatpush1.msra.mxu0 %v2188_v0  ;;  %v2180_v7 = vld [vmem:[%s5445_s9 + $0x18] sm:$0xff] }
 0x439   : > { %2091 = vmatprep.subr.mxu1 %v3186_v57  ;;  %2215 = vmatprep.subr.mxu0 %v3419_v16  ;;  %v2179_v57 = vld [vmem:[%s5445_s9 + $0x10] sm:$0xff] }
 0x43a   : > { %2092 = vmatpush1.msra.mxu1 %v3185_v50  ;;  %2216 = vmatpush1.msra.mxu0 %v2187_v1  ;;  %v2178_v50 = vld [vmem:[%s5445_s9 + $0x8] sm:$0xff] }
 0x43b   : > { %2093 = vmatprep.subr.mxu1 %v3184_v8  ;;  %2217 = vmatprep.subr.mxu0 %v3419_v16  ;;  %v2177_v8 = vld [vmem:[%s5445_s9] sm:$0xff] }
 0x43c   : > { %2094 = vmatpush1.msra.mxu1 %v3183_v9  ;;  %2218 = vmatpush1.msra.mxu0 %v2186_v2  ;;  %v2200_v9 = vld [vmem:[%s5445_s9 + $0xb8] sm:$0xff] }
 0x43d   : > { %2095 = vmatprep.subr.mxu1 %v3182_v10  ;;  %2219 = vmatprep.subr.mxu0 %v3419_v16  ;;  %v2199_v10 = vld [vmem:[%s5445_s9 + $0xb0] sm:$0xff] }
 0x43e   : > { %2096 = vmatpush1.msra.mxu1 %v3181_v11  ;;  %2220 = vmatpush1.msra.mxu0 %v2185_v3  ;;  %v2198_v11 = vld [vmem:[%s5445_s9 + $0xa8] sm:$0xff]  ;;  %v3252_v3 = vld [vmem:[%s5445_s9 + $0x1f0] sm:$0xff] }
 0x43f   : > { %2097 = vmatprep.subr.mxu1 %v3180_v12  ;;  %2221 = vmatprep.subr.mxu0 %v3419_v16 }
 0x440   : > { %2098 = vmatpush1.msra.mxu1 %v3179_v13  ;;  %2222 = vmatpush1.msra.mxu0 %v2184_v4 }
 0x441   : > { %2099 = vmatprep.subr.mxu1 %v3178_v14  ;;  %2223 = vmatprep.subr.mxu0 %v3419_v16 }
 0x442   : > { %2100 = vmatpush1.msra.mxu1 %v3177_v15  ;;  %2224 = vmatpush1.msra.mxu0 %v2183_v5  ;;  %v3278_v5 = vld [vmem:[%s5445_s9 + $0x2b8] sm:$0xff] }
 0x443   : > { %2101 = vmatprep.subr.mxu1 %v3176_v17  ;;  %2225 = vmatprep.subr.mxu0 %v3419_v16  ;;  %v3228_v17 = vld [vmem:[%s5445_s9 + $0x138] sm:$0xff] }
 0x444   : > { %2102 = vmatpush1.msra.mxu1 %v3175_v18  ;;  %2226 = vmatpush1.msra.mxu0 %v2182_v6  ;;  %v3227_v18 = vld [vmem:[%s5445_s9 + $0x130] sm:$0xff] }
 0x445   : > { %2103 = vmatprep.subr.mxu1 %v3174_v19  ;;  %2227 = vmatprep.subr.mxu0 %v3419_v16  ;;  %v3226_v19 = vld [vmem:[%s5445_s9 + $0x128] sm:$0xff] }
 0x446   : > { %2104 = vmatpush1.msra.mxu1 %v3173_v20  ;;  %2228 = vmatpush1.msra.mxu0 %v2181_v47  ;;  %v3225_v20 = vld [vmem:[%s5445_s9 + $0x120] sm:$0xff]  ;;  %v3251_v47 = vld [vmem:[%s5445_s9 + $0x1e8] sm:$0xff] }
 0x447   : > { %2105 = vmatprep.subr.mxu1 %v3172_v21  ;;  %2229 = vmatprep.subr.mxu0 %v3419_v16  ;;  %v3224_v21 = vld [vmem:[%s5445_s9 + $0x118] sm:$0xff] }
 0x448   : > { %2106 = vmatpush1.msra.mxu1 %v3171_v22  ;;  %2230 = vmatpush1.msra.mxu0 %v2180_v7  ;;  %v3223_v22 = vld [vmem:[%s5445_s9 + $0x110] sm:$0xff] }
 0x449   : > { %2107 = vmatprep.subr.mxu1 %v3170_v23  ;;  %2231 = vmatprep.subr.mxu0 %v3419_v16  ;;  %v3222_v23 = vld [vmem:[%s5445_s9 + $0x108] sm:$0xff]  ;;  %v3277_v7 = vld [vmem:[%s5445_s9 + $0x2b0] sm:$0xff] }
 0x44a   : > { %2108 = vmatpush1.msra.mxu1 %v3169_v24  ;;  %2232 = vmatpush1.msra.mxu0 %v2179_v57  ;;  %v3221_v24 = vld [vmem:[%s5445_s9 + $0x100] sm:$0xff] }
 0x44b   : > { %2109 = vmatprep.subr.mxu1 %v3168_v25  ;;  %2233 = vmatprep.subr.mxu0 %v3419_v16  ;;  %v3220_v25 = vld [vmem:[%s5445_s9 + $0xf8] sm:$0xff]  ;;  %v3250_v57 = vld [vmem:[%s5445_s9 + $0x1e0] sm:$0xff] }
 0x44c   : > { %2110 = vmatpush1.msra.mxu1 %v3167_v26  ;;  %2234 = vmatpush1.msra.mxu0 %v2178_v50  ;;  %v3219_v26 = vld [vmem:[%s5445_s9 + $0xf0] sm:$0xff]  ;;  %v3276_v50 = vld [vmem:[%s5445_s9 + $0x2a8] sm:$0xff] }
 0x44d   : > { %2111 = vmatprep.subr.mxu1 %v3166_v28  ;;  %2235 = vmatprep.subr.mxu0 %v3419_v16  ;;  %v3218_v28 = vld [vmem:[%s5445_s9 + $0xe8] sm:$0xff] }
 0x44e   : > { %2112 = vmatpush1.msra.mxu1 %v3165_v30  ;;  %2236 = vmatpush1.msra.mxu0 %v2177_v8  ;;  %v3217_v30 = vld [vmem:[%s5445_s9 + $0xe0] sm:$0xff]  ;;  %v3249_v8 = vld [vmem:[%s5445_s9 + $0x1d8] sm:$0xff] }
 0x44f   : > { %2113 = vmatprep.subr.mxu1 %v3164_v36  ;;  %2253 = vmatprep.subr.mxu0 %v3419_v16  ;;  %v3216_v36 = vld [vmem:[%s5445_s9 + $0xd8] sm:$0xff] }
 0x450   : > { %2114 = vmatpush1.msra.mxu1 %v3163_v37  ;;  %2254 = vmatpush2.msra.mxu0 %v2200_v9  ;;  %v3215_v37 = vld [vmem:[%s5445_s9 + $0xd0] sm:$0xff]  ;;  %v3275_v9 = vld [vmem:[%s5445_s9 + $0x2a0] sm:$0xff] }
 0x451   : > { %2115 = vmatprep.subr.mxu1 %v3162_v38  ;;  %2255 = vmatprep.subr.mxu0 %v3419_v16  ;;  %v3214_v38 = vld [vmem:[%s5445_s9 + $0xc8] sm:$0xff] }
 0x452   : > { %2116 = vmatpush1.msra.mxu1 %v3161_v39  ;;  %2256 = vmatpush2.msra.mxu0 %v2199_v10  ;;  %v3213_v39 = vld [vmem:[%s5445_s9 + $0xc0] sm:$0xff]  ;;  %v3248_v10 = vld [vmem:[%s5445_s9 + $0x1d0] sm:$0xff] }
 0x453   : > { %2117 = vmatprep.subr.mxu1 %v3160_v40  ;;  %2257 = vmatprep.subr.mxu0 %v3419_v16  ;;  %v3236_v40 = vld [vmem:[%s5445_s9 + $0x178] sm:$0xff] }
 0x454   : > { %2118 = vmatpush1.msra.mxu1 %v3159_v41  ;;  %2258 = vmatpush2.msra.mxu0 %v2198_v11  ;;  %v3235_v41 = vld [vmem:[%s5445_s9 + $0x170] sm:$0xff]  ;;  %v3274_v11 = vld [vmem:[%s5445_s9 + $0x298] sm:$0xff] }
 0x455   : > { %2131 = vmatprep.subr.mxu1 %v3210_v42  ;;  %2259 = vmatprep.subr.mxu0 %v3419_v16  ;;  %v2197_v42 = vld [vmem:[%s5445_s9 + $0xa0] sm:$0xff] }
 0x456   : > { %2132 = vmatpush2.msra.mxu1 %v3209_v43  ;;  %v3234_v43 = vld [vmem:[%s5445_s9 + $0x168] sm:$0xff]  ;;  %2260 = vmatpush2.msra.mxu0 %v2197_v42  ;;  %v3260_v42 = vld [vmem:[%s5445_s9 + $0x230] sm:$0xff] }
 0x457   : > { %2133 = vmatprep.subr.mxu1 %v3208_v44  ;;  %2261 = vmatprep.subr.mxu0 %v3419_v16  ;;  %v2196_v44 = vld [vmem:[%s5445_s9 + $0x98] sm:$0xff] }
 0x458   : > { %2134 = vmatpush2.msra.mxu1 %v3207_v45  ;;  %v3233_v45 = vld [vmem:[%s5445_s9 + $0x160] sm:$0xff]  ;;  %2262 = vmatpush2.msra.mxu0 %v2196_v44  ;;  %v3259_v44 = vld [vmem:[%s5445_s9 + $0x228] sm:$0xff] }
 0x459   : > { %2135 = vmatprep.subr.mxu1 %v3206_v46  ;;  %2263 = vmatprep.subr.mxu0 %v3419_v16  ;;  %v2195_v46 = vld [vmem:[%s5445_s9 + $0x90] sm:$0xff] }
 0x45a   : > { %2136 = vmatpush2.msra.mxu1 %v3205_v27  ;;  %v3232_v27 = vld [vmem:[%s5445_s9 + $0x158] sm:$0xff]  ;;  %2264 = vmatpush2.msra.mxu0 %v2195_v46  ;;  %v3258_v46 = vld [vmem:[%s5445_s9 + $0x220] sm:$0xff] }
 0x45b   : > { %2137 = vmatprep.subr.mxu1 %v3204_v29  ;;  %2265 = vmatprep.subr.mxu0 %v3419_v16  ;;  %v2194_v29 = vld [vmem:[%s5445_s9 + $0x88] sm:$0xff] }
 0x45c   : > { %2138 = vmatpush2.msra.mxu1 %v3203_v31  ;;  %v3231_v31 = vld [vmem:[%s5445_s9 + $0x150] sm:$0xff]  ;;  %2266 = vmatpush2.msra.mxu0 %v2194_v29  ;;  %v3257_v29 = vld [vmem:[%s5445_s9 + $0x218] sm:$0xff] }
 0x45d   : > { %2139 = vmatprep.subr.mxu1 %v3202_v32  ;;  %v2193_v32 = vld [vmem:[%s5445_s9 + $0x80] sm:$0xff]  ;;  %2267 = vmatprep.subr.mxu0 %v3419_v16 }
 0x45e   : > { %2140 = vmatpush2.msra.mxu1 %v3201_v33  ;;  %v3230_v33 = vld [vmem:[%s5445_s9 + $0x148] sm:$0xff]  ;;  %2268 = vmatpush2.msra.mxu0 %v2193_v32  ;;  %v3256_v32 = vld [vmem:[%s5445_s9 + $0x210] sm:$0xff] }
 0x45f   : > { %2141 = vmatprep.subr.mxu1 %v3200_v34  ;;  %2408 = vmatprep.subr.mxu0 %v3419_v16  ;;  %v3229_v34 = vld [vmem:[%s5445_s9 + $0x140] sm:$0xff] }
 0x460   : > { %2142 = vmatpush2.msra.mxu1 %v3199_v35 }
 0x461   : > { %2143 = vmatprep.subr.mxu1 %v3198_v51  ;;  %v2160_v51 = vld [vmem:[%s5444_s8] sm:$0x3] }
 0x462   : > { %2144 = vmatpush2.msra.mxu1 %v3197_v48 }
 0x463   : > { %2145 = vmatprep.subr.mxu1 %v3196_v52  ;;  %v2165_v52 = vrot.slane %v2160_v51, %v3799_v59  ;;  %v3253_v59 = vld [vmem:[%s5445_s9 + $0x1f8] sm:$0xff] }
 0x464   : > { %2146 = vmatpush2.msra.mxu1 %v3195_v49 }
 0x465   : > { %2147 = vmatprep.subr.mxu1 %v3194_v53 }
 0x466   : > { %2148 = vmatpush2.msra.mxu1 %v3193_v54 }
 0x467   : > { %2149 = vmatprep.subr.mxu1 %v3192_v55 }
 0x468   : > { %2150 = vmatpush2.msra.mxu1 %v3191_v58  ;;  %v2169_v58 = vrot.slane %v2160_v51, %v3804_v63  ;;  %v3254_v51 = vld [vmem:[%s5445_s9 + $0x200] sm:$0xff] }
 0x469   : > { %2307 = vmatprep.subr.mxu1 %v3419_v16 }
 0x4ed   : > { %v1950_v35 = vpop.f32.mrf.mxu0 }
 0x4ef   : > { %v1952_v49 = vpop.f32.mrf.mxu0 }
 0x4f1   : > { %v4826_v12 = vpop.f32.mrf.mxu1 }
 0x4f2   : > { %v1951_v48 = vadd.f32 %v1950_v35, %v4826_v12  ;;  %v3247_v12 = vld [vmem:[%s5445_s9 + $0x1c8] sm:$0xff]  ;;  %v3281_v35 = vld [vmem:[%s5445_s9 + $0x2d0] sm:$0xff] }
 0x4f3   : > { %v4828_v13 = vpop.f32.mrf.mxu1 }
 0x4f4   : > { %v1953_v54 = vadd.f32 %v1952_v49, %v4828_v13  ;;  %v3273_v13 = vld [vmem:[%s5445_s9 + $0x290] sm:$0xff]  ;;  %v3279_v49 = vld [vmem:[%s5445_s9 + $0x2c0] sm:$0xff] }
 0x4f5   : > { %v2026_v14 = vpop.f32.mrf.mxu1 }
 0x4f7   : > { %v2028_v15 = vpop.f32.mrf.mxu1 }
 0x4f8   : > { %3211 = vmatprep.mubr.msk.f32.mxu1 %vm1806_vm8, %v2028_v15  ;;  %v3272_v15 = vld [vmem:[%s5445_s9 + $0x288] sm:$0xff] }
 0x4f9   : > { %2152 = vmatmul.mubr.f32.vlgmr.msra.gmra.mxu1 %v2026_v14  ;;  %v3246_v14 = vld [vmem:[%s5445_s9 + $0x1c0] sm:$0xff] }
 0x4fa   : > { %2308 = vmatpush1.msra.mxu1 %v3228_v17  ;;  %v3245_v17 = vld [vmem:[%s5445_s9 + $0x1b8] sm:$0xff] }
 0x4fb   : > { %2309 = vmatprep.subr.mxu1 %v3419_v16 }
 0x4fc   : > { %2310 = vmatpush1.msra.mxu1 %v3227_v18  ;;  %v3271_v18 = vld [vmem:[%s5445_s9 + $0x280] sm:$0xff] }
 0x4fd   : > { %2311 = vmatprep.subr.mxu1 %v3419_v16 }
 0x4fe   : > { %2312 = vmatpush1.msra.mxu1 %v3226_v19  ;;  %v3244_v19 = vld [vmem:[%s5445_s9 + $0x1b0] sm:$0xff] }
 0x4ff   : > { %2313 = vmatprep.subr.mxu1 %v3419_v16 }
 0x500   : > { %2314 = vmatpush1.msra.mxu1 %v3225_v20  ;;  %v3270_v20 = vld [vmem:[%s5445_s9 + $0x278] sm:$0xff] }
 0x501   : > { %2315 = vmatprep.subr.mxu1 %v3419_v16 }
 0x502   : > { %2316 = vmatpush1.msra.mxu1 %v3224_v21  ;;  %v3243_v21 = vld [vmem:[%s5445_s9 + $0x1a8] sm:$0xff] }
 0x503   : > { %2317 = vmatprep.subr.mxu1 %v3419_v16 }
 0x504   : > { %2318 = vmatpush1.msra.mxu1 %v3223_v22  ;;  %v3269_v22 = vld [vmem:[%s5445_s9 + $0x270] sm:$0xff] }
 0x505   : > { %2319 = vmatprep.subr.mxu1 %v3419_v16 }
 0x506   : > { %2320 = vmatpush1.msra.mxu1 %v3222_v23  ;;  %v3242_v23 = vld [vmem:[%s5445_s9 + $0x1a0] sm:$0xff] }
 0x507   : > { %2321 = vmatprep.subr.mxu1 %v3419_v16 }
 0x508   : > { %2322 = vmatpush1.msra.mxu1 %v3221_v24  ;;  %v3268_v24 = vld [vmem:[%s5445_s9 + $0x268] sm:$0xff] }
 0x509   : > { %2323 = vmatprep.subr.mxu1 %v3419_v16 }
 0x50a   : > { %2324 = vmatpush1.msra.mxu1 %v3220_v25  ;;  %v3241_v25 = vld [vmem:[%s5445_s9 + $0x198] sm:$0xff] }
 0x50b   : > { %2325 = vmatprep.subr.mxu1 %v3419_v16 }
 0x50c   : > { %2326 = vmatpush1.msra.mxu1 %v3219_v26  ;;  %v3267_v26 = vld [vmem:[%s5445_s9 + $0x260] sm:$0xff] }
 0x50d   : > { %2327 = vmatprep.subr.mxu1 %v3419_v16 }
 0x50e   : > { %2328 = vmatpush1.msra.mxu1 %v3218_v28  ;;  %v3240_v28 = vld [vmem:[%s5445_s9 + $0x190] sm:$0xff] }
 0x50f   : > { %2329 = vmatprep.subr.mxu1 %v3419_v16 }
 0x510   : > { %2330 = vmatpush1.msra.mxu1 %v3217_v30  ;;  %v3266_v30 = vld [vmem:[%s5445_s9 + $0x258] sm:$0xff] }
 0x511   : > { %2331 = vmatprep.subr.mxu1 %v3419_v16 }
 0x512   : > { %2332 = vmatpush1.msra.mxu1 %v3216_v36  ;;  %v3239_v36 = vld [vmem:[%s5445_s9 + $0x188] sm:$0xff] }
 0x513   : > { %2333 = vmatprep.subr.mxu1 %v3419_v16 }
 0x514   : > { %2334 = vmatpush1.msra.mxu1 %v3215_v37  ;;  %v3265_v37 = vld [vmem:[%s5445_s9 + $0x250] sm:$0xff] }
 0x515   : > { %2335 = vmatprep.subr.mxu1 %v3419_v16 }
 0x516   : > { %2336 = vmatpush1.msra.mxu1 %v3214_v38  ;;  %v3238_v38 = vld [vmem:[%s5445_s9 + $0x180] sm:$0xff] }
 0x517   : > { %2337 = vmatprep.subr.mxu1 %v3419_v16 }
 0x518   : > { %2338 = vmatpush1.msra.mxu1 %v3213_v39  ;;  %v3264_v39 = vld [vmem:[%s5445_s9 + $0x248] sm:$0xff] }
 0x519   : > { %2355 = vmatprep.subr.mxu1 %v3419_v16 }
 0x51a   : > { %2356 = vmatpush2.msra.mxu1 %v3236_v40  ;;  %v3261_v40 = vld [vmem:[%s5445_s9 + $0x238] sm:$0xff] }
 0x51b   : > { %2357 = vmatprep.subr.mxu1 %v3419_v16 }
 0x51c   : > { %2358 = vmatpush2.msra.mxu1 %v3235_v41  ;;  %v3263_v41 = vld [vmem:[%s5445_s9 + $0x240] sm:$0xff] }
 0x51d   : > { %2359 = vmatprep.subr.mxu1 %v3419_v16 }
 0x51e   : > { %2360 = vmatpush2.msra.mxu1 %v3234_v43  ;;  %v3286_v43 = vld [vmem:[%s5445_s9 + $0x2f8] sm:$0xff] }
 0x51f   : > { %2361 = vmatprep.subr.mxu1 %v3419_v16 }
 0x520   : > { %2362 = vmatpush2.msra.mxu1 %v3233_v45  ;;  %v3285_v45 = vld [vmem:[%s5445_s9 + $0x2f0] sm:$0xff] }
 0x521   : > { %2363 = vmatprep.subr.mxu1 %v3419_v16 }
 0x522   : > { %2364 = vmatpush2.msra.mxu1 %v3232_v27  ;;  %v3284_v27 = vld [vmem:[%s5445_s9 + $0x2e8] sm:$0xff] }
 0x523   : > { %2365 = vmatprep.subr.mxu1 %v3419_v16 }
 0x524   : > { %2366 = vmatpush2.msra.mxu1 %v3231_v31  ;;  %v3283_v31 = vld [vmem:[%s5445_s9 + $0x2e0] sm:$0xff] }
 0x525   : > { %2367 = vmatprep.subr.mxu1 %v3419_v16 }
 0x526   : > { %2368 = vmatpush2.msra.mxu1 %v3230_v33  ;;  %v3282_v33 = vld [vmem:[%s5445_s9 + $0x2d8] sm:$0xff] }
 0x527   : > { %2369 = vmatprep.subr.mxu1 %v3419_v16 }
 0x528   : > { %2370 = vmatpush2.msra.mxu1 %v3229_v34  ;;  %v3255_v34 = vld [vmem:[%s5445_s9 + $0x208] sm:$0xff] }
 0x529   : > { %2509 = vmatprep.subr.mxu1 %v3419_v16 }
 0x5b9   : > { %v2153_v53 = vpop.f32.mrf.mxu1 }
 0x5ba   : > { %v2158_v55 = vadd.f32 %v2153_v53, %v1951_v48  ;;  %v3280_v48 = vld [vmem:[%s5445_s9 + $0x2c8] sm:$0xff]  ;;  %v3303_v53 = vld [vmem:[%s5445_s9 + $0x378] sm:$0xff] }
 0x5bb   : > { %v2155_v56 = vpop.f32.mrf.mxu1 }
 0x5bc   : > { %v2172_v60 = vadd.f32 %v2165_v52, %v2158_v55  ;;  %v2159_v61 = vadd.f32 %v2155_v56, %v1953_v54  ;;  %v3328_v56 = vld [vmem:[%s5445_s9 + $0x438] sm:$0xff] }
 0x5be   : > { %v2173_v62 = vadd.f32 %v2169_v58, %v2159_v61  ;;  %v4954_v0 = vmax.f32 %v2172_v60, 0.0  ;;  %v3302_v58 = vld [vmem:[%s5445_s9 + $0x370] sm:$0xff]  ;;  %v3301_v61 = vld [vmem:[%s5445_s9 + $0x368] sm:$0xff] }
 0x5c0   : > { %v4956_v1 = vmax.f32 %v2173_v62, 0.0  ;;  %v2302_v4 = vrot.slane %v4954_v0, 1  ;;  %v2403_v52 = vrot.slane %v4954_v0, 2  ;;  %v2504_v55 = vrot.slane %v4954_v0, 3  ;;  %v3327_v62 = vld [vmem:[%s5445_s9 + $0x430] sm:$0xff] }
 0x5c2   : > { %3212 = vmatprep.mubr.msk.f32.mxu0 %vm2201_vm9, %v4956_v1  ;;  %v2303_v2 = vrot.slane %v4956_v1, 1  ;;  %v2404_v63 = vrot.slane %v4956_v1, 2  ;;  %v2505_v6 = vrot.slane %v4956_v1, 3  ;;  %v2606_v54 = vrot.slane %v4956_v1, 4 }
 0x5c3   : > { %2270 = vmatmul.mubr.f32.vlgmr.msra.gmra.mxu0 %v4954_v0  ;;  %v2707_v60 = vrot.slane %v4956_v1, 5  ;;  %v3300_v1 = vld [vmem:[%s5445_s9 + $0x360] sm:$0xff] }
 0x5c4   : > { %2409 = vmatpush1.msra.mxu0 %v3253_v59  ;;  %3237 = vmatprep.mubr.msk.f32.mxu1 %vm2201_vm9, %v2303_v2  ;;  %v3326_v59 = vld [vmem:[%s5445_s9 + $0x428] sm:$0xff]  ;;  %v3299_v2 = vld [vmem:[%s5445_s9 + $0x358] sm:$0xff] }
 0x5c5   : > { %2410 = vmatprep.subr.mxu0 %v3419_v16  ;;  %3262 = vmatprep.mubr.msk.f32.mxu0 %vm2201_vm9, %v2404_v63  ;;  %v3325_v63 = vld [vmem:[%s5445_s9 + $0x420] sm:$0xff] }
 0x5c6   : > { %2372 = vmatmul.mubr.f32.vlgmr.msra.gmra.mxu1 %v2302_v4  ;;  %2411 = vmatpush1.msra.mxu0 %v3252_v3  ;;  %v3298_v3 = vld [vmem:[%s5445_s9 + $0x350] sm:$0xff]  ;;  %v3324_v4 = vld [vmem:[%s5445_s9 + $0x418] sm:$0xff] }
 0x5c7   : > { %2510 = vmatpush1.msra.mxu1 %v3278_v5  ;;  %2412 = vmatprep.subr.mxu0 %v3419_v16  ;;  %v3297_v5 = vld [vmem:[%s5445_s9 + $0x348] sm:$0xff] }
 0x5c8   : > { %2511 = vmatprep.subr.mxu1 %v3419_v16  ;;  %3287 = vmatprep.mubr.msk.f32.mxu1 %vm2201_vm9, %v2505_v6  ;;  %v3323_v6 = vld [vmem:[%s5445_s9 + $0x410] sm:$0xff] }
 0x5c9   : > { %2413 = vmatpush1.msra.mxu0 %v3251_v47  ;;  %2512 = vmatpush1.msra.mxu1 %v3277_v7  ;;  %v3296_v47 = vld [vmem:[%s5445_s9 + $0x340] sm:$0xff]  ;;  %v3322_v7 = vld [vmem:[%s5445_s9 + $0x408] sm:$0xff] }
 0x5ca   : > { %2414 = vmatprep.subr.mxu0 %v3419_v16  ;;  %2513 = vmatprep.subr.mxu1 %v3419_v16 }
 0x5cb   : > { %2415 = vmatpush1.msra.mxu0 %v3250_v57  ;;  %2514 = vmatpush1.msra.mxu1 %v3276_v50  ;;  %v3295_v57 = vld [vmem:[%s5445_s9 + $0x338] sm:$0xff]  ;;  %v3321_v50 = vld [vmem:[%s5445_s9 + $0x400] sm:$0xff] }
 0x5cc   : > { %2416 = vmatprep.subr.mxu0 %v3419_v16  ;;  %2515 = vmatprep.subr.mxu1 %v3419_v16 }
 0x5cd   : > { %2417 = vmatpush1.msra.mxu0 %v3249_v8  ;;  %2516 = vmatpush1.msra.mxu1 %v3275_v9  ;;  %v3294_v8 = vld [vmem:[%s5445_s9 + $0x330] sm:$0xff]  ;;  %v3320_v9 = vld [vmem:[%s5445_s9 + $0x3f8] sm:$0xff] }
 0x5ce   : > { %2418 = vmatprep.subr.mxu0 %v3419_v16  ;;  %2517 = vmatprep.subr.mxu1 %v3419_v16 }
 0x5cf   : > { %2419 = vmatpush1.msra.mxu0 %v3248_v10  ;;  %2518 = vmatpush1.msra.mxu1 %v3274_v11  ;;  %v3293_v10 = vld [vmem:[%s5445_s9 + $0x328] sm:$0xff]  ;;  %v3319_v11 = vld [vmem:[%s5445_s9 + $0x3f0] sm:$0xff] }
 0x5d0   : > { %2420 = vmatprep.subr.mxu0 %v3419_v16  ;;  %2519 = vmatprep.subr.mxu1 %v3419_v16 }
 0x5d1   : > { %2421 = vmatpush1.msra.mxu0 %v3247_v12  ;;  %2520 = vmatpush1.msra.mxu1 %v3273_v13  ;;  %v3292_v12 = vld [vmem:[%s5445_s9 + $0x320] sm:$0xff]  ;;  %v3318_v13 = vld [vmem:[%s5445_s9 + $0x3e8] sm:$0xff] }
 0x5d2   : > { %2422 = vmatprep.subr.mxu0 %v3419_v16  ;;  %2521 = vmatprep.subr.mxu1 %v3419_v16 }
 0x5d3   : > { %2423 = vmatpush1.msra.mxu0 %v3246_v14  ;;  %2522 = vmatpush1.msra.mxu1 %v3272_v15  ;;  %v3291_v14 = vld [vmem:[%s5445_s9 + $0x318] sm:$0xff]  ;;  %v3317_v15 = vld [vmem:[%s5445_s9 + $0x3e0] sm:$0xff] }
 0x5d4   : > { %2424 = vmatprep.subr.mxu0 %v3419_v16  ;;  %2523 = vmatprep.subr.mxu1 %v3419_v16 }
 0x5d5   : > { %2425 = vmatpush1.msra.mxu0 %v3245_v17  ;;  %2524 = vmatpush1.msra.mxu1 %v3271_v18  ;;  %v3290_v17 = vld [vmem:[%s5445_s9 + $0x310] sm:$0xff]  ;;  %v3316_v18 = vld [vmem:[%s5445_s9 + $0x3d8] sm:$0xff] }
 0x5d6   : > { %2426 = vmatprep.subr.mxu0 %v3419_v16  ;;  %2525 = vmatprep.subr.mxu1 %v3419_v16 }
 0x5d7   : > { %2427 = vmatpush1.msra.mxu0 %v3244_v19  ;;  %2526 = vmatpush1.msra.mxu1 %v3270_v20  ;;  %v3289_v19 = vld [vmem:[%s5445_s9 + $0x308] sm:$0xff]  ;;  %v3315_v20 = vld [vmem:[%s5445_s9 + $0x3d0] sm:$0xff] }
 0x5d8   : > { %2428 = vmatprep.subr.mxu0 %v3419_v16  ;;  %2527 = vmatprep.subr.mxu1 %v3419_v16 }
 0x5d9   : > { %2429 = vmatpush1.msra.mxu0 %v3243_v21  ;;  %2528 = vmatpush1.msra.mxu1 %v3269_v22  ;;  %v3288_v21 = vld [vmem:[%s5445_s9 + $0x300] sm:$0xff]  ;;  %v3314_v22 = vld [vmem:[%s5445_s9 + $0x3c8] sm:$0xff] }
 0x5da   : > { %2430 = vmatprep.subr.mxu0 %v3419_v16  ;;  %2529 = vmatprep.subr.mxu1 %v3419_v16 }
 0x5db   : > { %2431 = vmatpush1.msra.mxu0 %v3242_v23  ;;  %2530 = vmatpush1.msra.mxu1 %v3268_v24  ;;  %v3311_v23 = vld [vmem:[%s5445_s9 + $0x3b8] sm:$0xff]  ;;  %v3313_v24 = vld [vmem:[%s5445_s9 + $0x3c0] sm:$0xff] }
 0x5dc   : > { %2432 = vmatprep.subr.mxu0 %v3419_v16  ;;  %2531 = vmatprep.subr.mxu1 %v3419_v16 }
 0x5dd   : > { %2433 = vmatpush1.msra.mxu0 %v3241_v25  ;;  %2532 = vmatpush1.msra.mxu1 %v3267_v26  ;;  %v3310_v25 = vld [vmem:[%s5445_s9 + $0x3b0] sm:$0xff]  ;;  %v3336_v26 = vld [vmem:[%s5445_s9 + $0x478] sm:$0xff] }
 0x5de   : > { %2434 = vmatprep.subr.mxu0 %v3419_v16  ;;  %2533 = vmatprep.subr.mxu1 %v3419_v16 }
 0x5df   : > { %2435 = vmatpush1.msra.mxu0 %v3240_v28  ;;  %2534 = vmatpush1.msra.mxu1 %v3266_v30  ;;  %v3309_v28 = vld [vmem:[%s5445_s9 + $0x3a8] sm:$0xff]  ;;  %v3335_v30 = vld [vmem:[%s5445_s9 + $0x470] sm:$0xff] }
 0x5e0   : > { %2436 = vmatprep.subr.mxu0 %v3419_v16  ;;  %2535 = vmatprep.subr.mxu1 %v3419_v16 }
 0x5e1   : > { %2437 = vmatpush1.msra.mxu0 %v3239_v36  ;;  %2536 = vmatpush1.msra.mxu1 %v3265_v37  ;;  %v3308_v36 = vld [vmem:[%s5445_s9 + $0x3a0] sm:$0xff]  ;;  %v3334_v37 = vld [vmem:[%s5445_s9 + $0x468] sm:$0xff] }
 0x5e2   : > { %2438 = vmatprep.subr.mxu0 %v3419_v16  ;;  %2537 = vmatprep.subr.mxu1 %v3419_v16 }
 0x5e3   : > { %2439 = vmatpush1.msra.mxu0 %v3238_v38  ;;  %2538 = vmatpush1.msra.mxu1 %v3264_v39  ;;  %v3307_v38 = vld [vmem:[%s5445_s9 + $0x398] sm:$0xff]  ;;  %v3333_v39 = vld [vmem:[%s5445_s9 + $0x460] sm:$0xff] }
 0x5e4   : > { %2456 = vmatprep.subr.mxu0 %v3419_v16  ;;  %2539 = vmatprep.subr.mxu1 %v3419_v16 }
 0x5e5   : > { %2457 = vmatpush2.msra.mxu0 %v3261_v40  ;;  %2540 = vmatpush1.msra.mxu1 %v3263_v41  ;;  %v3306_v40 = vld [vmem:[%s5445_s9 + $0x390] sm:$0xff]  ;;  %v3332_v41 = vld [vmem:[%s5445_s9 + $0x458] sm:$0xff] }
 0x5e6   : > { %2458 = vmatprep.subr.mxu0 %v3419_v16  ;;  %2557 = vmatprep.subr.mxu1 %v3419_v16 }
 0x5e7   : > { %2459 = vmatpush2.msra.mxu0 %v3260_v42  ;;  %2558 = vmatpush2.msra.mxu1 %v3286_v43  ;;  %v3305_v42 = vld [vmem:[%s5445_s9 + $0x388] sm:$0xff]  ;;  %v3331_v43 = vld [vmem:[%s5445_s9 + $0x450] sm:$0xff] }
 0x5e8   : > { %2460 = vmatprep.subr.mxu0 %v3419_v16  ;;  %2559 = vmatprep.subr.mxu1 %v3419_v16 }
 0x5e9   : > { %2461 = vmatpush2.msra.mxu0 %v3259_v44  ;;  %2560 = vmatpush2.msra.mxu1 %v3285_v45  ;;  %v3304_v44 = vld [vmem:[%s5445_s9 + $0x380] sm:$0xff]  ;;  %v3330_v45 = vld [vmem:[%s5445_s9 + $0x448] sm:$0xff] }
 0x5ea   : > { %2462 = vmatprep.subr.mxu0 %v3419_v16  ;;  %2561 = vmatprep.subr.mxu1 %v3419_v16 }
 0x5eb   : > { %2463 = vmatpush2.msra.mxu0 %v3258_v46  ;;  %2562 = vmatpush2.msra.mxu1 %v3284_v27  ;;  %v2605_v46 = vrot.slane %v4954_v0, 4  ;;  %v3329_v27 = vld [vmem:[%s5445_s9 + $0x440] sm:$0xff] }
 0x5ec   : > { %2464 = vmatprep.subr.mxu0 %v3419_v16  ;;  %2563 = vmatprep.subr.mxu1 %v3419_v16 }
 0x5ed   : > { %2465 = vmatpush2.msra.mxu0 %v3257_v29  ;;  %2564 = vmatpush2.msra.mxu1 %v3283_v31  ;;  %v2706_v29 = vrot.slane %v4954_v0, 5  ;;  %v2798_v31 = vld [vmem:[%s5447_s11 + $0x78] sm:$0xff]  ;;  %v2795_v0 = vld [vmem:[%s5447_s11 + $0x60] sm:$0xff] }
 0x5ee   : > { %2466 = vmatprep.subr.mxu0 %v3419_v16  ;;  %2565 = vmatprep.subr.mxu1 %v3419_v16 }
 0x5ef   : > { %2467 = vmatpush2.msra.mxu0 %v3256_v32  ;;  %2566 = vmatpush2.msra.mxu1 %v3282_v33  ;;  %v2797_v32 = vld [vmem:[%s5447_s11 + $0x70] sm:$0xff]  ;;  %v2796_v33 = vld [vmem:[%s5447_s11 + $0x68] sm:$0xff] }
 0x5f0   : > { %2468 = vmatprep.subr.mxu0 %v3419_v16  ;;  %2567 = vmatprep.subr.mxu1 %v3419_v16 }
 0x5f1   : > { %2469 = vmatpush2.msra.mxu0 %v3255_v34  ;;  %2568 = vmatpush2.msra.mxu1 %v3281_v35  ;;  %v2794_v34 = vld [vmem:[%s5447_s11 + $0x58] sm:$0xff]  ;;  %v2793_v35 = vld [vmem:[%s5447_s11 + $0x50] sm:$0xff] }
 0x5f2   : > { %2470 = vmatprep.subr.mxu0 %v3419_v16  ;;  %2569 = vmatprep.subr.mxu1 %v3419_v16 }
 0x5f3   : > { %2471 = vmatpush2.msra.mxu0 %v3254_v51  ;;  %2570 = vmatpush2.msra.mxu1 %v3280_v48  ;;  %v2792_v51 = vld [vmem:[%s5447_s11 + $0x48] sm:$0xff]  ;;  %v2791_v48 = vld [vmem:[%s5447_s11 + $0x40] sm:$0xff] }
 0x5f4   : > { %2473 = vmatmul.mubr.f32.vlgmr.msra.gmra.mxu0 %v2403_v52  ;;  %2571 = vmatprep.subr.mxu1 %v3419_v16  ;;  %v2790_v52 = vld [vmem:[%s5447_s11 + $0x38] sm:$0xff] }
 0x5f5   : > { %2610 = vmatprep.subr.mxu0 %v3419_v16  ;;  %2572 = vmatpush2.msra.mxu1 %v3279_v49  ;;  %v2789_v49 = vld [vmem:[%s5447_s11 + $0x30] sm:$0xff] }
 0x5f6   : > { %2611 = vmatpush1.msra.mxu0 %v3303_v53  ;;  %3312 = vmatprep.mubr.msk.f32.mxu0 %vm2201_vm9, %v2606_v54  ;;  %v2788_v53 = vld [vmem:[%s5447_s11 + $0x28] sm:$0xff]  ;;  %v2787_v54 = vld [vmem:[%s5447_s11 + $0x20] sm:$0xff] }
 0x5f7   : > { %2574 = vmatmul.mubr.f32.vlgmr.msra.gmra.mxu1 %v2504_v55  ;;  %2612 = vmatprep.subr.mxu0 %v3419_v16  ;;  %v2786_v55 = vld [vmem:[%s5447_s11 + $0x18] sm:$0xff] }
 0x5f8   : > { %2711 = vmatprep.subr.mxu1 %v3419_v16  ;;  %2613 = vmatpush1.msra.mxu0 %v3302_v58  ;;  %v2785_v58 = vld [vmem:[%s5447_s11 + $0x10] sm:$0xff] }
 0x5f9   : > { %2712 = vmatpush1.msra.mxu1 %v3328_v56  ;;  %3337 = vmatprep.mubr.msk.f32.mxu1 %vm2201_vm9, %v2707_v60  ;;  %v2784_v56 = vld [vmem:[%s5447_s11 + $0x8] sm:$0xff]  ;;  %v2783_v60 = vld [vmem:[%s5447_s11] sm:$0xff] }
 0x5fa   : > { %2614 = vmatprep.subr.mxu0 %v3419_v16  ;;  %2713 = vmatprep.subr.mxu1 %v3419_v16 }
 0x5fb   : > { %2615 = vmatpush1.msra.mxu0 %v3301_v61  ;;  %2714 = vmatpush1.msra.mxu1 %v3327_v62  ;;  %v2176_v61 = vld [vmem:[%s5446_s10] sm:$0x1] }
 0x5fc   : > { %2616 = vmatprep.subr.mxu0 %v3419_v16  ;;  %2715 = vmatprep.subr.mxu1 %v3419_v16 }
 0x5fd   : > { %2617 = vmatpush1.msra.mxu0 %v3300_v1  ;;  %2716 = vmatpush1.msra.mxu1 %v3326_v59 }
 0x5fe   : > { %2618 = vmatprep.subr.mxu0 %v3419_v16  ;;  %2717 = vmatprep.subr.mxu1 %v3419_v16 }
 0x5ff   : > { %2619 = vmatpush1.msra.mxu0 %v3299_v2  ;;  %2718 = vmatpush1.msra.mxu1 %v3325_v63 }
 0x600   : > { %2620 = vmatprep.subr.mxu0 %v3419_v16  ;;  %2719 = vmatprep.subr.mxu1 %v3419_v16 }
 0x601   : > { %2621 = vmatpush1.msra.mxu0 %v3298_v3  ;;  %2720 = vmatpush1.msra.mxu1 %v3324_v4 }
 0x602   : > { %2622 = vmatprep.subr.mxu0 %v3419_v16  ;;  %2721 = vmatprep.subr.mxu1 %v3419_v16 }
 0x603   : > { %2623 = vmatpush1.msra.mxu0 %v3297_v5  ;;  %2722 = vmatpush1.msra.mxu1 %v3323_v6 }
 0x604   : > { %2624 = vmatprep.subr.mxu0 %v3419_v16  ;;  %2723 = vmatprep.subr.mxu1 %v3419_v16 }
 0x605   : > { %2625 = vmatpush1.msra.mxu0 %v3296_v47  ;;  %2724 = vmatpush1.msra.mxu1 %v3322_v7 }
 0x606   : > { %2626 = vmatprep.subr.mxu0 %v3419_v16  ;;  %2725 = vmatprep.subr.mxu1 %v3419_v16 }
 0x607   : > { %2627 = vmatpush1.msra.mxu0 %v3295_v57  ;;  %2726 = vmatpush1.msra.mxu1 %v3321_v50 }
 0x608   : > { %2628 = vmatprep.subr.mxu0 %v3419_v16  ;;  %2727 = vmatprep.subr.mxu1 %v3419_v16 }
 0x609   : > { %2629 = vmatpush1.msra.mxu0 %v3294_v8  ;;  %2728 = vmatpush1.msra.mxu1 %v3320_v9 }
 0x60a   : > { %2630 = vmatprep.subr.mxu0 %v3419_v16  ;;  %2729 = vmatprep.subr.mxu1 %v3419_v16 }
 0x60b   : > { %2631 = vmatpush1.msra.mxu0 %v3293_v10  ;;  %2730 = vmatpush1.msra.mxu1 %v3319_v11 }
 0x60c   : > { %2632 = vmatprep.subr.mxu0 %v3419_v16  ;;  %2731 = vmatprep.subr.mxu1 %v3419_v16 }
 0x60d   : > { %2633 = vmatpush1.msra.mxu0 %v3292_v12  ;;  %2732 = vmatpush1.msra.mxu1 %v3318_v13  ;;  %v2799_v13 = vld [vmem:[%s5448_s12] sm:$0x1] }
 0x60e   : > { %2634 = vmatprep.subr.mxu0 %v3419_v16  ;;  %2733 = vmatprep.subr.mxu1 %v3419_v16 }
 0x60f   : > { %2635 = vmatpush1.msra.mxu0 %v3291_v14  ;;  %2734 = vmatpush1.msra.mxu1 %v3317_v15 }
 0x610   : > { %2636 = vmatprep.subr.mxu0 %v3419_v16  ;;  %2735 = vmatprep.subr.mxu1 %v3419_v16 }
 0x611   : > { %2637 = vmatpush1.msra.mxu0 %v3290_v17  ;;  %2736 = vmatpush1.msra.mxu1 %v3316_v18 }
 0x612   : > { %2638 = vmatprep.subr.mxu0 %v3419_v16  ;;  %2737 = vmatprep.subr.mxu1 %v3419_v16 }
 0x613   : > { %2639 = vmatpush1.msra.mxu0 %v3289_v19  ;;  %2738 = vmatpush1.msra.mxu1 %v3315_v20 }
 0x614   : > { %2640 = vmatprep.subr.mxu0 %v3419_v16  ;;  %2739 = vmatprep.subr.mxu1 %v3419_v16 }
 0x615   : > { %2641 = vmatpush1.msra.mxu0 %v3288_v21  ;;  %2740 = vmatpush1.msra.mxu1 %v3314_v22 }
 0x616   : > { %2658 = vmatprep.subr.mxu0 %v3419_v16  ;;  %2741 = vmatprep.subr.mxu1 %v3419_v16 }
 0x617   : > { %2659 = vmatpush2.msra.mxu0 %v3311_v23  ;;  %2742 = vmatpush1.msra.mxu1 %v3313_v24 }
 0x618   : > { %2660 = vmatprep.subr.mxu0 %v3419_v16  ;;  %2759 = vmatprep.subr.mxu1 %v3419_v16 }
 0x619   : > { %2661 = vmatpush2.msra.mxu0 %v3310_v25  ;;  %2760 = vmatpush2.msra.mxu1 %v3336_v26 }
 0x61a   : > { %2662 = vmatprep.subr.mxu0 %v3419_v16  ;;  %2761 = vmatprep.subr.mxu1 %v3419_v16 }
 0x61b   : > { %2663 = vmatpush2.msra.mxu0 %v3309_v28  ;;  %2762 = vmatpush2.msra.mxu1 %v3335_v30 }
 0x61c   : > { %2664 = vmatprep.subr.mxu0 %v3419_v16  ;;  %2763 = vmatprep.subr.mxu1 %v3419_v16 }
 0x61d   : > { %2665 = vmatpush2.msra.mxu0 %v3308_v36  ;;  %2764 = vmatpush2.msra.mxu1 %v3334_v37 }
 0x61e   : > { %2666 = vmatprep.subr.mxu0 %v3419_v16  ;;  %2765 = vmatprep.subr.mxu1 %v3419_v16 }
 0x61f   : > { %2667 = vmatpush2.msra.mxu0 %v3307_v38  ;;  %2766 = vmatpush2.msra.mxu1 %v3333_v39 }
 0x620   : > { %2668 = vmatprep.subr.mxu0 %v3419_v16  ;;  %2767 = vmatprep.subr.mxu1 %v3419_v16 }
 0x621   : > { %2669 = vmatpush2.msra.mxu0 %v3306_v40  ;;  %2768 = vmatpush2.msra.mxu1 %v3332_v41 }
 0x622   : > { %2670 = vmatprep.subr.mxu0 %v3419_v16  ;;  %2769 = vmatprep.subr.mxu1 %v3419_v16 }
 0x623   : > { %2671 = vmatpush2.msra.mxu0 %v3305_v42  ;;  %2770 = vmatpush2.msra.mxu1 %v3331_v43 }
 0x624   : > { %2672 = vmatprep.subr.mxu0 %v3419_v16  ;;  %2771 = vmatprep.subr.mxu1 %v3419_v16 }
 0x625   : > { %2673 = vmatpush2.msra.mxu0 %v3304_v44  ;;  %2772 = vmatpush2.msra.mxu1 %v3330_v45 }
 0x626   : > { %2675 = vmatmul.mubr.f32.vlgmr.msra.gmra.mxu0 %v2605_v46  ;;  %2773 = vmatprep.subr.mxu1 %v3419_v16 }
 0x627   : > { %2774 = vmatpush2.msra.mxu1 %v3329_v27  ;;  %3358 = vmatprep.subr.mxu0 %v3419_v16 }
 0x628   : > { %2776 = vmatmul.mubr.f32.vlgmr.msra.gmra.mxu1 %v2706_v29  ;;  %3359 = vmatpush3.msra.mxu0 %v2798_v31 }
 0x629   : > { %3360 = vmatprep.subr.mxu0 %v3419_v16  ;;  %3390 = vmatprep.mubr.msk.f32.mxu0 %vm3420_vm10, %v3419_v16 }
 0x62a   : > { %3361 = vmatpush3.msra.mxu0 %v2797_v32 }
 0x62b   : > { %3362 = vmatprep.subr.mxu0 %v3419_v16 }
 0x62c   : > { %3363 = vmatpush3.msra.mxu0 %v2796_v33 }
 0x62d   : > { %3364 = vmatprep.subr.mxu0 %v3419_v16 }
 0x62e   : > { %3365 = vmatpush3.msra.mxu0 %v2795_v0 }
 0x62f   : > { %3366 = vmatprep.subr.mxu0 %v3419_v16 }
 0x630   : > { %3367 = vmatpush3.msra.mxu0 %v2794_v34 }
 0x631   : > { %3368 = vmatprep.subr.mxu0 %v3419_v16 }
 0x632   : > { %3369 = vmatpush3.msra.mxu0 %v2793_v35 }
 0x633   : > { %3370 = vmatprep.subr.mxu0 %v3419_v16 }
 0x634   : > { %3371 = vmatpush3.msra.mxu0 %v2792_v51 }
 0x635   : > { %3372 = vmatprep.subr.mxu0 %v3419_v16 }
 0x636   : > { %3373 = vmatpush3.msra.mxu0 %v2791_v48 }
 0x637   : > { %3374 = vmatprep.subr.mxu0 %v3419_v16 }
 0x638   : > { %3375 = vmatpush3.msra.mxu0 %v2790_v52 }
 0x639   : > { %3376 = vmatprep.subr.mxu0 %v3419_v16 }
 0x63a   : > { %3377 = vmatpush3.msra.mxu0 %v2789_v49 }
 0x63b   : > { %3378 = vmatprep.subr.mxu0 %v3419_v16 }
 0x63c   : > { %3379 = vmatpush3.msra.mxu0 %v2788_v53 }
 0x63d   : > { %3380 = vmatprep.subr.mxu0 %v3419_v16 }
 0x63e   : > { %3381 = vmatpush3.msra.mxu0 %v2787_v54 }
 0x63f   : > { %3382 = vmatprep.subr.mxu0 %v3419_v16 }
 0x640   : > { %3383 = vmatpush3.msra.mxu0 %v2786_v55 }
 0x641   : > { %3384 = vmatprep.subr.mxu0 %v3419_v16 }
 0x642   : > { %3385 = vmatpush3.msra.mxu0 %v2785_v58 }
 0x643   : > { %3386 = vmatprep.subr.mxu0 %v3419_v16 }
 0x644   : > { %3387 = vmatpush3.msra.mxu0 %v2784_v56 }
 0x645   : > { %3388 = vmatprep.subr.mxu0 %v3419_v16 }
 0x646   : > { %3389 = vmatpush3.msra.mxu0 %v2783_v60 }
 0x683   : > { %v2271_v62 = vpop.f32.mrf.mxu0 }
 0x684   : > { %v2275_v1 = vadd.f32 %v2271_v62, %v2176_v61 }
 0x685   : > { %v2273_v59 = vpop.f32.mrf.mxu0 }
 0x686   : > { %v2373_v2 = vpop.f32.mrf.mxu1 }
 0x687   : > { %v2377_v63 = vadd.f32 %v2373_v2, %v2275_v1 }
 0x688   : > { %v2375_v3 = vpop.f32.mrf.mxu1 }
 0x6b4   : > { %v2474_v4 = vpop.f32.mrf.mxu0 }
 0x6b5   : > { %v2478_v7 = vadd.f32 %v2474_v4, %v2377_v63 }
 0x6b6   : > { %v2476_v5 = vpop.f32.mrf.mxu0 }
 0x6b7   : > { %v2575_v6 = vpop.f32.mrf.mxu1 }
 0x6b8   : > { %v2579_v57 = vadd.f32 %v2575_v6, %v2478_v7 }
 0x6b9   : > { %v2577_v47 = vpop.f32.mrf.mxu1 }
 0x6e6   : > { %v2676_v50 = vpop.f32.mrf.mxu0 }
 0x6e7   : > { %v2680_v8 = vadd.f32 %v2676_v50, %v2579_v57 }
 0x6e8   : > { %v2678_v16 = vpop.f32.mrf.mxu0  ;;  %v2777_v9 = vpop.f32.mrf.mxu1 }
 0x6e9   : > { %v2781_v10 = vadd.f32 %v2777_v9, %v2680_v8 }
 0x6ea   : > { %v2779_v11 = vpop.f32.mrf.mxu1 }
 0x6eb   : > { %v2782_v12 = vmax.f32 %v2781_v10, 0.0 }
 0x6ed   : > { %3391 = vmatmul.mubr.f32.vlgmr.msra.gmra.mxu0 %v2782_v12 }
 0x7ad   : > { %v2866_v14 = vpop.f32.mrf.mxu0 }
 0x7ae   : > { %v2867_v15 = vadd.f32 %v2866_v14, %v2799_v13 }
 0x7af   : > { %v3392_v17 = vpop.f32.mrf.mxu0 }
 0x7b0   : > { %2871 = vst.msk [vmem:[%s436_s27] sm:$0x1] %vm2870_vm11, %v2867_v15 }
 0x7b1 PF: > { %s23_s25 = sadd.s32 1, %s3417_s25  }
 0x7b2   : > { %p20_p4 = scmp.ge.s32.totalorder %s23_s25, 4  }
 0x7b4   :  { %22 = sbr.rel (!%p20_p4) target bundleno = 1 (0x1), region = 117 }

</bundles_post_ra>
